<compile_context>
chip_gen: v7x
topology: tpu7x:2x2x1
jax: 0.10.0
libtpu: 0.0.40
codegen_flags: <defaults>
</compile_context>

<pallas_src>
import functools
import math

import jax
import jax.numpy as jnp
from jax.experimental import pallas as pl
from jax.experimental.pallas import tpu as pltpu


# ------------------------------ fused kernel --------------------------------

def _fused_backbone_kernel(
    patches_ref, patch_w_ref, patch_b_ref, fcn_g_ref, fcn_b_ref,
    head_mask_ref, seg_ref,
    ln1_g_ref, ln1_b_ref, wq_ref, bq_ref, wk_ref, bk_ref, wv_ref, bv_ref,
    aproj_w_ref, aproj_b_ref, ln2_g_ref, ln2_b_ref,
    fc1_w_ref, fc1_b_ref, fc2_w_ref, fc2_b_ref,
    out_w_ref, out_b_ref,
    feats_ref,
    *, batch, n_tok, depth, num_heads, eps):
  """Single grid step: all B*Np tokens resident in VMEM/vregs end-to-end."""

  d_model = patch_w_ref.shape[1]
  inv_d = 1.0 / d_model

  def ln(x, g, b):
    # One-pass stats: E[x], E[x^2]; var = E[x^2] - E[x]^2 (constant 1/D mul).
    mu = jnp.sum(x, axis=-1, keepdims=True) * inv_d
    ex2 = jnp.sum(x * x, axis=-1, keepdims=True) * inv_d
    var = ex2 - mu * mu
    return (x - mu) * jax.lax.rsqrt(var + eps) * g + b

  def mm(a, w, b=None):
    # bf16 at the MXU inputs, f32 accumulation.
    y = jnp.dot(a.astype(jnp.bfloat16), w.astype(jnp.bfloat16),
                preferred_element_type=jnp.float32)
    return y if b is None else y + b

  # Constant masks for block-diagonal per-head attention (read once).
  head_mask = head_mask_ref[...]          # (nh*Np, D)   {0,1} f32
  seg = seg_ref[...]                      # (nh*Np, nh*Np) block-diag ones f32

  # patch embedding + fc_norm over all B*Np rows at once (M = BN).
  x = mm(patches_ref[...], patch_w_ref[...], patch_b_ref[...])      # (BN, D) f32
  x = ln(x, fcn_g_ref[...], fcn_b_ref[...])

  for l in range(depth):                  # static unroll (depth = 2)
    # ---- attention ----
    h1 = ln(x, ln1_g_ref[l], ln1_b_ref[l])
    # q weights pre-scaled by 1/sqrt(dh) at init -> no score scaling below.
    q = mm(h1, wq_ref[l], bq_ref[l])                                 # (BN, D)
    k = mm(h1, wk_ref[l], bk_ref[l])
    v = mm(h1, wv_ref[l], bv_ref[l])

    outs = []
    for b in range(batch):                # static unroll (B = 2); tokens of
      rows = slice(b * n_tok, (b + 1) * n_tok)   # different images never mix.
      # Block-diagonal expansion: row h*Np+t keeps only head h's dh columns of
      # K[t]/V[t].  One matmul then computes every head's scores; no 8-lane
      # head slices, no per-head matmul loop.
      k_blk = jnp.concatenate([k[rows]] * num_heads, axis=0) * head_mask
      v_blk = jnp.concatenate([v[rows]] * num_heads, axis=0) * head_mask
      s = jax.lax.dot_general(
          q[rows].astype(jnp.bfloat16), k_blk.astype(jnp.bfloat16),
          (((1,), (1,)), ((), ())),
          preferred_element_type=jnp.float32)                        # (Np, nh*Np)
      # Softmax is shift-invariant, so the global row max is an exact per-head
      # stabilizer (avoids a segmented max).
      s = s - jnp.max(s, axis=-1, keepdims=True)
      p = jnp.exp(s)
      # Segmented (per-head) row sums via a block-diagonal ones matrix; each
      # lane receives its own head's denominator, ready for broadcast-free div.
      denom = jnp.dot(p, seg, preferred_element_type=jnp.float32)
      p = p * pl.reciprocal(denom, approx=True)
      # P @ V_blk lands each head's output directly in its own dh columns ->
      # heads are merged back into (Np, D) with zero extra ops.
      outs.append(jnp.dot(p.astype(jnp.bfloat16), v_blk.astype(jnp.bfloat16),
                          preferred_element_type=jnp.float32))       # (Np, D)
    o = jnp.concatenate(outs, axis=0)                                # (BN, D)
    # single attention output projection for all BN rows
    x = x + mm(o, aproj_w_ref[l], aproj_b_ref[l])                    # residual

    # ---- MLP ----
    h2 = ln(x, ln2_g_ref[l], ln2_b_ref[l])
    # TODO(synk): PyTorch nn.GELU() default is exact erf; tanh approx used here.
    hmid = jax.nn.gelu(mm(h2, fc1_w_ref[l], fc1_b_ref[l]), approximate=True)
    x = x + mm(hmid, fc2_w_ref[l], fc2_b_ref[l])                     # residual

  # FakeBackbone.proj: Linear(feature_dim, 2048) — lane-dense (BN, 2048) store.
  feats_ref[...] = mm(x, out_w_ref[...], out_b_ref[...]).astype(feats_ref.dtype)


# --------------------------- parameter construction --------------------------

def init_params(key, cfg):
  P = cfg["patch_size"]
  D = cfg["embed_dim"]
  depth = cfg["depth"]
  nh = cfg["num_heads"]
  dh = D // nh
  E = cfg["wave_embed_dim"]
  hidden = cfg["mlp_ratio"] * D
  proj_out = cfg["proj_out"]

  keys = iter(jax.random.split(key, 24))

  def w(shape, scale=0.02, dtype=jnp.float32):
    return (jax.random.normal(next(keys), shape, dtype=jnp.float32)
            * scale).astype(dtype)

  q_scale = 1.0 / math.sqrt(dh)

  return dict(
      # Fourier frequencies for wavelength embedding (DOFA-style).
      wave_freqs=jnp.linspace(1.0, 8.0, E // 2, dtype=jnp.float32),
      # hypernetwork generating patch-embed conv weights from wavelengths
      # TODO(synk): real DOFA uses a transformer-based Dynamic_MLP_OFA weight
      # generator; a single linear hypernetwork is used here.
      wgen_w=w((E, P * P * D)),
      wgen_b=w((P * P * D,)),
      bgen_w=w((E, D)),
      bgen_b=jnp.zeros((D,), jnp.float32),
      # fc_norm
      fcn_g=jnp.ones((1, D), jnp.float32),
      fcn_b=jnp.zeros((1, D), jnp.float32),
      # transformer blocks, stacked along a leading depth axis
      ln1_g=jnp.ones((depth, 1, D), jnp.float32),
      ln1_b=jnp.zeros((depth, 1, D), jnp.float32),
      # q weight/bias pre-scaled by 1/sqrt(dh): removes the in-kernel `* scale`.
      wq=(w((depth, D, D)) * q_scale).astype(jnp.bfloat16),
      bq=jnp.zeros((depth, 1, D), jnp.float32),
      wk=w((depth, D, D), dtype=jnp.bfloat16),
      bk=jnp.zeros((depth, 1, D), jnp.float32),
      wv=w((depth, D, D), dtype=jnp.bfloat16),
      bv=jnp.zeros((depth, 1, D), jnp.float32),
      aproj_w=w((depth, D, D), dtype=jnp.bfloat16),
      aproj_b=jnp.zeros((depth, 1, D), jnp.float32),
      ln2_g=jnp.ones((depth, 1, D), jnp.float32),
      ln2_b=jnp.zeros((depth, 1, D), jnp.float32),
      fc1_w=w((depth, D, hidden), dtype=jnp.bfloat16),
      fc1_b=jnp.zeros((depth, 1, hidden), jnp.float32),
      fc2_w=w((depth, hidden, D), dtype=jnp.bfloat16),
      fc2_b=jnp.zeros((depth, 1, D), jnp.float32),
      # FakeBackbone.proj = nn.Linear(feature_dim, 2048)
      proj_w=w((D, proj_out), dtype=jnp.bfloat16),
      proj_b=jnp.zeros((1, proj_out), jnp.float32),
  )


# --------------------------------- forward ----------------------------------

def fake_backbone_forward(params, pixel_values, *, cfg):
  # layout: NCHW input, matching the PyTorch module.
  B, C, H, W = pixel_values.shape
  P = cfg["patch_size"]
  D = cfg["embed_dim"]
  depth = cfg["depth"]
  nh = cfg["num_heads"]
  dh = D // nh
  hidden = cfg["mlp_ratio"] * D
  proj_out = cfg["proj_out"]

  # wavelengths hard-coded in FakeBackbone.forward
  wavelengths = jnp.array([0.665, 0.56, 0.49], dtype=jnp.float32)

  # --- wavelength-conditioned patch embed weights (tiny hypernetwork, XLA) ---
  freqs = params["wave_freqs"]
  ang = wavelengths[:, None] * freqs[None, :] * (2.0 * math.pi)
  wv_embed = jnp.concatenate([jnp.sin(ang), jnp.cos(ang)], axis=-1)   # (C, E)
  w_rows = wv_embed @ params["wgen_w"] + params["wgen_b"]             # (C, P*P*D)
  patch_w = w_rows.reshape(C * P * P, D).astype(jnp.bfloat16)
  patch_b = (wv_embed.mean(axis=0) @ params["bgen_w"]
             + params["bgen_b"]).reshape(1, D)

  # extract non-overlapping patches, flatten (c, ph, pw) like Conv2d(k=P, s=P)
  nH, nW = H // P, W // P
  Np = nH * nW
  BN = B * Np
  CPP = C * P * P
  HN = nh * Np
  patches = pixel_values.reshape(B, C, nH, P, nW, P)
  patches = patches.transpose(0, 2, 4, 1, 3, 5).reshape(BN, CPP)

  # constant masks for the in-kernel block-diagonal (per-head) attention
  r = jnp.arange(HN)
  head_mask = (r[:, None] // Np == jnp.arange(D)[None, :] // dh).astype(jnp.float32)
  seg = (r[:, None] // Np == r[None, :] // Np).astype(jnp.float32)

  const2 = lambda shape: pl.BlockSpec(shape, lambda i: (0, 0))
  const3 = lambda shape: pl.BlockSpec(shape, lambda i: (0, 0, 0))

  # Single grid step: all B*Np tokens feed every dense matmul (max M per push).
  grid_spec = pltpu.PrefetchScalarGridSpec(
      num_scalar_prefetch=0,
      grid=(1,),
      in_specs=[
          const2((BN, CPP)),                                      # patches
          const2((CPP, D)), const2((1, D)),                       # patch w/b
          const2((1, D)), const2((1, D)),                         # fc_norm g/b
          const2((HN, D)), const2((HN, HN)),                      # head_mask, seg
          const3((depth, 1, D)), const3((depth, 1, D)),           # ln1 g/b
          const3((depth, D, D)), const3((depth, 1, D)),           # wq/bq (pre-scaled)
          const3((depth, D, D)), const3((depth, 1, D)),           # wk/bk
          const3((depth, D, D)), const3((depth, 1, D)),           # wv/bv
          const3((depth, D, D)), const3((depth, 1, D)),           # attn proj w/b
          const3((depth, 1, D)), const3((depth, 1, D)),           # ln2 g/b
          const3((depth, D, hidden)), const3((depth, 1, hidden)), # fc1 w/b
          const3((depth, hidden, D)), const3((depth, 1, D)),      # fc2 w/b
          const2((D, proj_out)), const2((1, proj_out)),           # final proj w/b
      ],
      out_specs=pl.BlockSpec((BN, proj_out), lambda i: (0, 0)),
  )

  operands = (
      patches, patch_w, patch_b, params["fcn_g"], params["fcn_b"],
      head_mask, seg,
      params["ln1_g"], params["ln1_b"],
      params["wq"], params["bq"], params["wk"], params["bk"],
      params["wv"], params["bv"],
      params["aproj_w"], params["aproj_b"],
      params["ln2_g"], params["ln2_b"],
      params["fc1_w"], params["fc1_b"], params["fc2_w"], params["fc2_b"],
      params["proj_w"], params["proj_b"],
  )

  # Advisory cost estimate so XLA schedules hypernetwork / transpose around us.
  flops = int(
      2 * BN * CPP * D
      + depth * (4 * 2 * BN * D * D                                   # q,k,v,proj
                 + B * (2 * Np * D * HN + 2 * Np * HN * HN + 2 * Np * HN * D)
                 + 2 * 2 * BN * D * hidden)                           # fc1 + fc2
      + 2 * BN * D * proj_out)
  transcendentals = int(depth * (BN * HN + BN * hidden))
  bytes_accessed = int(sum(op.size * op.dtype.itemsize for op in operands)
                       + BN * proj_out * 4)

  feats = pl.pallas_call(
      functools.partial(_fused_backbone_kernel, batch=B, n_tok=Np,
                        depth=depth, num_heads=nh, eps=1e-6),
      out_shape=jax.ShapeDtypeStruct((BN, proj_out), jnp.float32),
      grid_spec=grid_spec,
      compiler_params=pltpu.CompilerParams(
          dimension_semantics=("arbitrary",)),
      cost_estimate=pl.CostEstimate(flops=flops,
                                    transcendentals=transcendentals,
                                    bytes_accessed=bytes_accessed),
  )(*operands)

  # permute(0, 2, 1).view(B, 2048, h, w) — kept outside the kernel (module
  # semantics require NCHW); kernel output stays lane-dense (BN, 2048).
  feats = feats.reshape(B, Np, proj_out)
  h = w = int(round(math.sqrt(Np)))
  features = feats.transpose(0, 2, 1).reshape(B, proj_out, h, w)

  mask = jnp.zeros((B, h, w), dtype=jnp.bool_)
  object_queries_list = [jnp.zeros((B, 256, 1), dtype=jnp.float32)]
  return ([(features, mask)], object_queries_list)


# ----------------------------------- main ------------------------------------

if __name__ == "__main__":
  key = jax.random.PRNGKey(0)
  k_params, k_input = jax.random.split(key)

  # B=2, C=3 (3 wavelengths), 16x16 image, patch=4 -> 16 tokens/image,
  # feature_dim=32, 4 heads, proj -> 2048, h=w=4.
  cfg = dict(patch_size=4, embed_dim=32, depth=2, num_heads=4, mlp_ratio=4,
             wave_embed_dim=16, proj_out=2048)
  params = init_params(k_params, cfg)
  pixel_values = jax.random.normal(k_input, (2, 3, 16, 16), dtype=jnp.float32)

  fwd = jax.jit(functools.partial(fake_backbone_forward, cfg=cfg))
  (feature_maps, object_queries_list) = fwd(params, pixel_values)
  features, mask = feature_maps[0]
  queries = object_queries_list[0]

  jax.block_until_ready(features)
  jax.block_until_ready(mask)
  jax.block_until_ready(queries)

  assert features.shape == (2, 2048, 4, 4), features.shape
  assert features.dtype == jnp.float32
  assert mask.shape == (2, 4, 4) and mask.dtype == jnp.bool_
  assert queries.shape == (2, 256, 1)
  assert bool(jnp.all(jnp.isfinite(features)))

  print("KERNEL_OK")
</pallas_src>

<mosaic_0001>
module attributes {stable_mosaic.version = 11 : i64} {
  func.func @_fused_backbone_kernel(%arg0: i32, %arg1: memref<32x48xf32, #tpu.memory_space<vmem>>, %arg2: memref<48x32xbf16, #tpu.memory_space<vmem>>, %arg3: memref<1x32xf32, #tpu.memory_space<vmem>>, %arg4: memref<1x32xf32, #tpu.memory_space<vmem>>, %arg5: memref<1x32xf32, #tpu.memory_space<vmem>>, %arg6: memref<64x32xf32, #tpu.memory_space<vmem>>, %arg7: memref<64x64xf32, #tpu.memory_space<vmem>>, %arg8: memref<2x1x32xf32, #tpu.memory_space<vmem>>, %arg9: memref<2x1x32xf32, #tpu.memory_space<vmem>>, %arg10: memref<2x32x32xbf16, #tpu.memory_space<vmem>>, %arg11: memref<2x1x32xf32, #tpu.memory_space<vmem>>, %arg12: memref<2x32x32xbf16, #tpu.memory_space<vmem>>, %arg13: memref<2x1x32xf32, #tpu.memory_space<vmem>>, %arg14: memref<2x32x32xbf16, #tpu.memory_space<vmem>>, %arg15: memref<2x1x32xf32, #tpu.memory_space<vmem>>, %arg16: memref<2x32x32xbf16, #tpu.memory_space<vmem>>, %arg17: memref<2x1x32xf32, #tpu.memory_space<vmem>>, %arg18: memref<2x1x32xf32, #tpu.memory_space<vmem>>, %arg19: memref<2x1x32xf32, #tpu.memory_space<vmem>>, %arg20: memref<2x32x128xbf16, #tpu.memory_space<vmem>>, %arg21: memref<2x1x128xf32, #tpu.memory_space<vmem>>, %arg22: memref<2x128x32xbf16, #tpu.memory_space<vmem>>, %arg23: memref<2x1x32xf32, #tpu.memory_space<vmem>>, %arg24: memref<32x2048xbf16, #tpu.memory_space<vmem>>, %arg25: memref<1x2048xf32, #tpu.memory_space<vmem>>, %arg26: memref<32x2048xf32, #tpu.memory_space<vmem>>) attributes {dimension_semantics = [#tpu.dimension_semantics<arbitrary>], iteration_bounds = array<i64: 1>, scalar_prefetch = 0 : i64, scratch_operands = 0 : i64, tpu.core_type = #tpu.core_type<tc>, window_params = [{pipeline_mode = #tpu.pipeline_mode<synchronous>, transform_indices = @transform_0, window_bounds = array<i64: 32, 48>}, {pipeline_mode = #tpu.pipeline_mode<synchronous>, transform_indices = @transform_1, window_bounds = array<i64: 48, 32>}, {pipeline_mode = #tpu.pipeline_mode<synchronous>, transform_indices = @transform_2, window_bounds = array<i64: 1, 32>}, {pipeline_mode = #tpu.pipeline_mode<synchronous>, transform_indices = @transform_3, window_bounds = array<i64: 1, 32>}, {pipeline_mode = #tpu.pipeline_mode<synchronous>, transform_indices = @transform_4, window_bounds = array<i64: 1, 32>}, {pipeline_mode = #tpu.pipeline_mode<synchronous>, transform_indices = @transform_5, window_bounds = array<i64: 64, 32>}, {pipeline_mode = #tpu.pipeline_mode<synchronous>, transform_indices = @transform_6, window_bounds = array<i64: 64, 64>}, {pipeline_mode = #tpu.pipeline_mode<synchronous>, transform_indices = @transform_7, window_bounds = array<i64: 2, 1, 32>}, {pipeline_mode = #tpu.pipeline_mode<synchronous>, transform_indices = @transform_8, window_bounds = array<i64: 2, 1, 32>}, {pipeline_mode = #tpu.pipeline_mode<synchronous>, transform_indices = @transform_9, window_bounds = array<i64: 2, 32, 32>}, {pipeline_mode = #tpu.pipeline_mode<synchronous>, transform_indices = @transform_10, window_bounds = array<i64: 2, 1, 32>}, {pipeline_mode = #tpu.pipeline_mode<synchronous>, transform_indices = @transform_11, window_bounds = array<i64: 2, 32, 32>}, {pipeline_mode = #tpu.pipeline_mode<synchronous>, transform_indices = @transform_12, window_bounds = array<i64: 2, 1, 32>}, {pipeline_mode = #tpu.pipeline_mode<synchronous>, transform_indices = @transform_13, window_bounds = array<i64: 2, 32, 32>}, {pipeline_mode = #tpu.pipeline_mode<synchronous>, transform_indices = @transform_14, window_bounds = array<i64: 2, 1, 32>}, {pipeline_mode = #tpu.pipeline_mode<synchronous>, transform_indices = @transform_15, window_bounds = array<i64: 2, 32, 32>}, {pipeline_mode = #tpu.pipeline_mode<synchronous>, transform_indices = @transform_16, window_bounds = array<i64: 2, 1, 32>}, {pipeline_mode = #tpu.pipeline_mode<synchronous>, transform_indices = @transform_17, window_bounds = array<i64: 2, 1, 32>}, {pipeline_mode = #tpu.pipeline_mode<synchronous>, transform_indices = @transform_18, window_bounds = array<i64: 2, 1, 32>}, {pipeline_mode = #tpu.pipeline_mode<synchronous>, transform_indices = @transform_19, window_bounds = array<i64: 2, 32, 128>}, {pipeline_mode = #tpu.pipeline_mode<synchronous>, transform_indices = @transform_20, window_bounds = array<i64: 2, 1, 128>}, {pipeline_mode = #tpu.pipeline_mode<synchronous>, transform_indices = @transform_21, window_bounds = array<i64: 2, 128, 32>}, {pipeline_mode = #tpu.pipeline_mode<synchronous>, transform_indices = @transform_22, window_bounds = array<i64: 2, 1, 32>}, {pipeline_mode = #tpu.pipeline_mode<synchronous>, transform_indices = @transform_23, window_bounds = array<i64: 32, 2048>}, {pipeline_mode = #tpu.pipeline_mode<synchronous>, transform_indices = @transform_24, window_bounds = array<i64: 1, 2048>}, {pipeline_mode = #tpu.pipeline_mode<synchronous>, transform_indices = @transform_25, window_bounds = array<i64: 32, 2048>}]} {
    %c0 = arith.constant 0 : index
    %c0_0 = arith.constant 0 : index
    %0 = vector.load %arg6[%c0, %c0_0] : memref<64x32xf32, #tpu.memory_space<vmem>>, vector<64x32xf32>
    %c0_1 = arith.constant 0 : index
    %c0_2 = arith.constant 0 : index
    %1 = vector.load %arg7[%c0_1, %c0_2] : memref<64x64xf32, #tpu.memory_space<vmem>>, vector<64x64xf32>
    %c0_3 = arith.constant 0 : index
    %c0_4 = arith.constant 0 : index
    %2 = vector.load %arg1[%c0_3, %c0_4] : memref<32x48xf32, #tpu.memory_space<vmem>>, vector<32x48xf32>
    %c0_5 = arith.constant 0 : index
    %c0_6 = arith.constant 0 : index
    %3 = vector.load %arg2[%c0_5, %c0_6] : memref<48x32xbf16, #tpu.memory_space<vmem>>, vector<48x32xbf16>
    %c0_7 = arith.constant 0 : index
    %c0_8 = arith.constant 0 : index
    %4 = vector.load %arg3[%c0_7, %c0_8] : memref<1x32xf32, #tpu.memory_space<vmem>>, vector<1x32xf32>
    %5 = arith.truncf %2 : vector<32x48xf32> to vector<32x48xbf16>
    %cst = arith.constant dense<0.000000e+00> : vector<32x32xf32>
    %6 = tpu.matmul %5, %3, %cst {dimension_numbers = #tpu.dot_dimension_numbers<[1], [0], [0], [1], [0, 0, 1, 1], [], []>} : vector<32x48xbf16>, vector<48x32xbf16>, vector<32x32xf32> -> vector<32x32xf32>
    %7 = vector.broadcast %4 : vector<1x32xf32> to vector<32x32xf32>
    %8 = arith.addf %6, %7 : vector<32x32xf32>
    %c0_9 = arith.constant 0 : index
    %c0_10 = arith.constant 0 : index
    %9 = vector.load %arg4[%c0_9, %c0_10] : memref<1x32xf32, #tpu.memory_space<vmem>>, vector<1x32xf32>
    %c0_11 = arith.constant 0 : index
    %c0_12 = arith.constant 0 : index
    %10 = vector.load %arg5[%c0_11, %c0_12] : memref<1x32xf32, #tpu.memory_space<vmem>>, vector<1x32xf32>
    %cst_13 = arith.constant dense<0.000000e+00> : vector<32xf32>
    %11 = vector.multi_reduction <add>, %8, %cst_13 [1] : vector<32x32xf32> to vector<32xf32>
    %12 = vector.shape_cast %11 : vector<32xf32> to vector<32x1xf32>
    %cst_14 = arith.constant 3.125000e-02 : f32
    %13 = vector.broadcast %cst_14 : f32 to vector<32x1xf32>
    %14 = arith.mulf %12, %13 : vector<32x1xf32>
    %15 = arith.mulf %8, %8 : vector<32x32xf32>
    %cst_15 = arith.constant dense<0.000000e+00> : vector<32xf32>
    %16 = vector.multi_reduction <add>, %15, %cst_15 [1] : vector<32x32xf32> to vector<32xf32>
    %17 = vector.shape_cast %16 : vector<32xf32> to vector<32x1xf32>
    %cst_16 = arith.constant 3.125000e-02 : f32
    %18 = vector.broadcast %cst_16 : f32 to vector<32x1xf32>
    %19 = arith.mulf %17, %18 : vector<32x1xf32>
    %20 = arith.mulf %14, %14 : vector<32x1xf32>
    %21 = arith.subf %19, %20 : vector<32x1xf32>
    %22 = vector.broadcast %14 : vector<32x1xf32> to vector<32x32xf32>
    %23 = arith.subf %8, %22 : vector<32x32xf32>
    %cst_17 = arith.constant 9.99999997E-7 : f32
    %24 = vector.broadcast %cst_17 : f32 to vector<32x1xf32>
    %25 = arith.addf %21, %24 : vector<32x1xf32>
    %26 = math.rsqrt %25 : vector<32x1xf32>
    %27 = vector.broadcast %26 : vector<32x1xf32> to vector<32x32xf32>
    %28 = arith.mulf %23, %27 : vector<32x32xf32>
    %29 = vector.broadcast %9 : vector<1x32xf32> to vector<32x32xf32>
    %30 = arith.mulf %28, %29 : vector<32x32xf32>
    %31 = vector.broadcast %10 : vector<1x32xf32> to vector<32x32xf32>
    %32 = arith.addf %30, %31 : vector<32x32xf32>
    %c0_18 = arith.constant 0 : index
    %c0_19 = arith.constant 0 : index
    %c0_20 = arith.constant 0 : index
    %33 = vector.load %arg8[%c0_18, %c0_19, %c0_20] : memref<2x1x32xf32, #tpu.memory_space<vmem>>, vector<1x1x32xf32>
    %34 = vector.shape_cast %33 : vector<1x1x32xf32> to vector<1x32xf32>
    %c0_21 = arith.constant 0 : index
    %c0_22 = arith.constant 0 : index
    %c0_23 = arith.constant 0 : index
    %35 = vector.load %arg9[%c0_21, %c0_22, %c0_23] : memref<2x1x32xf32, #tpu.memory_space<vmem>>, vector<1x1x32xf32>
    %36 = vector.shape_cast %35 : vector<1x1x32xf32> to vector<1x32xf32>
    %cst_24 = arith.constant dense<0.000000e+00> : vector<32xf32>
    %37 = vector.multi_reduction <add>, %32, %cst_24 [1] : vector<32x32xf32> to vector<32xf32>
    %38 = vector.shape_cast %37 : vector<32xf32> to vector<32x1xf32>
    %cst_25 = arith.constant 3.125000e-02 : f32
    %39 = vector.broadcast %cst_25 : f32 to vector<32x1xf32>
    %40 = arith.mulf %38, %39 : vector<32x1xf32>
    %41 = arith.mulf %32, %32 : vector<32x32xf32>
    %cst_26 = arith.constant dense<0.000000e+00> : vector<32xf32>
    %42 = vector.multi_reduction <add>, %41, %cst_26 [1] : vector<32x32xf32> to vector<32xf32>
    %43 = vector.shape_cast %42 : vector<32xf32> to vector<32x1xf32>
    %cst_27 = arith.constant 3.125000e-02 : f32
    %44 = vector.broadcast %cst_27 : f32 to vector<32x1xf32>
    %45 = arith.mulf %43, %44 : vector<32x1xf32>
    %46 = arith.mulf %40, %40 : vector<32x1xf32>
    %47 = arith.subf %45, %46 : vector<32x1xf32>
    %48 = vector.broadcast %40 : vector<32x1xf32> to vector<32x32xf32>
    %49 = arith.subf %32, %48 : vector<32x32xf32>
    %cst_28 = arith.constant 9.99999997E-7 : f32
    %50 = vector.broadcast %cst_28 : f32 to vector<32x1xf32>
    %51 = arith.addf %47, %50 : vector<32x1xf32>
    %52 = math.rsqrt %51 : vector<32x1xf32>
    %53 = vector.broadcast %52 : vector<32x1xf32> to vector<32x32xf32>
    %54 = arith.mulf %49, %53 : vector<32x32xf32>
    %55 = vector.broadcast %34 : vector<1x32xf32> to vector<32x32xf32>
    %56 = arith.mulf %54, %55 : vector<32x32xf32>
    %57 = vector.broadcast %36 : vector<1x32xf32> to vector<32x32xf32>
    %58 = arith.addf %56, %57 : vector<32x32xf32>
    %c0_29 = arith.constant 0 : index
    %c0_30 = arith.constant 0 : index
    %c0_31 = arith.constant 0 : index
    %59 = vector.load %arg10[%c0_29, %c0_30, %c0_31] : memref<2x32x32xbf16, #tpu.memory_space<vmem>>, vector<1x32x32xbf16>
    %60 = vector.shape_cast %59 : vector<1x32x32xbf16> to vector<32x32xbf16>
    %c0_32 = arith.constant 0 : index
    %c0_33 = arith.constant 0 : index
    %c0_34 = arith.constant 0 : index
    %61 = vector.load %arg11[%c0_32, %c0_33, %c0_34] : memref<2x1x32xf32, #tpu.memory_space<vmem>>, vector<1x1x32xf32>
    %62 = vector.shape_cast %61 : vector<1x1x32xf32> to vector<1x32xf32>
    %63 = arith.truncf %58 : vector<32x32xf32> to vector<32x32xbf16>
    %cst_35 = arith.constant dense<0.000000e+00> : vector<32x32xf32>
    %64 = tpu.matmul %63, %60, %cst_35 {dimension_numbers = #tpu.dot_dimension_numbers<[1], [0], [0], [1], [0, 0, 1, 1], [], []>} : vector<32x32xbf16>, vector<32x32xbf16>, vector<32x32xf32> -> vector<32x32xf32>
    %65 = vector.broadcast %62 : vector<1x32xf32> to vector<32x32xf32>
    %66 = arith.addf %64, %65 : vector<32x32xf32>
    %c0_36 = arith.constant 0 : index
    %c0_37 = arith.constant 0 : index
    %c0_38 = arith.constant 0 : index
    %67 = vector.load %arg12[%c0_36, %c0_37, %c0_38] : memref<2x32x32xbf16, #tpu.memory_space<vmem>>, vector<1x32x32xbf16>
    %68 = vector.shape_cast %67 : vector<1x32x32xbf16> to vector<32x32xbf16>
    %c0_39 = arith.constant 0 : index
    %c0_40 = arith.constant 0 : index
    %c0_41 = arith.constant 0 : index
    %69 = vector.load %arg13[%c0_39, %c0_40, %c0_41] : memref<2x1x32xf32, #tpu.memory_space<vmem>>, vector<1x1x32xf32>
    %70 = vector.shape_cast %69 : vector<1x1x32xf32> to vector<1x32xf32>
    %71 = arith.truncf %58 : vector<32x32xf32> to vector<32x32xbf16>
    %cst_42 = arith.constant dense<0.000000e+00> : vector<32x32xf32>
    %72 = tpu.matmul %71, %68, %cst_42 {dimension_numbers = #tpu.dot_dimension_numbers<[1], [0], [0], [1], [0, 0, 1, 1], [], []>} : vector<32x32xbf16>, vector<32x32xbf16>, vector<32x32xf32> -> vector<32x32xf32>
    %73 = vector.broadcast %70 : vector<1x32xf32> to vector<32x32xf32>
    %74 = arith.addf %72, %73 : vector<32x32xf32>
    %c0_43 = arith.constant 0 : index
    %c0_44 = arith.constant 0 : index
    %c0_45 = arith.constant 0 : index
    %75 = vector.load %arg14[%c0_43, %c0_44, %c0_45] : memref<2x32x32xbf16, #tpu.memory_space<vmem>>, vector<1x32x32xbf16>
    %76 = vector.shape_cast %75 : vector<1x32x32xbf16> to vector<32x32xbf16>
    %c0_46 = arith.constant 0 : index
    %c0_47 = arith.constant 0 : index
    %c0_48 = arith.constant 0 : index
    %77 = vector.load %arg15[%c0_46, %c0_47, %c0_48] : memref<2x1x32xf32, #tpu.memory_space<vmem>>, vector<1x1x32xf32>
    %78 = vector.shape_cast %77 : vector<1x1x32xf32> to vector<1x32xf32>
    %79 = arith.truncf %58 : vector<32x32xf32> to vector<32x32xbf16>
    %cst_49 = arith.constant dense<0.000000e+00> : vector<32x32xf32>
    %80 = tpu.matmul %79, %76, %cst_49 {dimension_numbers = #tpu.dot_dimension_numbers<[1], [0], [0], [1], [0, 0, 1, 1], [], []>} : vector<32x32xbf16>, vector<32x32xbf16>, vector<32x32xf32> -> vector<32x32xf32>
    %81 = vector.broadcast %78 : vector<1x32xf32> to vector<32x32xf32>
    %82 = arith.addf %80, %81 : vector<32x32xf32>
    %83 = vector.extract_strided_slice %74 {offsets = [0, 0], sizes = [16, 32], strides = [1, 1]} : vector<32x32xf32> to vector<16x32xf32>
    %84 = tpu.concatenate %83, %83, %83, %83 in 0 : vector<16x32xf32>, vector<16x32xf32>, vector<16x32xf32>, vector<16x32xf32> -> vector<64x32xf32>
    %85 = arith.mulf %84, %0 : vector<64x32xf32>
    %86 = vector.extract_strided_slice %82 {offsets = [0, 0], sizes = [16, 32], strides = [1, 1]} : vector<32x32xf32> to vector<16x32xf32>
    %87 = tpu.concatenate %86, %86, %86, %86 in 0 : vector<16x32xf32>, vector<16x32xf32>, vector<16x32xf32>, vector<16x32xf32> -> vector<64x32xf32>
    %88 = arith.mulf %87, %0 : vector<64x32xf32>
    %89 = vector.extract_strided_slice %66 {offsets = [0, 0], sizes = [16, 32], strides = [1, 1]} : vector<32x32xf32> to vector<16x32xf32>
    %90 = arith.truncf %89 : vector<16x32xf32> to vector<16x32xbf16>
    %91 = arith.truncf %85 : vector<64x32xf32> to vector<64x32xbf16>
    %cst_50 = arith.constant dense<0.000000e+00> : vector<16x64xf32>
    %92 = tpu.matmul %90, %91, %cst_50 {dimension_numbers = #tpu.dot_dimension_numbers<[1], [1], [0], [0], [0, 0, 1, 0], [], []>} : vector<16x32xbf16>, vector<64x32xbf16>, vector<16x64xf32> -> vector<16x64xf32>
    %cst_51 = arith.constant dense<0xFF800000> : vector<16xf32>
    %93 = vector.multi_reduction <maximumf>, %92, %cst_51 [1] : vector<16x64xf32> to vector<16xf32>
    %94 = vector.shape_cast %93 : vector<16xf32> to vector<16x1xf32>
    %95 = vector.broadcast %94 : vector<16x1xf32> to vector<16x64xf32>
    %96 = arith.subf %92, %95 : vector<16x64xf32>
    %97 = math.exp %96 : vector<16x64xf32>
    %cst_52 = arith.constant dense<0.000000e+00> : vector<16x64xf32>
    %98 = tpu.matmul %97, %1, %cst_52 {dimension_numbers = #tpu.dot_dimension_numbers<[1], [0], [0], [1], [0, 0, 1, 1], [], []>} : vector<16x64xf32>, vector<64x64xf32>, vector<16x64xf32> -> vector<16x64xf32>
    %99 = tpu.reciprocal %98 {approx = true} : vector<16x64xf32> -> vector<16x64xf32>
    %100 = arith.mulf %97, %99 : vector<16x64xf32>
    %101 = arith.truncf %100 : vector<16x64xf32> to vector<16x64xbf16>
    %102 = arith.truncf %88 : vector<64x32xf32> to vector<64x32xbf16>
    %cst_53 = arith.constant dense<0.000000e+00> : vector<16x32xf32>
    %103 = tpu.matmul %101, %102, %cst_53 {dimension_numbers = #tpu.dot_dimension_numbers<[1], [0], [0], [1], [0, 0, 1, 1], [], []>} : vector<16x64xbf16>, vector<64x32xbf16>, vector<16x32xf32> -> vector<16x32xf32>
    %104 = vector.extract_strided_slice %74 {offsets = [16, 0], sizes = [16, 32], strides = [1, 1]} : vector<32x32xf32> to vector<16x32xf32>
    %105 = tpu.concatenate %104, %104, %104, %104 in 0 : vector<16x32xf32>, vector<16x32xf32>, vector<16x32xf32>, vector<16x32xf32> -> vector<64x32xf32>
    %106 = arith.mulf %105, %0 : vector<64x32xf32>
    %107 = vector.extract_strided_slice %82 {offsets = [16, 0], sizes = [16, 32], strides = [1, 1]} : vector<32x32xf32> to vector<16x32xf32>
    %108 = tpu.concatenate %107, %107, %107, %107 in 0 : vector<16x32xf32>, vector<16x32xf32>, vector<16x32xf32>, vector<16x32xf32> -> vector<64x32xf32>
    %109 = arith.mulf %108, %0 : vector<64x32xf32>
    %110 = vector.extract_strided_slice %66 {offsets = [16, 0], sizes = [16, 32], strides = [1, 1]} : vector<32x32xf32> to vector<16x32xf32>
    %111 = arith.truncf %110 : vector<16x32xf32> to vector<16x32xbf16>
    %112 = arith.truncf %106 : vector<64x32xf32> to vector<64x32xbf16>
    %cst_54 = arith.constant dense<0.000000e+00> : vector<16x64xf32>
    %113 = tpu.matmul %111, %112, %cst_54 {dimension_numbers = #tpu.dot_dimension_numbers<[1], [1], [0], [0], [0, 0, 1, 0], [], []>} : vector<16x32xbf16>, vector<64x32xbf16>, vector<16x64xf32> -> vector<16x64xf32>
    %cst_55 = arith.constant dense<0xFF800000> : vector<16xf32>
    %114 = vector.multi_reduction <maximumf>, %113, %cst_55 [1] : vector<16x64xf32> to vector<16xf32>
    %115 = vector.shape_cast %114 : vector<16xf32> to vector<16x1xf32>
    %116 = vector.broadcast %115 : vector<16x1xf32> to vector<16x64xf32>
    %117 = arith.subf %113, %116 : vector<16x64xf32>
    %118 = math.exp %117 : vector<16x64xf32>
    %cst_56 = arith.constant dense<0.000000e+00> : vector<16x64xf32>
    %119 = tpu.matmul %118, %1, %cst_56 {dimension_numbers = #tpu.dot_dimension_numbers<[1], [0], [0], [1], [0, 0, 1, 1], [], []>} : vector<16x64xf32>, vector<64x64xf32>, vector<16x64xf32> -> vector<16x64xf32>
    %120 = tpu.reciprocal %119 {approx = true} : vector<16x64xf32> -> vector<16x64xf32>
    %121 = arith.mulf %118, %120 : vector<16x64xf32>
    %122 = arith.truncf %121 : vector<16x64xf32> to vector<16x64xbf16>
    %123 = arith.truncf %109 : vector<64x32xf32> to vector<64x32xbf16>
    %cst_57 = arith.constant dense<0.000000e+00> : vector<16x32xf32>
    %124 = tpu.matmul %122, %123, %cst_57 {dimension_numbers = #tpu.dot_dimension_numbers<[1], [0], [0], [1], [0, 0, 1, 1], [], []>} : vector<16x64xbf16>, vector<64x32xbf16>, vector<16x32xf32> -> vector<16x32xf32>
    %125 = tpu.concatenate %103, %124 in 0 : vector<16x32xf32>, vector<16x32xf32> -> vector<32x32xf32>
    %c0_58 = arith.constant 0 : index
    %c0_59 = arith.constant 0 : index
    %c0_60 = arith.constant 0 : index
    %126 = vector.load %arg16[%c0_58, %c0_59, %c0_60] : memref<2x32x32xbf16, #tpu.memory_space<vmem>>, vector<1x32x32xbf16>
    %127 = vector.shape_cast %126 : vector<1x32x32xbf16> to vector<32x32xbf16>
    %c0_61 = arith.constant 0 : index
    %c0_62 = arith.constant 0 : index
    %c0_63 = arith.constant 0 : index
    %128 = vector.load %arg17[%c0_61, %c0_62, %c0_63] : memref<2x1x32xf32, #tpu.memory_space<vmem>>, vector<1x1x32xf32>
    %129 = vector.shape_cast %128 : vector<1x1x32xf32> to vector<1x32xf32>
    %130 = arith.truncf %125 : vector<32x32xf32> to vector<32x32xbf16>
    %cst_64 = arith.constant dense<0.000000e+00> : vector<32x32xf32>
    %131 = tpu.matmul %130, %127, %cst_64 {dimension_numbers = #tpu.dot_dimension_numbers<[1], [0], [0], [1], [0, 0, 1, 1], [], []>} : vector<32x32xbf16>, vector<32x32xbf16>, vector<32x32xf32> -> vector<32x32xf32>
    %132 = vector.broadcast %129 : vector<1x32xf32> to vector<32x32xf32>
    %133 = arith.addf %131, %132 : vector<32x32xf32>
    %134 = arith.addf %32, %133 : vector<32x32xf32>
    %c0_65 = arith.constant 0 : index
    %c0_66 = arith.constant 0 : index
    %c0_67 = arith.constant 0 : index
    %135 = vector.load %arg18[%c0_65, %c0_66, %c0_67] : memref<2x1x32xf32, #tpu.memory_space<vmem>>, vector<1x1x32xf32>
    %136 = vector.shape_cast %135 : vector<1x1x32xf32> to vector<1x32xf32>
    %c0_68 = arith.constant 0 : index
    %c0_69 = arith.constant 0 : index
    %c0_70 = arith.constant 0 : index
    %137 = vector.load %arg19[%c0_68, %c0_69, %c0_70] : memref<2x1x32xf32, #tpu.memory_space<vmem>>, vector<1x1x32xf32>
    %138 = vector.shape_cast %137 : vector<1x1x32xf32> to vector<1x32xf32>
    %cst_71 = arith.constant dense<0.000000e+00> : vector<32xf32>
    %139 = vector.multi_reduction <add>, %134, %cst_71 [1] : vector<32x32xf32> to vector<32xf32>
    %140 = vector.shape_cast %139 : vector<32xf32> to vector<32x1xf32>
    %cst_72 = arith.constant 3.125000e-02 : f32
    %141 = vector.broadcast %cst_72 : f32 to vector<32x1xf32>
    %142 = arith.mulf %140, %141 : vector<32x1xf32>
    %143 = arith.mulf %134, %134 : vector<32x32xf32>
    %cst_73 = arith.constant dense<0.000000e+00> : vector<32xf32>
    %144 = vector.multi_reduction <add>, %143, %cst_73 [1] : vector<32x32xf32> to vector<32xf32>
    %145 = vector.shape_cast %144 : vector<32xf32> to vector<32x1xf32>
    %cst_74 = arith.constant 3.125000e-02 : f32
    %146 = vector.broadcast %cst_74 : f32 to vector<32x1xf32>
    %147 = arith.mulf %145, %146 : vector<32x1xf32>
    %148 = arith.mulf %142, %142 : vector<32x1xf32>
    %149 = arith.subf %147, %148 : vector<32x1xf32>
    %150 = vector.broadcast %142 : vector<32x1xf32> to vector<32x32xf32>
    %151 = arith.subf %134, %150 : vector<32x32xf32>
    %cst_75 = arith.constant 9.99999997E-7 : f32
    %152 = vector.broadcast %cst_75 : f32 to vector<32x1xf32>
    %153 = arith.addf %149, %152 : vector<32x1xf32>
    %154 = math.rsqrt %153 : vector<32x1xf32>
    %155 = vector.broadcast %154 : vector<32x1xf32> to vector<32x32xf32>
    %156 = arith.mulf %151, %155 : vector<32x32xf32>
    %157 = vector.broadcast %136 : vector<1x32xf32> to vector<32x32xf32>
    %158 = arith.mulf %156, %157 : vector<32x32xf32>
    %159 = vector.broadcast %138 : vector<1x32xf32> to vector<32x32xf32>
    %160 = arith.addf %158, %159 : vector<32x32xf32>
    %c0_76 = arith.constant 0 : index
    %c0_77 = arith.constant 0 : index
    %c0_78 = arith.constant 0 : index
    %161 = vector.load %arg20[%c0_76, %c0_77, %c0_78] : memref<2x32x128xbf16, #tpu.memory_space<vmem>>, vector<1x32x128xbf16>
    %162 = vector.shape_cast %161 : vector<1x32x128xbf16> to vector<32x128xbf16>
    %c0_79 = arith.constant 0 : index
    %c0_80 = arith.constant 0 : index
    %c0_81 = arith.constant 0 : index
    %163 = vector.load %arg21[%c0_79, %c0_80, %c0_81] : memref<2x1x128xf32, #tpu.memory_space<vmem>>, vector<1x1x128xf32>
    %164 = vector.shape_cast %163 : vector<1x1x128xf32> to vector<1x128xf32>
    %165 = arith.truncf %160 : vector<32x32xf32> to vector<32x32xbf16>
    %cst_82 = arith.constant dense<0.000000e+00> : vector<32x128xf32>
    %166 = tpu.matmul %165, %162, %cst_82 {dimension_numbers = #tpu.dot_dimension_numbers<[1], [0], [0], [1], [0, 0, 1, 1], [], []>} : vector<32x32xbf16>, vector<32x128xbf16>, vector<32x128xf32> -> vector<32x128xf32>
    %167 = vector.broadcast %164 : vector<1x128xf32> to vector<32x128xf32>
    %168 = arith.addf %166, %167 : vector<32x128xf32>
    %169 = arith.mulf %168, %168 : vector<32x128xf32>
    %170 = arith.mulf %168, %169 : vector<32x128xf32>
    %cst_83 = arith.constant 4.471500e-02 : f32
    %171 = vector.broadcast %cst_83 : f32 to vector<32x128xf32>
    %172 = arith.mulf %171, %170 : vector<32x128xf32>
    %173 = arith.addf %168, %172 : vector<32x128xf32>
    %cst_84 = arith.constant 0.797884583 : f32
    %174 = vector.broadcast %cst_84 : f32 to vector<32x128xf32>
    %175 = arith.mulf %174, %173 : vector<32x128xf32>
    %176 = math.tanh %175 : vector<32x128xf32>
    %cst_85 = arith.constant 1.000000e+00 : f32
    %177 = vector.broadcast %cst_85 : f32 to vector<32x128xf32>
    %178 = arith.addf %177, %176 : vector<32x128xf32>
    %cst_86 = arith.constant 5.000000e-01 : f32
    %179 = vector.broadcast %cst_86 : f32 to vector<32x128xf32>
    %180 = arith.mulf %179, %178 : vector<32x128xf32>
    %181 = arith.mulf %168, %180 : vector<32x128xf32>
    %c0_87 = arith.constant 0 : index
    %c0_88 = arith.constant 0 : index
    %c0_89 = arith.constant 0 : index
    %182 = vector.load %arg22[%c0_87, %c0_88, %c0_89] : memref<2x128x32xbf16, #tpu.memory_space<vmem>>, vector<1x128x32xbf16>
    %183 = vector.shape_cast %182 : vector<1x128x32xbf16> to vector<128x32xbf16>
    %c0_90 = arith.constant 0 : index
    %c0_91 = arith.constant 0 : index
    %c0_92 = arith.constant 0 : index
    %184 = vector.load %arg23[%c0_90, %c0_91, %c0_92] : memref<2x1x32xf32, #tpu.memory_space<vmem>>, vector<1x1x32xf32>
    %185 = vector.shape_cast %184 : vector<1x1x32xf32> to vector<1x32xf32>
    %186 = arith.truncf %181 : vector<32x128xf32> to vector<32x128xbf16>
    %cst_93 = arith.constant dense<0.000000e+00> : vector<32x32xf32>
    %187 = tpu.matmul %186, %183, %cst_93 {dimension_numbers = #tpu.dot_dimension_numbers<[1], [0], [0], [1], [0, 0, 1, 1], [], []>} : vector<32x128xbf16>, vector<128x32xbf16>, vector<32x32xf32> -> vector<32x32xf32>
    %188 = vector.broadcast %185 : vector<1x32xf32> to vector<32x32xf32>
    %189 = arith.addf %187, %188 : vector<32x32xf32>
    %190 = arith.addf %134, %189 : vector<32x32xf32>
    %c1 = arith.constant 1 : index
    %c0_94 = arith.constant 0 : index
    %c0_95 = arith.constant 0 : index
    %191 = vector.load %arg8[%c1, %c0_94, %c0_95] : memref<2x1x32xf32, #tpu.memory_space<vmem>>, vector<1x1x32xf32>
    %192 = vector.shape_cast %191 : vector<1x1x32xf32> to vector<1x32xf32>
    %c1_96 = arith.constant 1 : index
    %c0_97 = arith.constant 0 : index
    %c0_98 = arith.constant 0 : index
    %193 = vector.load %arg9[%c1_96, %c0_97, %c0_98] : memref<2x1x32xf32, #tpu.memory_space<vmem>>, vector<1x1x32xf32>
    %194 = vector.shape_cast %193 : vector<1x1x32xf32> to vector<1x32xf32>
    %cst_99 = arith.constant dense<0.000000e+00> : vector<32xf32>
    %195 = vector.multi_reduction <add>, %190, %cst_99 [1] : vector<32x32xf32> to vector<32xf32>
    %196 = vector.shape_cast %195 : vector<32xf32> to vector<32x1xf32>
    %cst_100 = arith.constant 3.125000e-02 : f32
    %197 = vector.broadcast %cst_100 : f32 to vector<32x1xf32>
    %198 = arith.mulf %196, %197 : vector<32x1xf32>
    %199 = arith.mulf %190, %190 : vector<32x32xf32>
    %cst_101 = arith.constant dense<0.000000e+00> : vector<32xf32>
    %200 = vector.multi_reduction <add>, %199, %cst_101 [1] : vector<32x32xf32> to vector<32xf32>
    %201 = vector.shape_cast %200 : vector<32xf32> to vector<32x1xf32>
    %cst_102 = arith.constant 3.125000e-02 : f32
    %202 = vector.broadcast %cst_102 : f32 to vector<32x1xf32>
    %203 = arith.mulf %201, %202 : vector<32x1xf32>
    %204 = arith.mulf %198, %198 : vector<32x1xf32>
    %205 = arith.subf %203, %204 : vector<32x1xf32>
    %206 = vector.broadcast %198 : vector<32x1xf32> to vector<32x32xf32>
    %207 = arith.subf %190, %206 : vector<32x32xf32>
    %cst_103 = arith.constant 9.99999997E-7 : f32
    %208 = vector.broadcast %cst_103 : f32 to vector<32x1xf32>
    %209 = arith.addf %205, %208 : vector<32x1xf32>
    %210 = math.rsqrt %209 : vector<32x1xf32>
    %211 = vector.broadcast %210 : vector<32x1xf32> to vector<32x32xf32>
    %212 = arith.mulf %207, %211 : vector<32x32xf32>
    %213 = vector.broadcast %192 : vector<1x32xf32> to vector<32x32xf32>
    %214 = arith.mulf %212, %213 : vector<32x32xf32>
    %215 = vector.broadcast %194 : vector<1x32xf32> to vector<32x32xf32>
    %216 = arith.addf %214, %215 : vector<32x32xf32>
    %c1_104 = arith.constant 1 : index
    %c0_105 = arith.constant 0 : index
    %c0_106 = arith.constant 0 : index
    %217 = vector.load %arg10[%c1_104, %c0_105, %c0_106] : memref<2x32x32xbf16, #tpu.memory_space<vmem>>, vector<1x32x32xbf16>
    %218 = vector.shape_cast %217 : vector<1x32x32xbf16> to vector<32x32xbf16>
    %c1_107 = arith.constant 1 : index
    %c0_108 = arith.constant 0 : index
    %c0_109 = arith.constant 0 : index
    %219 = vector.load %arg11[%c1_107, %c0_108, %c0_109] : memref<2x1x32xf32, #tpu.memory_space<vmem>>, vector<1x1x32xf32>
    %220 = vector.shape_cast %219 : vector<1x1x32xf32> to vector<1x32xf32>
    %221 = arith.truncf %216 : vector<32x32xf32> to vector<32x32xbf16>
    %cst_110 = arith.constant dense<0.000000e+00> : vector<32x32xf32>
    %222 = tpu.matmul %221, %218, %cst_110 {dimension_numbers = #tpu.dot_dimension_numbers<[1], [0], [0], [1], [0, 0, 1, 1], [], []>} : vector<32x32xbf16>, vector<32x32xbf16>, vector<32x32xf32> -> vector<32x32xf32>
    %223 = vector.broadcast %220 : vector<1x32xf32> to vector<32x32xf32>
    %224 = arith.addf %222, %223 : vector<32x32xf32>
    %c1_111 = arith.constant 1 : index
    %c0_112 = arith.constant 0 : index
    %c0_113 = arith.constant 0 : index
    %225 = vector.load %arg12[%c1_111, %c0_112, %c0_113] : memref<2x32x32xbf16, #tpu.memory_space<vmem>>, vector<1x32x32xbf16>
    %226 = vector.shape_cast %225 : vector<1x32x32xbf16> to vector<32x32xbf16>
    %c1_114 = arith.constant 1 : index
    %c0_115 = arith.constant 0 : index
    %c0_116 = arith.constant 0 : index
    %227 = vector.load %arg13[%c1_114, %c0_115, %c0_116] : memref<2x1x32xf32, #tpu.memory_space<vmem>>, vector<1x1x32xf32>
    %228 = vector.shape_cast %227 : vector<1x1x32xf32> to vector<1x32xf32>
    %229 = arith.truncf %216 : vector<32x32xf32> to vector<32x32xbf16>
    %cst_117 = arith.constant dense<0.000000e+00> : vector<32x32xf32>
    %230 = tpu.matmul %229, %226, %cst_117 {dimension_numbers = #tpu.dot_dimension_numbers<[1], [0], [0], [1], [0, 0, 1, 1], [], []>} : vector<32x32xbf16>, vector<32x32xbf16>, vector<32x32xf32> -> vector<32x32xf32>
    %231 = vector.broadcast %228 : vector<1x32xf32> to vector<32x32xf32>
    %232 = arith.addf %230, %231 : vector<32x32xf32>
    %c1_118 = arith.constant 1 : index
    %c0_119 = arith.constant 0 : index
    %c0_120 = arith.constant 0 : index
    %233 = vector.load %arg14[%c1_118, %c0_119, %c0_120] : memref<2x32x32xbf16, #tpu.memory_space<vmem>>, vector<1x32x32xbf16>
    %234 = vector.shape_cast %233 : vector<1x32x32xbf16> to vector<32x32xbf16>
    %c1_121 = arith.constant 1 : index
    %c0_122 = arith.constant 0 : index
    %c0_123 = arith.constant 0 : index
    %235 = vector.load %arg15[%c1_121, %c0_122, %c0_123] : memref<2x1x32xf32, #tpu.memory_space<vmem>>, vector<1x1x32xf32>
    %236 = vector.shape_cast %235 : vector<1x1x32xf32> to vector<1x32xf32>
    %237 = arith.truncf %216 : vector<32x32xf32> to vector<32x32xbf16>
    %cst_124 = arith.constant dense<0.000000e+00> : vector<32x32xf32>
    %238 = tpu.matmul %237, %234, %cst_124 {dimension_numbers = #tpu.dot_dimension_numbers<[1], [0], [0], [1], [0, 0, 1, 1], [], []>} : vector<32x32xbf16>, vector<32x32xbf16>, vector<32x32xf32> -> vector<32x32xf32>
    %239 = vector.broadcast %236 : vector<1x32xf32> to vector<32x32xf32>
    %240 = arith.addf %238, %239 : vector<32x32xf32>
    %241 = vector.extract_strided_slice %232 {offsets = [0, 0], sizes = [16, 32], strides = [1, 1]} : vector<32x32xf32> to vector<16x32xf32>
    %242 = tpu.concatenate %241, %241, %241, %241 in 0 : vector<16x32xf32>, vector<16x32xf32>, vector<16x32xf32>, vector<16x32xf32> -> vector<64x32xf32>
    %243 = arith.mulf %242, %0 : vector<64x32xf32>
    %244 = vector.extract_strided_slice %240 {offsets = [0, 0], sizes = [16, 32], strides = [1, 1]} : vector<32x32xf32> to vector<16x32xf32>
    %245 = tpu.concatenate %244, %244, %244, %244 in 0 : vector<16x32xf32>, vector<16x32xf32>, vector<16x32xf32>, vector<16x32xf32> -> vector<64x32xf32>
    %246 = arith.mulf %245, %0 : vector<64x32xf32>
    %247 = vector.extract_strided_slice %224 {offsets = [0, 0], sizes = [16, 32], strides = [1, 1]} : vector<32x32xf32> to vector<16x32xf32>
    %248 = arith.truncf %247 : vector<16x32xf32> to vector<16x32xbf16>
    %249 = arith.truncf %243 : vector<64x32xf32> to vector<64x32xbf16>
    %cst_125 = arith.constant dense<0.000000e+00> : vector<16x64xf32>
    %250 = tpu.matmul %248, %249, %cst_125 {dimension_numbers = #tpu.dot_dimension_numbers<[1], [1], [0], [0], [0, 0, 1, 0], [], []>} : vector<16x32xbf16>, vector<64x32xbf16>, vector<16x64xf32> -> vector<16x64xf32>
    %cst_126 = arith.constant dense<0xFF800000> : vector<16xf32>
    %251 = vector.multi_reduction <maximumf>, %250, %cst_126 [1] : vector<16x64xf32> to vector<16xf32>
    %252 = vector.shape_cast %251 : vector<16xf32> to vector<16x1xf32>
    %253 = vector.broadcast %252 : vector<16x1xf32> to vector<16x64xf32>
    %254 = arith.subf %250, %253 : vector<16x64xf32>
    %255 = math.exp %254 : vector<16x64xf32>
    %cst_127 = arith.constant dense<0.000000e+00> : vector<16x64xf32>
    %256 = tpu.matmul %255, %1, %cst_127 {dimension_numbers = #tpu.dot_dimension_numbers<[1], [0], [0], [1], [0, 0, 1, 1], [], []>} : vector<16x64xf32>, vector<64x64xf32>, vector<16x64xf32> -> vector<16x64xf32>
    %257 = tpu.reciprocal %256 {approx = true} : vector<16x64xf32> -> vector<16x64xf32>
    %258 = arith.mulf %255, %257 : vector<16x64xf32>
    %259 = arith.truncf %258 : vector<16x64xf32> to vector<16x64xbf16>
    %260 = arith.truncf %246 : vector<64x32xf32> to vector<64x32xbf16>
    %cst_128 = arith.constant dense<0.000000e+00> : vector<16x32xf32>
    %261 = tpu.matmul %259, %260, %cst_128 {dimension_numbers = #tpu.dot_dimension_numbers<[1], [0], [0], [1], [0, 0, 1, 1], [], []>} : vector<16x64xbf16>, vector<64x32xbf16>, vector<16x32xf32> -> vector<16x32xf32>
    %262 = vector.extract_strided_slice %232 {offsets = [16, 0], sizes = [16, 32], strides = [1, 1]} : vector<32x32xf32> to vector<16x32xf32>
    %263 = tpu.concatenate %262, %262, %262, %262 in 0 : vector<16x32xf32>, vector<16x32xf32>, vector<16x32xf32>, vector<16x32xf32> -> vector<64x32xf32>
    %264 = arith.mulf %263, %0 : vector<64x32xf32>
    %265 = vector.extract_strided_slice %240 {offsets = [16, 0], sizes = [16, 32], strides = [1, 1]} : vector<32x32xf32> to vector<16x32xf32>
    %266 = tpu.concatenate %265, %265, %265, %265 in 0 : vector<16x32xf32>, vector<16x32xf32>, vector<16x32xf32>, vector<16x32xf32> -> vector<64x32xf32>
    %267 = arith.mulf %266, %0 : vector<64x32xf32>
    %268 = vector.extract_strided_slice %224 {offsets = [16, 0], sizes = [16, 32], strides = [1, 1]} : vector<32x32xf32> to vector<16x32xf32>
    %269 = arith.truncf %268 : vector<16x32xf32> to vector<16x32xbf16>
    %270 = arith.truncf %264 : vector<64x32xf32> to vector<64x32xbf16>
    %cst_129 = arith.constant dense<0.000000e+00> : vector<16x64xf32>
    %271 = tpu.matmul %269, %270, %cst_129 {dimension_numbers = #tpu.dot_dimension_numbers<[1], [1], [0], [0], [0, 0, 1, 0], [], []>} : vector<16x32xbf16>, vector<64x32xbf16>, vector<16x64xf32> -> vector<16x64xf32>
    %cst_130 = arith.constant dense<0xFF800000> : vector<16xf32>
    %272 = vector.multi_reduction <maximumf>, %271, %cst_130 [1] : vector<16x64xf32> to vector<16xf32>
    %273 = vector.shape_cast %272 : vector<16xf32> to vector<16x1xf32>
    %274 = vector.broadcast %273 : vector<16x1xf32> to vector<16x64xf32>
    %275 = arith.subf %271, %274 : vector<16x64xf32>
    %276 = math.exp %275 : vector<16x64xf32>
    %cst_131 = arith.constant dense<0.000000e+00> : vector<16x64xf32>
    %277 = tpu.matmul %276, %1, %cst_131 {dimension_numbers = #tpu.dot_dimension_numbers<[1], [0], [0], [1], [0, 0, 1, 1], [], []>} : vector<16x64xf32>, vector<64x64xf32>, vector<16x64xf32> -> vector<16x64xf32>
    %278 = tpu.reciprocal %277 {approx = true} : vector<16x64xf32> -> vector<16x64xf32>
    %279 = arith.mulf %276, %278 : vector<16x64xf32>
    %280 = arith.truncf %279 : vector<16x64xf32> to vector<16x64xbf16>
    %281 = arith.truncf %267 : vector<64x32xf32> to vector<64x32xbf16>
    %cst_132 = arith.constant dense<0.000000e+00> : vector<16x32xf32>
    %282 = tpu.matmul %280, %281, %cst_132 {dimension_numbers = #tpu.dot_dimension_numbers<[1], [0], [0], [1], [0, 0, 1, 1], [], []>} : vector<16x64xbf16>, vector<64x32xbf16>, vector<16x32xf32> -> vector<16x32xf32>
    %283 = tpu.concatenate %261, %282 in 0 : vector<16x32xf32>, vector<16x32xf32> -> vector<32x32xf32>
    %c1_133 = arith.constant 1 : index
    %c0_134 = arith.constant 0 : index
    %c0_135 = arith.constant 0 : index
    %284 = vector.load %arg16[%c1_133, %c0_134, %c0_135] : memref<2x32x32xbf16, #tpu.memory_space<vmem>>, vector<1x32x32xbf16>
    %285 = vector.shape_cast %284 : vector<1x32x32xbf16> to vector<32x32xbf16>
    %c1_136 = arith.constant 1 : index
    %c0_137 = arith.constant 0 : index
    %c0_138 = arith.constant 0 : index
    %286 = vector.load %arg17[%c1_136, %c0_137, %c0_138] : memref<2x1x32xf32, #tpu.memory_space<vmem>>, vector<1x1x32xf32>
    %287 = vector.shape_cast %286 : vector<1x1x32xf32> to vector<1x32xf32>
    %288 = arith.truncf %283 : vector<32x32xf32> to vector<32x32xbf16>
    %cst_139 = arith.constant dense<0.000000e+00> : vector<32x32xf32>
    %289 = tpu.matmul %288, %285, %cst_139 {dimension_numbers = #tpu.dot_dimension_numbers<[1], [0], [0], [1], [0, 0, 1, 1], [], []>} : vector<32x32xbf16>, vector<32x32xbf16>, vector<32x32xf32> -> vector<32x32xf32>
    %290 = vector.broadcast %287 : vector<1x32xf32> to vector<32x32xf32>
    %291 = arith.addf %289, %290 : vector<32x32xf32>
    %292 = arith.addf %190, %291 : vector<32x32xf32>
    %c1_140 = arith.constant 1 : index
    %c0_141 = arith.constant 0 : index
    %c0_142 = arith.constant 0 : index
    %293 = vector.load %arg18[%c1_140, %c0_141, %c0_142] : memref<2x1x32xf32, #tpu.memory_space<vmem>>, vector<1x1x32xf32>
    %294 = vector.shape_cast %293 : vector<1x1x32xf32> to vector<1x32xf32>
    %c1_143 = arith.constant 1 : index
    %c0_144 = arith.constant 0 : index
    %c0_145 = arith.constant 0 : index
    %295 = vector.load %arg19[%c1_143, %c0_144, %c0_145] : memref<2x1x32xf32, #tpu.memory_space<vmem>>, vector<1x1x32xf32>
    %296 = vector.shape_cast %295 : vector<1x1x32xf32> to vector<1x32xf32>
    %cst_146 = arith.constant dense<0.000000e+00> : vector<32xf32>
    %297 = vector.multi_reduction <add>, %292, %cst_146 [1] : vector<32x32xf32> to vector<32xf32>
    %298 = vector.shape_cast %297 : vector<32xf32> to vector<32x1xf32>
    %cst_147 = arith.constant 3.125000e-02 : f32
    %299 = vector.broadcast %cst_147 : f32 to vector<32x1xf32>
    %300 = arith.mulf %298, %299 : vector<32x1xf32>
    %301 = arith.mulf %292, %292 : vector<32x32xf32>
    %cst_148 = arith.constant dense<0.000000e+00> : vector<32xf32>
    %302 = vector.multi_reduction <add>, %301, %cst_148 [1] : vector<32x32xf32> to vector<32xf32>
    %303 = vector.shape_cast %302 : vector<32xf32> to vector<32x1xf32>
    %cst_149 = arith.constant 3.125000e-02 : f32
    %304 = vector.broadcast %cst_149 : f32 to vector<32x1xf32>
    %305 = arith.mulf %303, %304 : vector<32x1xf32>
    %306 = arith.mulf %300, %300 : vector<32x1xf32>
    %307 = arith.subf %305, %306 : vector<32x1xf32>
    %308 = vector.broadcast %300 : vector<32x1xf32> to vector<32x32xf32>
    %309 = arith.subf %292, %308 : vector<32x32xf32>
    %cst_150 = arith.constant 9.99999997E-7 : f32
    %310 = vector.broadcast %cst_150 : f32 to vector<32x1xf32>
    %311 = arith.addf %307, %310 : vector<32x1xf32>
    %312 = math.rsqrt %311 : vector<32x1xf32>
    %313 = vector.broadcast %312 : vector<32x1xf32> to vector<32x32xf32>
    %314 = arith.mulf %309, %313 : vector<32x32xf32>
    %315 = vector.broadcast %294 : vector<1x32xf32> to vector<32x32xf32>
    %316 = arith.mulf %314, %315 : vector<32x32xf32>
    %317 = vector.broadcast %296 : vector<1x32xf32> to vector<32x32xf32>
    %318 = arith.addf %316, %317 : vector<32x32xf32>
    %c1_151 = arith.constant 1 : index
    %c0_152 = arith.constant 0 : index
    %c0_153 = arith.constant 0 : index
    %319 = vector.load %arg20[%c1_151, %c0_152, %c0_153] : memref<2x32x128xbf16, #tpu.memory_space<vmem>>, vector<1x32x128xbf16>
    %320 = vector.shape_cast %319 : vector<1x32x128xbf16> to vector<32x128xbf16>
    %c1_154 = arith.constant 1 : index
    %c0_155 = arith.constant 0 : index
    %c0_156 = arith.constant 0 : index
    %321 = vector.load %arg21[%c1_154, %c0_155, %c0_156] : memref<2x1x128xf32, #tpu.memory_space<vmem>>, vector<1x1x128xf32>
    %322 = vector.shape_cast %321 : vector<1x1x128xf32> to vector<1x128xf32>
    %323 = arith.truncf %318 : vector<32x32xf32> to vector<32x32xbf16>
    %cst_157 = arith.constant dense<0.000000e+00> : vector<32x128xf32>
    %324 = tpu.matmul %323, %320, %cst_157 {dimension_numbers = #tpu.dot_dimension_numbers<[1], [0], [0], [1], [0, 0, 1, 1], [], []>} : vector<32x32xbf16>, vector<32x128xbf16>, vector<32x128xf32> -> vector<32x128xf32>
    %325 = vector.broadcast %322 : vector<1x128xf32> to vector<32x128xf32>
    %326 = arith.addf %324, %325 : vector<32x128xf32>
    %327 = arith.mulf %326, %326 : vector<32x128xf32>
    %328 = arith.mulf %326, %327 : vector<32x128xf32>
    %cst_158 = arith.constant 4.471500e-02 : f32
    %329 = vector.broadcast %cst_158 : f32 to vector<32x128xf32>
    %330 = arith.mulf %329, %328 : vector<32x128xf32>
    %331 = arith.addf %326, %330 : vector<32x128xf32>
    %cst_159 = arith.constant 0.797884583 : f32
    %332 = vector.broadcast %cst_159 : f32 to vector<32x128xf32>
    %333 = arith.mulf %332, %331 : vector<32x128xf32>
    %334 = math.tanh %333 : vector<32x128xf32>
    %cst_160 = arith.constant 1.000000e+00 : f32
    %335 = vector.broadcast %cst_160 : f32 to vector<32x128xf32>
    %336 = arith.addf %335, %334 : vector<32x128xf32>
    %cst_161 = arith.constant 5.000000e-01 : f32
    %337 = vector.broadcast %cst_161 : f32 to vector<32x128xf32>
    %338 = arith.mulf %337, %336 : vector<32x128xf32>
    %339 = arith.mulf %326, %338 : vector<32x128xf32>
    %c1_162 = arith.constant 1 : index
    %c0_163 = arith.constant 0 : index
    %c0_164 = arith.constant 0 : index
    %340 = vector.load %arg22[%c1_162, %c0_163, %c0_164] : memref<2x128x32xbf16, #tpu.memory_space<vmem>>, vector<1x128x32xbf16>
    %341 = vector.shape_cast %340 : vector<1x128x32xbf16> to vector<128x32xbf16>
    %c1_165 = arith.constant 1 : index
    %c0_166 = arith.constant 0 : index
    %c0_167 = arith.constant 0 : index
    %342 = vector.load %arg23[%c1_165, %c0_166, %c0_167] : memref<2x1x32xf32, #tpu.memory_space<vmem>>, vector<1x1x32xf32>
    %343 = vector.shape_cast %342 : vector<1x1x32xf32> to vector<1x32xf32>
    %344 = arith.truncf %339 : vector<32x128xf32> to vector<32x128xbf16>
    %cst_168 = arith.constant dense<0.000000e+00> : vector<32x32xf32>
    %345 = tpu.matmul %344, %341, %cst_168 {dimension_numbers = #tpu.dot_dimension_numbers<[1], [0], [0], [1], [0, 0, 1, 1], [], []>} : vector<32x128xbf16>, vector<128x32xbf16>, vector<32x32xf32> -> vector<32x32xf32>
    %346 = vector.broadcast %343 : vector<1x32xf32> to vector<32x32xf32>
    %347 = arith.addf %345, %346 : vector<32x32xf32>
    %348 = arith.addf %292, %347 : vector<32x32xf32>
    %c0_169 = arith.constant 0 : index
    %c0_170 = arith.constant 0 : index
    %349 = vector.load %arg24[%c0_169, %c0_170] : memref<32x2048xbf16, #tpu.memory_space<vmem>>, vector<32x2048xbf16>
    %c0_171 = arith.constant 0 : index
    %c0_172 = arith.constant 0 : index
    %350 = vector.load %arg25[%c0_171, %c0_172] : memref<1x2048xf32, #tpu.memory_space<vmem>>, vector<1x2048xf32>
    %351 = arith.truncf %348 : vector<32x32xf32> to vector<32x32xbf16>
    %cst_173 = arith.constant dense<0.000000e+00> : vector<32x2048xf32>
    %352 = tpu.matmul %351, %349, %cst_173 {dimension_numbers = #tpu.dot_dimension_numbers<[1], [0], [0], [1], [0, 0, 1, 1], [], []>} : vector<32x32xbf16>, vector<32x2048xbf16>, vector<32x2048xf32> -> vector<32x2048xf32>
    %353 = vector.broadcast %350 : vector<1x2048xf32> to vector<32x2048xf32>
    %354 = arith.addf %352, %353 : vector<32x2048xf32>
    %c0_174 = arith.constant 0 : index
    %c0_175 = arith.constant 0 : index
    %355 = vector.load %arg26[%c0_174, %c0_175] : memref<32x2048xf32, #tpu.memory_space<vmem>>, vector<32x2048xf32>
    tpu.vector_store %arg26[%c0_174, %c0_175], %354 {strides = array<i32>} : memref<32x2048xf32, #tpu.memory_space<vmem>>, vector<32x2048xf32>,
    return
  }
  func.func @transform_0(%arg0: i32) -> (i32, i32) {
    %c0_i32 = arith.constant 0 : i32
    %c0_i32_0 = arith.constant 0 : i32
    %c0_i32_1 = arith.constant 0 : i32
    return %c0_i32, %c0_i32_0 : i32, i32
  }
  func.func @transform_1(%arg0: i32) -> (i32, i32) {
    %c0_i32 = arith.constant 0 : i32
    %c0_i32_0 = arith.constant 0 : i32
    %c0_i32_1 = arith.constant 0 : i32
    return %c0_i32, %c0_i32_0 : i32, i32
  }
  func.func @transform_2(%arg0: i32) -> (i32, i32) {
    %c0_i32 = arith.constant 0 : i32
    %c0_i32_0 = arith.constant 0 : i32
    %c0_i32_1 = arith.constant 0 : i32
    return %c0_i32, %c0_i32_0 : i32, i32
  }
  func.func @transform_3(%arg0: i32) -> (i32, i32) {
    %c0_i32 = arith.constant 0 : i32
    %c0_i32_0 = arith.constant 0 : i32
    %c0_i32_1 = arith.constant 0 : i32
    return %c0_i32, %c0_i32_0 : i32, i32
  }
  func.func @transform_4(%arg0: i32) -> (i32, i32) {
    %c0_i32 = arith.constant 0 : i32
    %c0_i32_0 = arith.constant 0 : i32
    %c0_i32_1 = arith.constant 0 : i32
    return %c0_i32, %c0_i32_0 : i32, i32
  }
  func.func @transform_5(%arg0: i32) -> (i32, i32) {
    %c0_i32 = arith.constant 0 : i32
    %c0_i32_0 = arith.constant 0 : i32
    %c0_i32_1 = arith.constant 0 : i32
    return %c0_i32, %c0_i32_0 : i32, i32
  }
  func.func @transform_6(%arg0: i32) -> (i32, i32) {
    %c0_i32 = arith.constant 0 : i32
    %c0_i32_0 = arith.constant 0 : i32
    %c0_i32_1 = arith.constant 0 : i32
    return %c0_i32, %c0_i32_0 : i32, i32
  }
  func.func @transform_7(%arg0: i32) -> (i32, i32, i32) {
    %c0_i32 = arith.constant 0 : i32
    %c0_i32_0 = arith.constant 0 : i32
    %c0_i32_1 = arith.constant 0 : i32
    %c0_i32_2 = arith.constant 0 : i32
    return %c0_i32, %c0_i32_0, %c0_i32_1 : i32, i32, i32
  }
  func.func @transform_8(%arg0: i32) -> (i32, i32, i32) {
    %c0_i32 = arith.constant 0 : i32
    %c0_i32_0 = arith.constant 0 : i32
    %c0_i32_1 = arith.constant 0 : i32
    %c0_i32_2 = arith.constant 0 : i32
    return %c0_i32, %c0_i32_0, %c0_i32_1 : i32, i32, i32
  }
  func.func @transform_9(%arg0: i32) -> (i32, i32, i32) {
    %c0_i32 = arith.constant 0 : i32
    %c0_i32_0 = arith.constant 0 : i32
    %c0_i32_1 = arith.constant 0 : i32
    %c0_i32_2 = arith.constant 0 : i32
    return %c0_i32, %c0_i32_0, %c0_i32_1 : i32, i32, i32
  }
  func.func @transform_10(%arg0: i32) -> (i32, i32, i32) {
    %c0_i32 = arith.constant 0 : i32
    %c0_i32_0 = arith.constant 0 : i32
    %c0_i32_1 = arith.constant 0 : i32
    %c0_i32_2 = arith.constant 0 : i32
    return %c0_i32, %c0_i32_0, %c0_i32_1 : i32, i32, i32
  }
  func.func @transform_11(%arg0: i32) -> (i32, i32, i32) {
    %c0_i32 = arith.constant 0 : i32
    %c0_i32_0 = arith.constant 0 : i32
    %c0_i32_1 = arith.constant 0 : i32
    %c0_i32_2 = arith.constant 0 : i32
    return %c0_i32, %c0_i32_0, %c0_i32_1 : i32, i32, i32
  }
  func.func @transform_12(%arg0: i32) -> (i32, i32, i32) {
    %c0_i32 = arith.constant 0 : i32
    %c0_i32_0 = arith.constant 0 : i32
    %c0_i32_1 = arith.constant 0 : i32
    %c0_i32_2 = arith.constant 0 : i32
    return %c0_i32, %c0_i32_0, %c0_i32_1 : i32, i32, i32
  }
  func.func @transform_13(%arg0: i32) -> (i32, i32, i32) {
    %c0_i32 = arith.constant 0 : i32
    %c0_i32_0 = arith.constant 0 : i32
    %c0_i32_1 = arith.constant 0 : i32
    %c0_i32_2 = arith.constant 0 : i32
    return %c0_i32, %c0_i32_0, %c0_i32_1 : i32, i32, i32
  }
  func.func @transform_14(%arg0: i32) -> (i32, i32, i32) {
    %c0_i32 = arith.constant 0 : i32
    %c0_i32_0 = arith.constant 0 : i32
    %c0_i32_1 = arith.constant 0 : i32
    %c0_i32_2 = arith.constant 0 : i32
    return %c0_i32, %c0_i32_0, %c0_i32_1 : i32, i32, i32
  }
  func.func @transform_15(%arg0: i32) -> (i32, i32, i32) {
    %c0_i32 = arith.constant 0 : i32
    %c0_i32_0 = arith.constant 0 : i32
    %c0_i32_1 = arith.constant 0 : i32
    %c0_i32_2 = arith.constant 0 : i32
    return %c0_i32, %c0_i32_0, %c0_i32_1 : i32, i32, i32
  }
  func.func @transform_16(%arg0: i32) -> (i32, i32, i32) {
    %c0_i32 = arith.constant 0 : i32
    %c0_i32_0 = arith.constant 0 : i32
    %c0_i32_1 = arith.constant 0 : i32
    %c0_i32_2 = arith.constant 0 : i32
    return %c0_i32, %c0_i32_0, %c0_i32_1 : i32, i32, i32
  }
  func.func @transform_17(%arg0: i32) -> (i32, i32, i32) {
    %c0_i32 = arith.constant 0 : i32
    %c0_i32_0 = arith.constant 0 : i32
    %c0_i32_1 = arith.constant 0 : i32
    %c0_i32_2 = arith.constant 0 : i32
    return %c0_i32, %c0_i32_0, %c0_i32_1 : i32, i32, i32
  }
  func.func @transform_18(%arg0: i32) -> (i32, i32, i32) {
    %c0_i32 = arith.constant 0 : i32
    %c0_i32_0 = arith.constant 0 : i32
    %c0_i32_1 = arith.constant 0 : i32
    %c0_i32_2 = arith.constant 0 : i32
    return %c0_i32, %c0_i32_0, %c0_i32_1 : i32, i32, i32
  }
  func.func @transform_19(%arg0: i32) -> (i32, i32, i32) {
    %c0_i32 = arith.constant 0 : i32
    %c0_i32_0 = arith.constant 0 : i32
    %c0_i32_1 = arith.constant 0 : i32
    %c0_i32_2 = arith.constant 0 : i32
    return %c0_i32, %c0_i32_0, %c0_i32_1 : i32, i32, i32
  }
  func.func @transform_20(%arg0: i32) -> (i32, i32, i32) {
    %c0_i32 = arith.constant 0 : i32
    %c0_i32_0 = arith.constant 0 : i32
    %c0_i32_1 = arith.constant 0 : i32
    %c0_i32_2 = arith.constant 0 : i32
    return %c0_i32, %c0_i32_0, %c0_i32_1 : i32, i32, i32
  }
  func.func @transform_21(%arg0: i32) -> (i32, i32, i32) {
    %c0_i32 = arith.constant 0 : i32
    %c0_i32_0 = arith.constant 0 : i32
    %c0_i32_1 = arith.constant 0 : i32
    %c0_i32_2 = arith.constant 0 : i32
    return %c0_i32, %c0_i32_0, %c0_i32_1 : i32, i32, i32
  }
  func.func @transform_22(%arg0: i32) -> (i32, i32, i32) {
    %c0_i32 = arith.constant 0 : i32
    %c0_i32_0 = arith.constant 0 : i32
    %c0_i32_1 = arith.constant 0 : i32
    %c0_i32_2 = arith.constant 0 : i32
    return %c0_i32, %c0_i32_0, %c0_i32_1 : i32, i32, i32
  }
  func.func @transform_23(%arg0: i32) -> (i32, i32) {
    %c0_i32 = arith.constant 0 : i32
    %c0_i32_0 = arith.constant 0 : i32
    %c0_i32_1 = arith.constant 0 : i32
    return %c0_i32, %c0_i32_0 : i32, i32
  }
  func.func @transform_24(%arg0: i32) -> (i32, i32) {
    %c0_i32 = arith.constant 0 : i32
    %c0_i32_0 = arith.constant 0 : i32
    %c0_i32_1 = arith.constant 0 : i32
    return %c0_i32, %c0_i32_0 : i32, i32
  }
  func.func @transform_25(%arg0: i32) -> (i32, i32) {
    %c0_i32 = arith.constant 0 : i32
    %c0_i32_0 = arith.constant 0 : i32
    %c0_i32_1 = arith.constant 0 : i32
    return %c0_i32, %c0_i32_0 : i32, i32
  }
}

</mosaic_0001>

<bundles_post_ra>
// kernel: fake_backbone_forward.1
= control target key start
LH: loop header
LB: loop body
LE: loop exit
PB: predicated region body
PF: predicated region fallthrough
CT: control target
= control target key end

     0   :  { %vm134_vm0 = vcmask 392192   ;;  %vm192_vm1 = vcmask 261120   ;;  %vm4230_vm2 = vmmov 0   ;;  %vm656_vm3 = vcmask 523264   ;;  %s5561_s1 = inlined_call_operand.vmem [shape: bf16[48,32], index: 1, kind: input, shape index: {}]   ;;  %s5562_s0 = inlined_call_operand.vmem [shape: f32[32,48], index: 0, kind: input, shape index: {}]   ;;  %s5563_s2 = inlined_call_operand.vmem [shape: f32[1,32], index: 2, kind: input, shape index: {}]   ;;  %s5564_s3 = inlined_call_operand.vmem [shape: f32[1,32], index: 3, kind: input, shape index: {}]   ;;  %s5565_s4 = inlined_call_operand.vmem [shape: f32[1,32], index: 4, kind: input, shape index: {}]   ;;  %s5566_s9 = inlined_call_operand.vmem [shape: bf16[2,32,32], index: 9, kind: input, shape index: {}]   ;;  %s5567_s13 = inlined_call_operand.vmem [shape: bf16[2,32,32], index: 13, kind: input, shape index: {}]   ;;  %s5568_s11 = inlined_call_operand.vmem [shape: bf16[2,32,32], index: 11, kind: input, shape index: {}]   ;;  %s5569_s7 = inlined_call_operand.vmem [shape: f32[2,1,32], index: 7, kind: input, shape index: {}]   ;;  %s5570_s8 = inlined_call_operand.vmem [shape: f32[2,1,32], index: 8, kind: input, shape index: {}]   ;;  %s5571_s14 = inlined_call_operand.vmem [shape: f32[2,1,32], index: 14, kind: input, shape index: {}]   ;;  %s5572_s10 = inlined_call_operand.vmem [shape: f32[2,1,32], index: 10, kind: input, shape index: {}]   ;;  %s5573_s5 = inlined_call_operand.vmem [shape: f32[64,32], index: 5, kind: input, shape index: {}]   ;;  %s5574_s12 = inlined_call_operand.vmem [shape: f32[2,1,32], index: 12, kind: input, shape index: {}]   ;;  %s5575_s6 = inlined_call_operand.vmem [shape: f32[64,64], index: 6, kind: input, shape index: {}]   ;;  %s5576_s15 = inlined_call_operand.vmem [shape: bf16[2,32,32], index: 15, kind: input, shape index: {}]   ;;  %s5577_s16 = inlined_call_operand.vmem [shape: f32[2,1,32], index: 16, kind: input, shape index: {}]   ;;  %s5578_s19 = inlined_call_operand.vmem [shape: bf16[2,32,128], index: 19, kind: input, shape index: {}]   ;;  %s5579_s17 = inlined_call_operand.vmem [shape: f32[2,1,32], index: 17, kind: input, shape index: {}]   ;;  %s5580_s18 = inlined_call_operand.vmem [shape: f32[2,1,32], index: 18, kind: input, shape index: {}]   ;;  %s5581_s21 = inlined_call_operand.vmem [shape: bf16[2,128,32], index: 21, kind: input, shape index: {}]   ;;  %s5582_s20 = inlined_call_operand.vmem [shape: f32[2,1,128], index: 20, kind: input, shape index: {}]   ;;  %s5583_s22 = inlined_call_operand.vmem [shape: f32[2,1,32], index: 22, kind: input, shape index: {}]   ;;  %s5584_s23 = inlined_call_operand.vmem [shape: bf16[32,2048], index: 23, kind: input, shape index: {}]   ;;  %s5585_s24 = inlined_call_operand.vmem [shape: f32[1,2048], index: 24, kind: input, shape index: {}]   ;;  %s5586_s25 = inlined_call_operand.vmem [shape: f32[32,2048], index: 25, kind: output, shape index: {}]  }
   0x1   :  { %5594 = sst [smem:[#allocation2_spill]] %s5561_s1 }
   0x2   :  { %5595 = sst [smem:[#allocation3_spill]] %s5562_s0 }
   0x3   :  { %5596 = sst [smem:[#allocation4_spill]] %s5563_s2  ;;  %s5605_s0 = sld [smem:[#allocation3_spill]] }
   0x4   :  { %5597 = sst [smem:[#allocation5_spill]] %s5564_s3 }
   0x5   :  { %5598 = sst [smem:[#allocation6_spill]] %s5565_s4  ;;  %s5607_s26 = sld [smem:[#allocation5_spill]] }
   0x6   :  { %5599 = sst [smem:[#allocation7_spill]] %s5566_s9  ;;  %s5608_s27 = sld [smem:[#allocation6_spill]] }
   0x7   :  { %5600 = sst [smem:[#allocation8_spill]] %s5567_s13  ;;  %s5604_s13 = sld [smem:[#allocation2_spill]] }
   0x8   :  { %5601 = sst [smem:[#allocation9_spill]] %s5568_s11  ;;  %s5606_s11 = sld [smem:[#allocation4_spill]] }
   0x9   :  { %5602 = sst [smem:[#allocation10_spill]] %s5569_s7  ;;  %v97_v2 = vld [vmem:[%s5605_s0] sm:$0xff]  ;;  %v98_v3 = vld [vmem:[%s5605_s0 + $0x8] sm:$0xff]  ;;  %v99_v6 = vld [vmem:[%s5605_s0 + $0x10] sm:$0xff]  ;;  %s5610_s29 = sld [smem:[#allocation8_spill]] }
   0xa   :  { %5603 = sst [smem:[#allocation11_spill]] %s5570_s8  ;;  %v108_v5 = vpack.c.bf16 %v98_v3, %v97_v2  ;;  %v100_v7 = vld [vmem:[%s5605_s0 + $0x18] sm:$0xff]  ;;  %s5609_s8 = sld [smem:[#allocation7_spill]] }
   0xb   :  { %v109_v8 = vpack.c.bf16 %v100_v7, %v99_v6  ;;  %v3392_v2 = vld [vmem:[%s5607_s26] ss:$0 sm:$0xff]  ;;  %s5611_s0 = sld [smem:[#allocation9_spill]]  ;;  %s5612_s4 = sld [smem:[#allocation10_spill]] }
   0xc   :  { %3731 = vmatprep.mubr.msk.bf16.mxu0 %vm134_vm0, %v108_v5  ;;  %s5613_s1 = sld [smem:[#allocation11_spill]] }
   0xd   :  { %v4094_v0 = vld [vmem:[%s5604_s13] sm:$0xff]   ;;  %v4095_v1 = vld [vmem:[%s5604_s13 + $0x8] sm:$0xff]   ;;  %v4096_v4 = vld [vmem:[%s5604_s13 + $0x10] sm:$0xff]  }
   0xe   :  { %3725 = vmatprep.subr.bf16.mxu0 %v4094_v0  ;;  %v3386_v9 = vld [vmem:[%s5606_s11] ss:$0 sm:$0xff] }
   0xf   :  { %3726 = vmatpush3.bf16.msra.mxu0 %v4094_v0 }
  0x10   :  { %3727 = vmatprep.subr.bf16.mxu0 %v4095_v1 }
  0x13   :  { %3728 = vmatpush3.bf16.msra.mxu0 %v4095_v1 }
  0x14   :  { %3729 = vmatprep.subr.bf16.mxu0 %v4096_v4 }
  0x17   :  { %3730 = vmatpush3.bf16.msra.mxu0 %v4096_v4 }
  0x1a   :  { %3732 = vmatmul.mubr.msk.bf16.vlgmr.msra.gmra.mrb[0].mxu0 %vm134_vm0, %v109_v8 }
  0xed   :  { %v3733_v10 = vpop.f32.mrb[0].mxu0 }
  0xee   :  { %v4386_v11 = vadd.f32 %v3733_v10, %v3386_v9  ;;  %v175_v12 = vpop.f32.mrb[1].mxu0 }
  0xef   :  { %v4388_v13 = vadd.f32 %v3386_v9, %v175_v12  ;;  %v3734_v14 = vpop.f32.mrb[2].mxu0 }
  0xf0   :  { %v4390_v15 = vadd.f32 %v3734_v14, %v3386_v9  ;;  %v178_v16 = vpop.f32.mrb[3].mxu0  ;;  %v199_v17 = vsel %vm192_vm1, %v4386_v11, 0.0  ;;  %v211_v27 = vmul.f32 %v4386_v11, %v4386_v11 }
  0xf1   :  { %v179_v18 = vadd.f32 %v3386_v9, %v178_v16  ;;  %200 = vadd.xlane.f32.xlu1 %v199_v17  ;;  %v193_v19 = vsel %vm192_vm1, %v4388_v13, 0.0  ;;  %v209_v23 = vmul.f32 %v4388_v13, %v4388_v13  ;;  %v3393_v9 = vld [vmem:[%s5608_s27] ss:$0 sm:$0xff] }
  0xf2   :  { %194 = vadd.xlane.f32.xlu0 %v193_v19  ;;  %v202_v20 = vsel %vm192_vm1, %v4390_v15, 0.0  ;;  %v212_v25 = vmul.f32 %v4390_v15, %v4390_v15  ;;  %v219_v29 = vsel %vm192_vm1, %v211_v27, 0.0 }
  0xf3   :  { %v210_v21 = vmul.f32 %v179_v18, %v179_v18  ;;  %v196_v22 = vsel %vm192_vm1, %v179_v18, 0.0  ;;  %v213_v26 = vsel %vm192_vm1, %v209_v23, 0.0 }
  0xf4   :  { %v222_v28 = vsel %vm192_vm1, %v212_v25, 0.0 }
  0xf5   :  { %203 = vadd.xlane.f32.xlu1 %v202_v20  ;;  %v216_v24 = vsel %vm192_vm1, %v210_v21, 0.0 }
  0xf6   :  { %197 = vadd.xlane.f32.xlu0 %v196_v22 }
  0xf9   :  { %217 = vadd.xlane.f32.xlu1 %v216_v24 }
  0xfa   :  { %214 = vadd.xlane.f32.xlu0 %v213_v26 }
  0xfd   :  { %223 = vadd.xlane.f32.xlu1 %v222_v28  ;;  %v4097_v28 = vld [vmem:[%s5609_s8] sm:$0xff]  }
  0xfe   :  { %220 = vadd.xlane.f32.xlu0 %v219_v29  ;;  %v4098_v29 = vld [vmem:[%s5610_s29] sm:$0xff]   ;;  %3735 = vmatprep.subr.bf16.mxu1 %v4097_v28 }
  0xff   :  { %3736 = vmatpush3.bf16.msra.mxu1 %v4097_v28  ;;  %3751 = vmatprep.subr.bf16.mxu0 %v4098_v29 }
 0x100   :  { %3752 = vmatpush3.bf16.msra.mxu0 %v4098_v29 }
 0x17e   :  { %v201_v30 = vpop.xlane.xlu1 %200 }
 0x17f   :  { %v195_v31 = vpop.xlane.xlu0 %194  ;;  %v207_v41 = vmul.f32 0.03125, %v201_v30  ;;  %v4099_v30 = vld [vmem:[%s5609_s8 + $0x8] sm:$0xff]  }
 0x180   :  { %v205_v34 = vmul.f32 0.03125, %v195_v31  ;;  %3737 = vmatprep.subr.bf16.mxu1 %v4099_v30  ;;  %v4100_v31 = vld [vmem:[%s5610_s29 + $0x8] sm:$0xff]  }
 0x181   :  { %v231_v51 = vmul.f32 %v207_v41, %v207_v41  ;;  %v239_v1 = vsub.f32 %v4386_v11, %v207_v41  ;;  %3738 = vmatpush3.bf16.msra.mxu1 %v4099_v30  ;;  %3753 = vmatprep.subr.bf16.mxu0 %v4100_v31  ;;  %v3396_v30 = vld [vmem:[%s5572_s10] ss:$0 sm:$0xff] }
 0x182   :  { %v204_v32 = vpop.xlane.xlu1 %203  ;;  %v229_v42 = vmul.f32 %v205_v34, %v205_v34  ;;  %v237_v61 = vsub.f32 %v4388_v13, %v205_v34  ;;  %3754 = vmatpush3.bf16.msra.mxu0 %v4100_v31 }
 0x183   :  { %v198_v33 = vpop.xlane.xlu0 %197  ;;  %v208_v38 = vmul.f32 0.03125, %v204_v32  ;;  %v4461_v32 = vld [vmem:[%s5611_s0] sm:$0xff]  }
 0x184   :  { %v206_v35 = vmul.f32 0.03125, %v198_v33  ;;  %3743 = vmatprep.subr.bf16.mxu1 %v4461_v32 }
 0x185   :  { %v232_v47 = vmul.f32 %v208_v38, %v208_v38  ;;  %v240_v62 = vsub.f32 %v4390_v15, %v208_v38 }
 0x186   :  { %v230_v36 = vmul.f32 %v206_v35, %v206_v35  ;;  %v218_v37 = vpop.xlane.xlu1 %217  ;;  %v238_v60 = vsub.f32 %v179_v18, %v206_v35 }
 0x187   :  { %v226_v39 = vmul.f32 0.03125, %v218_v37  ;;  %v215_v40 = vpop.xlane.xlu0 %214 }
 0x188   :  { %v225_v43 = vmul.f32 0.03125, %v215_v40 }
 0x189   :  { %v234_v44 = vsub.f32 %v226_v39, %v230_v36 }
 0x18a   :  { %v233_v45 = vsub.f32 %v225_v43, %v229_v42  ;;  %v224_v46 = vpop.xlane.xlu1 %223 }
 0x18b   :  { %v242_v48 = vadd.f32 1e-06, %v234_v44  ;;  %v228_v49 = vmul.f32 0.03125, %v224_v46  ;;  %v221_v50 = vpop.xlane.xlu0 %220 }
 0x18c   :  { %v241_v52 = vadd.f32 1e-06, %v233_v45  ;;  %v227_v53 = vmul.f32 0.03125, %v221_v50 }
 0x18d   :  { %4133 = vrsqrt.f32 %v242_v48  ;;  %v236_v54 = vsub.f32 %v228_v49, %v232_v47 }
 0x18e   :  { %4135 = vrsqrt.f32 %v241_v52  ;;  %v235_v55 = vsub.f32 %v227_v53, %v231_v51 }
 0x18f   :  { %v244_v56 = vadd.f32 1e-06, %v236_v54 }
 0x190   :  { %v243_v57 = vadd.f32 1e-06, %v235_v55 }
 0x191   :  { %4137 = vrsqrt.f32 %v244_v56 }
 0x192   :  { %4139 = vrsqrt.f32 %v243_v57 }
 0x197   :  { %v4134_v58 = vpop.eup %4133 }
 0x198   :  { %v4136_v59 = vpop.eup %4135  ;;  %v250_v63 = vmul.f32 %v4134_v58, %v238_v60 }
 0x199   :  { %v249_v3 = vmul.f32 %v4136_v59, %v237_v61 }
 0x19a   :  { %v260_v8 = vmul.f32 %v3392_v2, %v250_v63 }
 0x19b   :  { %v4138_v0 = vpop.eup %4137  ;;  %v259_v12 = vmul.f32 %v3392_v2, %v249_v3  ;;  %v3395_v3 = vld [vmem:[%s5613_s1] ss:$0 sm:$0xff] }
 0x19c   :  { %v4140_v4 = vpop.eup %4139  ;;  %v252_v5 = vmul.f32 %v4138_v0, %v240_v62  ;;  %v4424_v15 = vadd.f32 %v3393_v9, %v260_v8  ;;  %v3394_v0 = vld [vmem:[%s5612_s4] ss:$0 sm:$0xff] }
 0x19d   :  { %v251_v6 = vmul.f32 %v4140_v4, %v239_v1  ;;  %v4428_v17 = vadd.f32 %v3393_v9, %v259_v12 }
 0x19e   :  { %v262_v7 = vmul.f32 %v3392_v2, %v252_v5  ;;  %v278_v18 = vsel %vm192_vm1, %v4424_v15, 0.0  ;;  %v292_v19 = vmul.f32 %v4424_v15, %v4424_v15 }
 0x19f   :  { %v261_v10 = vmul.f32 %v3392_v2, %v251_v6  ;;  %v275_v20 = vsel %vm192_vm1, %v4428_v17, 0.0  ;;  %v291_v21 = vmul.f32 %v4428_v17, %v4428_v17 }
 0x1a0   :  { %v4418_v13 = vadd.f32 %v3393_v9, %v262_v7  ;;  %v298_v22 = vsel %vm192_vm1, %v292_v19, 0.0 }
 0x1a1   :  { %v4420_v14 = vadd.f32 %v3393_v9, %v261_v10  ;;  %v295_v24 = vsel %vm192_vm1, %v291_v21, 0.0 }
 0x1a2   :  { %v284_v11 = vsel %vm192_vm1, %v4418_v13, 0.0  ;;  %v294_v23 = vmul.f32 %v4418_v13, %v4418_v13 }
 0x1a3   :  { %285 = vadd.xlane.f32.xlu1 %v284_v11  ;;  %v281_v16 = vsel %vm192_vm1, %v4420_v14, 0.0  ;;  %v293_v25 = vmul.f32 %v4420_v14, %v4420_v14 }
 0x1a4   :  { %282 = vadd.xlane.f32.xlu0 %v281_v16  ;;  %v304_v26 = vsel %vm192_vm1, %v294_v23, 0.0 }
 0x1a5   :  { %v301_v27 = vsel %vm192_vm1, %v293_v25, 0.0  ;;  %v4102_v25 = vld [vmem:[%s5611_s0 + $0x8] sm:$0xff]  }
 0x1a7   :  { %279 = vadd.xlane.f32.xlu1 %v278_v18 }
 0x1a8   :  { %276 = vadd.xlane.f32.xlu0 %v275_v20 }
 0x1ab   :  { %299 = vadd.xlane.f32.xlu1 %v298_v22 }
 0x1ac   :  { %296 = vadd.xlane.f32.xlu0 %v295_v24 }
 0x1af   :  { %305 = vadd.xlane.f32.xlu1 %v304_v26  ;;  %v4229_v26 = vmov 0.0  }
 0x1b0   :  { %302 = vadd.xlane.f32.xlu0 %v301_v27  ;;  %v3406_v27 = vld [vmem:[%s5571_s14] ss:$0 sm:$0xff] }
 0x230   :  { %v286_v33 = vpop.xlane.xlu1 %285 }
 0x231   :  { %v283_v34 = vpop.xlane.xlu0 %282  ;;  %v290_v40 = vmul.f32 0.03125, %v286_v33 }
 0x232   :  { %v289_v44 = vmul.f32 0.03125, %v283_v34 }
 0x233   :  { %v314_v50 = vmul.f32 %v290_v40, %v290_v40  ;;  %v322_v5 = vsub.f32 %v4418_v13, %v290_v40 }
 0x234   :  { %v280_v35 = vpop.xlane.xlu1 %279  ;;  %v313_v54 = vmul.f32 %v289_v44, %v289_v44  ;;  %v321_v8 = vsub.f32 %v4420_v14, %v289_v44  ;;  %v82_v44 = vld [vmem:[%s5573_s5 + $0x8] sm:$0xff] }
 0x235   :  { %v288_v36 = vmul.f32 0.03125, %v280_v35  ;;  %v277_v37 = vpop.xlane.xlu0 %276 }
 0x236   :  { %v287_v38 = vmul.f32 0.03125, %v277_v37  ;;  %v81_v37 = vld [vmem:[%s5573_s5] sm:$0xff] }
 0x237   :  { %v312_v41 = vmul.f32 %v288_v36, %v288_v36  ;;  %v320_v61 = vsub.f32 %v4424_v15, %v288_v36 }
 0x238   :  { %v300_v39 = vpop.xlane.xlu1 %299  ;;  %v311_v45 = vmul.f32 %v287_v38, %v287_v38  ;;  %v319_v63 = vsub.f32 %v4428_v17, %v287_v38  ;;  %v83_v38 = vld [vmem:[%s5573_s5 + $0x10] sm:$0xff] }
 0x239   :  { %v308_v42 = vmul.f32 0.03125, %v300_v39  ;;  %v297_v43 = vpop.xlane.xlu0 %296  ;;  %v4506_v39 = vld [vmem:[%s5573_s5 + $0x20] sm:$0xff] }
 0x23a   :  { %v307_v46 = vmul.f32 0.03125, %v297_v43 }
 0x23b   :  { %v316_v47 = vsub.f32 %v308_v42, %v312_v41 }
 0x23c   :  { %v315_v48 = vsub.f32 %v307_v46, %v311_v45  ;;  %v306_v49 = vpop.xlane.xlu1 %305  ;;  %v84_v45 = vld [vmem:[%s5573_s5 + $0x18] sm:$0xff] }
 0x23d   :  { %v324_v51 = vadd.f32 1e-06, %v316_v47  ;;  %v310_v52 = vmul.f32 0.03125, %v306_v49  ;;  %v303_v53 = vpop.xlane.xlu0 %302  ;;  %v86_v47 = vld [vmem:[%s5573_s5 + $0x28] sm:$0xff] }
 0x23e   :  { %v323_v55 = vadd.f32 1e-06, %v315_v48  ;;  %v309_v56 = vmul.f32 0.03125, %v303_v53 }
 0x23f   :  { %4141 = vrsqrt.f32 %v324_v51  ;;  %v318_v57 = vsub.f32 %v310_v52, %v314_v50 }
 0x240   :  { %4143 = vrsqrt.f32 %v323_v55  ;;  %v317_v58 = vsub.f32 %v309_v56, %v313_v54  ;;  %v88_v55 = vld [vmem:[%s5573_s5 + $0x38] sm:$0xff]  ;;  %v3401_v56 = vld [vmem:[%s5574_s12] ss:$0 sm:$0xff] }
 0x241   :  { %v326_v59 = vadd.f32 1e-06, %v318_v57 }
 0x242   :  { %v325_v60 = vadd.f32 1e-06, %v317_v58 }
 0x243   :  { %4145 = vrsqrt.f32 %v326_v59 }
 0x244   :  { %4147 = vrsqrt.f32 %v325_v60 }
 0x249   :  { %v4142_v62 = vpop.eup %4141 }
 0x24a   :  { %v4144_v1 = vpop.eup %4143  ;;  %v332_v2 = vmul.f32 %v4142_v62, %v320_v61 }
 0x24b   :  { %v331_v4 = vmul.f32 %v4144_v1, %v319_v63 }
 0x24c   :  { %v342_v6 = vmul.f32 %v3394_v0, %v332_v2 }
 0x24d   :  { %v4146_v7 = vpop.eup %4145  ;;  %v341_v9 = vmul.f32 %v3394_v0, %v331_v4 }
 0x24e   :  { %v4148_v10 = vpop.eup %4147  ;;  %v352_v12 = vadd.f32 %v3395_v3, %v342_v6  ;;  %v334_v11 = vmul.f32 %v4146_v7, %v322_v5 }
 0x24f   :  { %v351_v16 = vadd.f32 %v3395_v3, %v341_v9  ;;  %v333_v18 = vmul.f32 %v4148_v10, %v321_v8 }
 0x250   :  { %v344_v19 = vmul.f32 %v3394_v0, %v334_v11 }
 0x251   :  { %v360_v20 = vpack.c.bf16 %v352_v12, %v351_v16  ;;  %v343_v21 = vmul.f32 %v3394_v0, %v333_v18 }
 0x252   :  { %v354_v22 = vadd.f32 %v3395_v3, %v344_v19 }
 0x253   :  { %3739 = vmatprep.mubr.msk.bf16.mxu1 %vm192_vm1, %v360_v20  ;;  %3755 = vmatprep.mubr.msk.bf16.mxu0 %vm192_vm1, %v360_v20  ;;  %v353_v23 = vadd.f32 %v3395_v3, %v343_v21  ;;  %v87_v21 = vld [vmem:[%s5573_s5 + $0x30] sm:$0xff] }
 0x255   :  { %v361_v24 = vpack.c.bf16 %v354_v22, %v353_v23 }
 0x257   :  { %3740 = vmatmul.mubr.msk.bf16.vlgmr.msra.gmra.mrb[0].mxu1 %vm192_vm1, %v361_v24  ;;  %3756 = vmatmul.mubr.msk.bf16.vlgmr.msra.gmra.mrb[4].mxu0 %vm192_vm1, %v361_v24 }
 0x258   :  { %3744 = vmatpush3.bf16.msra.mxu1 %v4461_v32  ;;  %3747 = vmatprep.mubr.msk.bf16.mxu1 %vm192_vm1, %v360_v20 }
 0x259   :  { %3745 = vmatprep.subr.bf16.mxu1 %v4102_v25 }
 0x25c   :  { %3746 = vmatpush3.bf16.msra.mxu1 %v4102_v25 }
 0x25d   :  { %3759 = vmatprep.subr.bf16.mxu1 %v4229_v26 }
 0x25f   :  { %3748 = vmatmul.mubr.msk.bf16.vlgmr.msra.gmra.mrb[4].mxu1 %vm192_vm1, %v361_v24 }
 0x260   :  { %3767 = vmatprep.mubr.msk.bf16.mxu1 %vm4230_vm2, %v4229_v26 }
 0x32a   :  { %v3741_v28 = vpop.f32.mrb[0].mxu1  ;;  %v3757_v29 = vpop.f32.mrb[4].mxu0 }
 0x32b   :  { %v4493_v31 = vadd.f32 %v3757_v29, %v3406_v27  ;;  %v420_v32 = vpop.f32.mrb[1].mxu1  ;;  %v564_v33 = vpop.f32.mrb[5].mxu0  ;;  %v4508_v42 = vadd.f32 %v3741_v28, %v3396_v30 }
 0x32c   :  { %v4495_v34 = vadd.f32 %v3406_v27, %v564_v33  ;;  %v3742_v35 = vpop.f32.mrb[2].mxu1  ;;  %v3758_v36 = vpop.f32.mrb[6].mxu0  ;;  %v4510_v43 = vadd.f32 %v3396_v30, %v420_v32 }
 0x32d   :  { %v423_v40 = vpop.f32.mrb[3].mxu1  ;;  %v567_v41 = vpop.f32.mrb[7].mxu0  ;;  %v4518_v46 = vadd.f32 %v3742_v35, %v3396_v30  ;;  %v576_v48 = vadd.f32 %v3758_v36, %v3406_v27  ;;  %v4526_v51 = vmul.f32 %v4493_v31, %v81_v37  ;;  %v4529_v52 = vmul.f32 %v4493_v31, %v83_v38 }
 0x32e   :  { %v4523_v49 = vadd.f32 %v3396_v30, %v423_v40  ;;  %v568_v50 = vadd.f32 %v3406_v27, %v567_v41  ;;  %v4533_v53 = vmul.f32 %v4493_v31, %v4506_v39  ;;  %v4536_v54 = vmul.f32 %v4495_v34, %v81_v37 }
 0x32f   :  { %v4545_v57 = vmul.f32 %v4495_v34, %v83_v38  ;;  %v819_v58 = vpack.c.bf16 %v4518_v46, %v4508_v42  ;;  %v4549_v59 = vmul.f32 %v576_v48, %v82_v44  ;;  %v4551_v60 = vmul.f32 %v576_v48, %v84_v45  ;;  %v90_v42 = vld [vmem:[%s5575_s6 + $0x8] sm:$0xff] }
 0x330   :  { %v4553_v61 = vmul.f32 %v576_v48, %v86_v47  ;;  %v595_v62 = vpack.c.bf16 %v4523_v49, %v4510_v43  ;;  %v4557_v63 = vmul.f32 %v568_v50, %v82_v44  ;;  %v4559_v0 = vmul.f32 %v568_v50, %v84_v45 }
 0x331   :  { %v4561_v2 = vmul.f32 %v576_v48, %v88_v55  ;;  %v4563_v3 = vmul.f32 %v568_v50, %v86_v47  ;;  %v978_v6 = vpack.c.bf16 %v4549_v59, %v4526_v51  ;;  %v979_v12 = vpack.c.bf16 %v4551_v60, %v4529_v52  ;;  %v4103_v51 = vld [vmem:[%s5576_s15] sm:$0xff]  }
 0x332   :  { %v3749_v1 = vpop.f32.mrb[4].mxu1  ;;  %v755_v9 = vpack.c.bf16 %v4557_v63, %v4536_v54  ;;  %v756_v10 = vpack.c.bf16 %v4559_v0, %v4545_v57  ;;  %v4578_v40 = vmul.f32 %v568_v50, %v88_v55 }
 0x333   :  { %v501_v4 = vadd.f32 %v3749_v1, %v3401_v56  ;;  %v492_v5 = vpop.f32.mrb[5].mxu1 }
 0x334   :  { %v493_v7 = vadd.f32 %v3401_v56, %v492_v5  ;;  %v3750_v8 = vpop.f32.mrb[6].mxu1  ;;  %v4585_v5 = vmul.f32 %v4495_v34, %v87_v21 }
 0x335   :  { %v504_v11 = vadd.f32 %v3750_v8, %v3401_v56  ;;  %v495_v16 = vpop.f32.mrb[7].mxu1  ;;  %v803_v18 = vmul.f32 %v501_v4, %v81_v37  ;;  %v805_v19 = vmul.f32 %v501_v4, %v83_v38  ;;  %v807_v20 = vmul.f32 %v501_v4, %v4506_v39 }
 0x336   :  { %v496_v22 = vadd.f32 %v3401_v56, %v495_v16  ;;  %v579_v23 = vmul.f32 %v493_v7, %v81_v37  ;;  %v581_v24 = vmul.f32 %v493_v7, %v83_v38  ;;  %v583_v25 = vmul.f32 %v493_v7, %v4506_v39 }
 0x337   :  { %v585_v27 = vmul.f32 %v493_v7, %v87_v21  ;;  %v804_v28 = vmul.f32 %v504_v11, %v82_v44  ;;  %v806_v29 = vmul.f32 %v504_v11, %v84_v45  ;;  %v808_v30 = vmul.f32 %v504_v11, %v86_v47 }
 0x338   :  { %v580_v32 = vmul.f32 %v496_v22, %v82_v44  ;;  %v582_v33 = vmul.f32 %v496_v22, %v84_v45  ;;  %v584_v35 = vmul.f32 %v496_v22, %v86_v47  ;;  %v586_v36 = vmul.f32 %v496_v22, %v88_v55 }
 0x339   :  { %v820_v41 = vpack.c.bf16 %v804_v28, %v803_v18  ;;  %v821_v43 = vpack.c.bf16 %v806_v29, %v805_v19  ;;  %v822_v48 = vpack.c.bf16 %v808_v30, %v807_v20  ;;  %v4582_v38 = vmul.f32 %v4495_v34, %v4506_v39  ;;  %v92_v28 = vld [vmem:[%s5575_s6 + $0x18] sm:$0xff]  ;;  %v93_v30 = vld [vmem:[%s5575_s6 + $0x20] sm:$0xff] }
 0x33a   :  { %v596_v49 = vpack.c.bf16 %v580_v32, %v579_v23  ;;  %v597_v1 = vpack.c.bf16 %v582_v33, %v581_v24  ;;  %v598_v56 = vpack.c.bf16 %v584_v35, %v583_v25  ;;  %v599_v37 = vpack.c.bf16 %v586_v36, %v585_v27  ;;  %v89_v27 = vld [vmem:[%s5575_s6] sm:$0xff]  ;;  %v94_v32 = vld [vmem:[%s5575_s6 + $0x28] sm:$0xff]  ;;  %v95_v35 = vld [vmem:[%s5575_s6 + $0x30] sm:$0xff] }
 0x33b   :  { %v809_v44 = vmul.f32 %v501_v4, %v87_v21  ;;  %v810_v45 = vmul.f32 %v504_v11, %v88_v55  ;;  %v4588_v47 = vmul.f32 %v4493_v31, %v87_v21  ;;  %v757_v8 = vpack.c.bf16 %v4563_v3, %v4582_v38  ;;  %v96_v36 = vld [vmem:[%s5575_s6 + $0x38] sm:$0xff] }
 0x33c   :  { %v604_v50 = vsel %vm192_vm1, %v596_v49, 0  ;;  %v758_v16 = vpack.c.bf16 %v4578_v40, %v4585_v5  ;;  %v980_v39 = vpack.c.bf16 %v4553_v61, %v4533_v53  ;;  %v607_v31 = vsel %vm192_vm1, %v597_v1, 0 }
 0x33d   :  { %3760 = vmatpush3.bf16.xpose.msra.mxu1 %v604_v50  ;;  %v823_v7 = vpack.c.bf16 %v810_v45, %v809_v44  ;;  %v981_v34 = vpack.c.bf16 %v4561_v2, %v4588_v47  ;;  %v610_v55 = vsel %vm192_vm1, %v598_v56, 0  ;;  %v613_v4 = vsel %vm192_vm1, %v599_v37, 0 }
 0x33e   :  { %3761 = vmatprep.subr.bf16.mxu1 %v4229_v26  ;;  %v828_v11 = vsel %vm192_vm1, %v820_v41, 0  ;;  %v831_v18 = vsel %vm192_vm1, %v821_v43, 0  ;;  %v834_v19 = vsel %vm192_vm1, %v822_v48, 0  ;;  %v4628_v46 = vpack.c.bf16 %v90_v42, %v89_v27  ;;  %v3419_v42 = vld [vmem:[%s5577_s16] ss:$0 sm:$0xff] }
 0x33f   :  { %v4646_v33 = vpack.c.bf16 %v94_v32, %v93_v30  ;;  %v4657_v41 = vpack.c.bf16 %v96_v36, %v95_v35 }
 0x340   :  { %4028 = vmatprep.subr.bf16.mxu0 %v4628_v46 }
 0x341   :  { %4030 = vmatpush3.bf16.msra.mxu0 %v4628_v46 }
 0x345   :  { %3762 = vmatpush3.bf16.xpose.msra.mxu1 %v607_v31 }
 0x346   :  { %3763 = vmatprep.subr.bf16.mxu1 %v4229_v26 }
 0x34d   :  { %3764 = vmatpush3.bf16.xpose.msra.mxu1 %v610_v55 }
 0x34e   :  { %3765 = vmatprep.subr.bf16.mxu1 %v4229_v26 }
 0x355   :  { %3766 = vmatpush3.bf16.xpose.msra.mxu1 %v613_v4 }
 0x356   :  { %3802 = vmatprep.subr.bf16.mxu1 %v4229_v26 }
 0x35c   :  { %3768 = vmatmul.mubr.msk.bf16.vlgmr.msra.gmra.mrb[8].mxu1 %vm192_vm1, %v595_v62  ;;  %v837_v62 = vsel %vm192_vm1, %v823_v7, 0 }
 0x35d   :  { %3803 = vmatpush3.bf16.xpose.msra.mxu1 %v828_v11  ;;  %3810 = vmatprep.mubr.msk.bf16.mxu1 %vm4230_vm2, %v4229_v26 }
 0x35e   :  { %3804 = vmatprep.subr.bf16.mxu1 %v4229_v26 }
 0x365   :  { %3805 = vmatpush3.bf16.xpose.msra.mxu1 %v831_v18 }
 0x366   :  { %3806 = vmatprep.subr.bf16.mxu1 %v4229_v26 }
 0x36d   :  { %3807 = vmatpush3.bf16.xpose.msra.mxu1 %v834_v19 }
 0x36e   :  { %3808 = vmatprep.subr.bf16.mxu1 %v4229_v26 }
 0x375   :  { %3809 = vmatpush3.bf16.xpose.msra.mxu1 %v837_v62 }
 0x376   :  { %3845 = vmatprep.subr.bf16.mxu1 %v4103_v51 }
 0x37c   :  { %3811 = vmatmul.mubr.msk.bf16.vlgmr.msra.gmra.mrb[12].mxu1 %vm192_vm1, %v819_v58  ;;  %v91_v58 = vld [vmem:[%s5575_s6 + $0x10] sm:$0xff] }
 0x37d   :  { %v4638_v29 = vpack.c.bf16 %v92_v28, %v91_v58  ;;  %3846 = vmatpush3.bf16.msra.mxu1 %v4103_v51 }
 0x37f   :  { %4032 = vmatprep.subr.bf16.mxu0 %v4638_v29 }
 0x380   :  { %4034 = vmatpush3.bf16.msra.mxu0 %v4638_v29 }
 0x381   :  { %4036 = vmatprep.subr.bf16.mxu0 %v4646_v33 }
 0x384   :  { %4038 = vmatpush3.bf16.msra.mxu0 %v4646_v33 }
 0x385   :  { %4040 = vmatprep.subr.bf16.mxu0 %v4657_v41 }
 0x388   :  { %4042 = vmatpush3.bf16.msra.mxu0 %v4657_v41 }
 0x389   :  { %3790 = vmatprep.subr.bf16.mxu0 %v4229_v26 }
 0x42f   :  { %v649_v20 = vpop.f32.mrb[8].mxu1 }
 0x430   :  { %v3769_v21 = vpop.f32.mrb[9].mxu1  ;;  %v657_v22 = vsel %vm656_vm3, %v649_v20, -inf }
 0x431   :  { %658 = vmax.xlane.f32.xlu0 %v657_v22  ;;  %v652_v23 = vpop.f32.mrb[10].mxu1  ;;  %v4104_v21 = vld [vmem:[%s5576_s15 + $0x8] sm:$0xff]  }
 0x432   :  { %v3770_v24 = vpop.f32.mrb[11].mxu1  ;;  %v660_v25 = vsel %vm656_vm3, %v652_v23, -inf  ;;  %3847 = vmatprep.subr.bf16.mxu1 %v4104_v21 }
 0x433   :  { %661 = vmax.xlane.f32.xlu1 %v660_v25  ;;  %3848 = vmatpush3.bf16.msra.mxu1 %v4104_v21 }
 0x44f   :  { %v873_v43 = vpop.f32.mrb[12].mxu1 }
 0x450   :  { %v3812_v48 = vpop.f32.mrb[13].mxu1  ;;  %v880_v49 = vsel %vm656_vm3, %v873_v43, -inf }
 0x451   :  { %881 = vmax.xlane.f32.xlu0 %v880_v49  ;;  %v876_v1 = vpop.f32.mrb[14].mxu1 }
 0x452   :  { %v3813_v56 = vpop.f32.mrb[15].mxu1  ;;  %v883_v37 = vsel %vm656_vm3, %v876_v1, -inf }
 0x453   :  { %884 = vmax.xlane.f32.xlu1 %v883_v37 }
 0x4be   :  { %v659_v44 = vpop.xlane.xlu0 %658 }
 0x4bf   :  { %v663_v45 = vsub.f32 %v649_v20, %v659_v44 }
 0x4c0   :  { %v662_v50 = vpop.xlane.xlu1 %661 }
 0x4c1   :  { %v665_v7 = vmul.f32 1.442695, %v663_v45  ;;  %v664_v31 = vsub.f32 %v652_v23, %v662_v50 }
 0x4c3   :  { %4149 = vpow2.f32 %v665_v7  ;;  %v667_v55 = vmul.f32 1.442695, %v664_v31 }
 0x4c5   :  { %4151 = vpow2.f32 %v667_v55 }
 0x4cd   :  { %v4150_v4 = vpop.eup %4149 }
 0x4ce   :  { %3787 = vmatprep.mubr.msk.f32.mxu0 %vm656_vm3, %v4150_v4 }
 0x4cf   :  { %v4152_v11 = vpop.eup %4151 }
 0x4d0   :  { %3788 = vmatmul.mubr.msk.f32.vlgmr.msra.gmra.mrb[8].mxu0 %vm656_vm3, %v4152_v11 }
 0x4d1   :  { %3791 = vmatpush3.bf16.msra.mxu0 %v755_v9  ;;  %3798 = vmatprep.mubr.msk.bf16.mxu0 %vm4230_vm2, %v4229_v26 }
 0x4d2   :  { %3792 = vmatprep.subr.bf16.mxu0 %v4229_v26 }
 0x4d5   :  { %3793 = vmatpush3.bf16.msra.mxu0 %v756_v10 }
 0x4d6   :  { %3794 = vmatprep.subr.bf16.mxu0 %v4229_v26 }
 0x4d9   :  { %3795 = vmatpush3.bf16.msra.mxu0 %v757_v8 }
 0x4da   :  { %3796 = vmatprep.subr.bf16.mxu0 %v4229_v26 }
 0x4dd   :  { %3797 = vmatpush3.bf16.msra.mxu0 %v758_v16 }
 0x4de   :  { %4044 = vmatprep.subr.bf16.mxu0 %v4628_v46  ;;  %v882_v54 = vpop.xlane.xlu0 %881 }
 0x4df   :  { %v886_v63 = vsub.f32 %v873_v43, %v882_v54  ;;  %v4105_v54 = vld [vmem:[%s5578_s19] sm:$0xff]  }
 0x4e0   :  { %v885_v18 = vpop.xlane.xlu1 %884 }
 0x4e1   :  { %v888_v0 = vmul.f32 1.442695, %v886_v63  ;;  %v887_v19 = vsub.f32 %v876_v1, %v885_v18  ;;  %v4106_v63 = vld [vmem:[%s5578_s19 + $0x8] sm:$0xff]  }
 0x4e3   :  { %v890_v40 = vmul.f32 1.442695, %v887_v19 }
 0x5a3   :  { %v3789_v9 = vpop.f32.mrb[8].mxu0 }
 0x5a4   :  { %4153 = vrcp.f32 %v3789_v9  ;;  %v741_v57 = vpop.f32.mrb[9].mxu0 }
 0x5a5   :  { %4155 = vrcp.f32 %v741_v57 }
 0x5a6   :  { %4157 = vpow2.f32 %v888_v0 }
 0x5a7   :  { %4159 = vpow2.f32 %v890_v40 }
 0x5ae   :  { %v4154_v10 = vpop.eup %4153 }
 0x5af   :  { %v4156_v3 = vpop.eup %4155  ;;  %v753_v38 = vmul.f32 %v4154_v10, %v4152_v11 }
 0x5b0   :  { %v752_v8 = vmul.f32 %v4156_v3, %v4150_v4  ;;  %v4158_v20 = vpop.eup %4157 }
 0x5b1   :  { %v4160_v5 = vpop.eup %4159 }
 0x5b2   :  { %v754_v62 = vpack.c.bf16 %v753_v38, %v752_v8 }
 0x5b4   :  { %3799 = vmatmul.mubr.msk.bf16.vlgmr.msra.gmra.mrb[12].mxu0 %vm656_vm3, %v754_v62 }
 0x5b5   :  { %4046 = vmatpush3.bf16.msra.mxu0 %v4628_v46  ;;  %3830 = vmatprep.mubr.msk.f32.mxu0 %vm656_vm3, %v4158_v20 }
 0x5b6   :  { %4048 = vmatprep.subr.bf16.mxu0 %v4638_v29 }
 0x5b9   :  { %4050 = vmatpush3.bf16.msra.mxu0 %v4638_v29 }
 0x5ba   :  { %4052 = vmatprep.subr.bf16.mxu0 %v4646_v33 }
 0x5bd   :  { %4054 = vmatpush3.bf16.msra.mxu0 %v4646_v33 }
 0x5be   :  { %4056 = vmatprep.subr.bf16.mxu0 %v4657_v41 }
 0x5c1   :  { %4058 = vmatpush3.bf16.msra.mxu0 %v4657_v41 }
 0x5c2   :  { %3833 = vmatprep.subr.bf16.mxu0 %v4229_v26 }
 0x5c4   :  { %3831 = vmatmul.mubr.msk.f32.vlgmr.msra.gmra.mrb[10].mxu0 %vm656_vm3, %v4160_v5 }
 0x5c5   :  { %3834 = vmatpush3.bf16.msra.mxu0 %v978_v6  ;;  %3841 = vmatprep.mubr.msk.bf16.mxu0 %vm4230_vm2, %v4229_v26 }
 0x5c6   :  { %3835 = vmatprep.subr.bf16.mxu0 %v4229_v26 }
 0x5c9   :  { %3836 = vmatpush3.bf16.msra.mxu0 %v979_v12 }
 0x5ca   :  { %3837 = vmatprep.subr.bf16.mxu0 %v4229_v26 }
 0x5cd   :  { %3838 = vmatpush3.bf16.msra.mxu0 %v980_v39 }
 0x5ce   :  { %3839 = vmatprep.subr.bf16.mxu0 %v4229_v26 }
 0x5d1   :  { %3840 = vmatpush3.bf16.msra.mxu0 %v981_v34 }
 0x5d2   :  { %3853 = vmatprep.subr.bf16.mxu0 %v4105_v54 }
 0x687   :  { %v796_v52 = vpop.f32.mrb[12].mxu0 }
 0x688   :  { %v3800_v59 = vpop.f32.mrb[13].mxu0 }
 0x689   :  { %v799_v60 = vpop.f32.mrb[14].mxu0 }
 0x68a   :  { %v1031_v6 = vpack.c.bf16 %v799_v60, %v796_v52  ;;  %v3801_v12 = vpop.f32.mrb[15].mxu0 }
 0x68c   :  { %3849 = vmatprep.mubr.msk.bf16.mxu1 %vm192_vm1, %v1031_v6 }
 0x697   :  { %v3832_v53 = vpop.f32.mrb[10].mxu0 }
 0x698   :  { %4161 = vrcp.f32 %v3832_v53  ;;  %v964_v61 = vpop.f32.mrb[11].mxu0 }
 0x699   :  { %4163 = vrcp.f32 %v964_v61 }
 0x6a2   :  { %v4162_v16 = vpop.eup %4161 }
 0x6a3   :  { %v4164_v2 = vpop.eup %4163  ;;  %v976_v47 = vmul.f32 %v4162_v16, %v4160_v5 }
 0x6a4   :  { %v975_v39 = vmul.f32 %v4164_v2, %v4158_v20 }
 0x6a6   :  { %v977_v34 = vpack.c.bf16 %v976_v47, %v975_v39 }
 0x6a8   :  { %3842 = vmatmul.mubr.msk.bf16.vlgmr.msra.gmra.mrb[16].mxu0 %vm656_vm3, %v977_v34 }
 0x6a9   :  { %3854 = vmatpush3.bf16.msra.mxu0 %v4105_v54  ;;  %v4108_v54 = vld [vmem:[%s5581_s21 + $0x8] sm:$0xff]  }
 0x6aa   :  { %3855 = vmatprep.subr.bf16.mxu0 %v4106_v63 }
 0x6ad   :  { %3856 = vmatpush3.bf16.msra.mxu0 %v4106_v63  ;;  %v4109_v63 = vld [vmem:[%s5581_s21 + $0x10] sm:$0xff]  }
 0x77b   :  { %v1019_v22 = vpop.f32.mrb[16].mxu0 }
 0x77c   :  { %v3843_v23 = vpop.f32.mrb[17].mxu0 }
 0x77d   :  { %v1022_v24 = vpop.f32.mrb[18].mxu0 }
 0x77e   :  { %v1032_v25 = vpack.c.bf16 %v1022_v24, %v1019_v22  ;;  %v3844_v27 = vpop.f32.mrb[19].mxu0 }
 0x780   :  { %3850 = vmatmul.mubr.msk.bf16.vlgmr.msra.gmra.mrb[16].mxu1 %vm192_vm1, %v1032_v25  ;;  %v3424_v25 = vld [vmem:[%s5579_s17] ss:$0 sm:$0xff] }
 0x853   :  { %v3851_v58 = vpop.f32.mrb[16].mxu1 }
 0x854   :  { %v1100_v28 = vadd.f32 %v3851_v58, %v3419_v42  ;;  %v1091_v30 = vpop.f32.mrb[17].mxu1 }
 0x855   :  { %v1092_v32 = vadd.f32 %v3419_v42, %v1091_v30  ;;  %v3852_v35 = vpop.f32.mrb[18].mxu1 }
 0x856   :  { %v4726_v36 = vadd.f32 %v1100_v28, %v4420_v14  ;;  %v1103_v43 = vadd.f32 %v3852_v35, %v3419_v42  ;;  %v1094_v48 = vpop.f32.mrb[19].mxu1 }
 0x857   :  { %v1095_v49 = vadd.f32 %v3419_v42, %v1094_v48  ;;  %v4729_v1 = vadd.f32 %v1092_v32, %v4428_v17 }
 0x858   :  { %v4732_v56 = vadd.f32 %v1103_v43, %v4418_v13  ;;  %v1118_v37 = vsel %vm192_vm1, %v4726_v36, 0.0  ;;  %v1130_v7 = vmul.f32 %v4726_v36, %v4726_v36  ;;  %v3425_v43 = vld [vmem:[%s5580_s18] ss:$0 sm:$0xff] }
 0x859   :  { %1119 = vadd.xlane.f32.xlu0 %v1118_v37  ;;  %v4737_v44 = vadd.f32 %v1095_v49, %v4424_v15  ;;  %v1112_v45 = vsel %vm192_vm1, %v4729_v1, 0.0  ;;  %v1128_v17 = vmul.f32 %v4729_v1, %v4729_v1 }
 0x85a   :  { %v1121_v14 = vsel %vm192_vm1, %v4732_v56, 0.0  ;;  %v1131_v55 = vmul.f32 %v4732_v56, %v4732_v56  ;;  %v1138_v4 = vsel %vm192_vm1, %v1130_v7, 0.0 }
 0x85b   :  { %1122 = vadd.xlane.f32.xlu1 %v1121_v14  ;;  %v1115_v13 = vsel %vm192_vm1, %v4737_v44, 0.0  ;;  %v1129_v50 = vmul.f32 %v4737_v44, %v4737_v44  ;;  %v1132_v15 = vsel %vm192_vm1, %v1128_v17, 0.0 }
 0x85c   :  { %v1141_v11 = vsel %vm192_vm1, %v1131_v55, 0.0 }
 0x85d   :  { %1113 = vadd.xlane.f32.xlu0 %v1112_v45  ;;  %v1135_v31 = vsel %vm192_vm1, %v1129_v50, 0.0 }
 0x85f   :  { %1116 = vadd.xlane.f32.xlu1 %v1115_v13 }
 0x861   :  { %1133 = vadd.xlane.f32.xlu0 %v1132_v15 }
 0x863   :  { %1136 = vadd.xlane.f32.xlu1 %v1135_v31 }
 0x865   :  { %1139 = vadd.xlane.f32.xlu0 %v1138_v4 }
 0x867   :  { %1142 = vadd.xlane.f32.xlu1 %v1141_v11  ;;  %v4107_v11 = vld [vmem:[%s5581_s21] sm:$0xff]  }
 0x868   :  { %3861 = vmatprep.subr.bf16.mxu1 %v4107_v11 }
 0x869   :  { %3862 = vmatpush3.bf16.msra.mxu1 %v4107_v11  ;;  %v3431_v11 = vld [vmem:[%s5583_s22] ss:$0 sm:$0xff] }
 0x86a   :  { %3863 = vmatprep.subr.bf16.mxu1 %v4108_v54 }
 0x86d   :  { %3864 = vmatpush3.bf16.msra.mxu1 %v4108_v54 }
 0x86e   :  { %3865 = vmatprep.subr.bf16.mxu1 %v4109_v63 }
 0x871   :  { %3866 = vmatpush3.bf16.msra.mxu1 %v4109_v63 }
 0x8e6   :  { %v1120_v9 = vpop.xlane.xlu0 %1119 }
 0x8e7   :  { %v1126_v8 = vmul.f32 0.03125, %v1120_v9  ;;  %v4110_v9 = vld [vmem:[%s5581_s21 + $0x18] sm:$0xff]  }
 0x8e8   :  { %v1123_v57 = vpop.xlane.xlu1 %1122  ;;  %3867 = vmatprep.subr.bf16.mxu1 %v4110_v9 }
 0x8e9   :  { %v1127_v20 = vmul.f32 0.03125, %v1123_v57  ;;  %v1150_v60 = vmul.f32 %v1126_v8, %v1126_v8  ;;  %v1158_v28 = vsub.f32 %v4726_v36, %v1126_v8  ;;  %3868 = vmatpush3.bf16.msra.mxu1 %v4110_v9  ;;  %v4111_v57 = vld [vmem:[%s5581_s21 + $0x20] sm:$0xff]  }
 0x8ea   :  { %v1114_v0 = vpop.xlane.xlu0 %1113  ;;  %3869 = vmatprep.subr.bf16.mxu1 %v4111_v57 }
 0x8eb   :  { %v1124_v10 = vmul.f32 0.03125, %v1114_v0  ;;  %v1151_v61 = vmul.f32 %v1127_v20, %v1127_v20  ;;  %v1159_v48 = vsub.f32 %v4732_v56, %v1127_v20  ;;  %v4112_v0 = vld [vmem:[%s5581_s21 + $0x28] sm:$0xff]  }
 0x8ec   :  { %v1117_v18 = vpop.xlane.xlu1 %1116 }
 0x8ed   :  { %v1125_v3 = vmul.f32 0.03125, %v1117_v18  ;;  %v1148_v19 = vmul.f32 %v1124_v10, %v1124_v10  ;;  %v1156_v23 = vsub.f32 %v4729_v1, %v1124_v10  ;;  %3870 = vmatpush3.bf16.msra.mxu1 %v4111_v57  ;;  %v4113_v10 = vld [vmem:[%s5581_s21 + $0x30] sm:$0xff]   ;;  %v4114_v18 = vld [vmem:[%s5581_s21 + $0x38] sm:$0xff]  }
 0x8ee   :  { %v1134_v38 = vpop.xlane.xlu0 %1133  ;;  %3871 = vmatprep.subr.bf16.mxu1 %v4112_v0 }
 0x8ef   :  { %v1144_v62 = vmul.f32 0.03125, %v1134_v38  ;;  %v1149_v5 = vmul.f32 %v1125_v3, %v1125_v3  ;;  %v1157_v27 = vsub.f32 %v4737_v44, %v1125_v3  ;;  %v3426_v3 = vld [vmem:[%s5582_s20] ss:$0 sm:$0xff] }
 0x8f0   :  { %v1137_v40 = vpop.xlane.xlu1 %1136 }
 0x8f1   :  { %v1152_v51 = vsub.f32 %v1144_v62, %v1148_v19  ;;  %v1145_v52 = vmul.f32 0.03125, %v1137_v40  ;;  %3872 = vmatpush3.bf16.msra.mxu1 %v4112_v0 }
 0x8f2   :  { %v1140_v59 = vpop.xlane.xlu0 %1139  ;;  %3873 = vmatprep.subr.bf16.mxu1 %v4113_v10 }
 0x8f3   :  { %v1160_v6 = vadd.f32 1e-06, %v1152_v51  ;;  %v1153_v12 = vsub.f32 %v1145_v52, %v1149_v5  ;;  %v1146_v53 = vmul.f32 0.03125, %v1140_v59 }
 0x8f4   :  { %v1143_v16 = vpop.xlane.xlu1 %1142 }
 0x8f5   :  { %4165 = vrsqrt.f32 %v1160_v6  ;;  %v1161_v2 = vadd.f32 1e-06, %v1153_v12  ;;  %v1154_v47 = vsub.f32 %v1146_v53, %v1150_v60  ;;  %v1147_v39 = vmul.f32 0.03125, %v1143_v16  ;;  %3874 = vmatpush3.bf16.msra.mxu1 %v4113_v10 }
 0x8f6   :  { %3875 = vmatprep.subr.bf16.mxu1 %v4114_v18 }
 0x8f7   :  { %4167 = vrsqrt.f32 %v1161_v2  ;;  %v1162_v34 = vadd.f32 1e-06, %v1154_v47  ;;  %v1155_v21 = vsub.f32 %v1147_v39, %v1151_v61 }
 0x8f9   :  { %4169 = vrsqrt.f32 %v1162_v34  ;;  %v1163_v22 = vadd.f32 1e-06, %v1155_v21  ;;  %3876 = vmatpush3.bf16.msra.mxu1 %v4114_v18 }
 0x8fa   :  { %4060 = vmatprep.subr.bf16.mxu1 %v4628_v46 }
 0x8fb   :  { %4171 = vrsqrt.f32 %v1163_v22 }
 0x8ff   :  { %v4166_v24 = vpop.eup %4165 }
 0x900   :  { %v1168_v42 = vmul.f32 %v4166_v24, %v1156_v23 }
 0x901   :  { %v4168_v58 = vpop.eup %4167 }
 0x902   :  { %v1169_v30 = vmul.f32 %v4168_v58, %v1157_v27  ;;  %v1178_v32 = vmul.f32 %v3424_v25, %v1168_v42 }
 0x903   :  { %v4170_v35 = vpop.eup %4169 }
 0x904   :  { %v1170_v49 = vmul.f32 %v4170_v35, %v1158_v28  ;;  %v1179_v37 = vmul.f32 %v3424_v25, %v1169_v30  ;;  %v1188_v17 = vadd.f32 %v3425_v43, %v1178_v32 }
 0x905   :  { %v4172_v14 = vpop.eup %4171 }
 0x906   :  { %v1171_v45 = vmul.f32 %v4172_v14, %v1159_v48  ;;  %v1189_v13 = vadd.f32 %v3425_v43, %v1179_v37  ;;  %v1180_v50 = vmul.f32 %v3424_v25, %v1170_v49 }
 0x908   :  { %v1197_v15 = vpack.c.bf16 %v1189_v13, %v1188_v17  ;;  %v1181_v7 = vmul.f32 %v3424_v25, %v1171_v45  ;;  %v1190_v31 = vadd.f32 %v3425_v43, %v1180_v50 }
 0x90a   :  { %3857 = vmatprep.mubr.msk.bf16.mxu0 %vm192_vm1, %v1197_v15  ;;  %v1191_v55 = vadd.f32 %v3425_v43, %v1181_v7 }
 0x90c   :  { %v1198_v4 = vpack.c.bf16 %v1191_v55, %v1190_v31 }
 0x90e   :  { %3858 = vmatmul.mubr.msk.bf16.vlgmr.msra.gmra.mrb[20].mxu0 %vm192_vm1, %v1198_v4 }
 0x9e1   :  { %v3859_v38 = vpop.f32.mrb[20].mxu0 }
 0x9e2   :  { %v1266_v8 = vadd.f32 %v3859_v38, %v3426_v3  ;;  %v1257_v19 = vpop.f32.mrb[21].mxu0 }
 0x9e3   :  { %v1258_v62 = vadd.f32 %v3426_v3, %v1257_v19  ;;  %v3860_v20 = vpop.f32.mrb[22].mxu0 }
 0x9e4   :  { %v1274_v40 = vmul.f32 %v1266_v8, %v1266_v8  ;;  %v1269_v5 = vadd.f32 %v3860_v20, %v3426_v3  ;;  %v1260_v51 = vpop.f32.mrb[23].mxu0 }
 0x9e5   :  { %v1272_v52 = vmul.f32 %v1258_v62, %v1258_v62  ;;  %v1261_v59 = vadd.f32 %v3426_v3, %v1260_v51 }
 0x9e6   :  { %v1278_v60 = vmul.f32 %v1274_v40, %v1266_v8  ;;  %v1275_v6 = vmul.f32 %v1269_v5, %v1269_v5 }
 0x9e7   :  { %v1276_v12 = vmul.f32 %v1272_v52, %v1258_v62  ;;  %v1273_v53 = vmul.f32 %v1261_v59, %v1261_v59 }
 0x9e8   :  { %v1282_v61 = vmul.f32 0.044715, %v1278_v60  ;;  %v1279_v16 = vmul.f32 %v1275_v6, %v1269_v5 }
 0x9e9   :  { %v1280_v2 = vmul.f32 0.044715, %v1276_v12  ;;  %v1277_v47 = vmul.f32 %v1273_v53, %v1261_v59  ;;  %v4115_v12 = vld [vmem:[%s5609_s8 + $0x10] sm:$0xff]   ;;  %v4116_v53 = vld [vmem:[%s5609_s8 + $0x18] sm:$0xff]  }
 0x9ea   :  { %v1286_v39 = vadd.f32 %v1282_v61, %v1266_v8  ;;  %v1283_v34 = vmul.f32 0.044715, %v1279_v16  ;;  %3881 = vmatprep.subr.bf16.mxu0 %v4115_v12  ;;  %v4117_v61 = vld [vmem:[%s5611_s0 + $0x10] sm:$0xff]  }
 0x9eb   :  { %v1284_v21 = vadd.f32 %v1280_v2, %v1258_v62  ;;  %v1281_v22 = vmul.f32 0.044715, %v1277_v47  ;;  %3882 = vmatpush3.bf16.msra.mxu0 %v4115_v12  ;;  %v4118_v12 = vld [vmem:[%s5611_s0 + $0x18] sm:$0xff]  }
 0x9ec   :  { %v1290_v23 = vmul.f32 0.7978846, %v1286_v39  ;;  %v1287_v24 = vadd.f32 %v1283_v34, %v1269_v5  ;;  %3883 = vmatprep.subr.bf16.mxu0 %v4116_v53 }
 0x9ed   :  { %v1288_v25 = vmul.f32 0.7978846, %v1284_v21  ;;  %v1285_v27 = vadd.f32 %v1281_v22, %v1261_v59 }
 0x9ee   :  { %4173 = vtanh.f32 %v1290_v23  ;;  %v1291_v42 = vmul.f32 0.7978846, %v1287_v24 }
 0x9ef   :  { %4175 = vtanh.f32 %v1288_v25  ;;  %v1289_v58 = vmul.f32 0.7978846, %v1285_v27  ;;  %3884 = vmatpush3.bf16.msra.mxu0 %v4116_v53  ;;  %v4119_v53 = vld [vmem:[%s5610_s29 + $0x10] sm:$0xff]  }
 0x9f0   :  { %4177 = vtanh.f32 %v1291_v42  ;;  %3889 = vmatprep.subr.bf16.mxu0 %v4117_v61 }
 0x9f1   :  { %4179 = vtanh.f32 %v1289_v58 }
 0x9f8   :  { %v4174_v28 = vpop.eup %4173 }
 0x9f9   :  { %v4176_v30 = vpop.eup %4175  ;;  %v1298_v32 = vadd.f32 1.0, %v4174_v28 }
 0x9fa   :  { %v4178_v35 = vpop.eup %4177  ;;  %v1296_v43 = vadd.f32 1.0, %v4176_v30 }
 0x9fb   :  { %v4180_v48 = vpop.eup %4179  ;;  %v1302_v49 = vmul.f32 0.5, %v1298_v32  ;;  %v1299_v37 = vadd.f32 1.0, %v4178_v35 }
 0x9fc   :  { %v1297_v14 = vadd.f32 1.0, %v4180_v48  ;;  %v1300_v45 = vmul.f32 0.5, %v1296_v43 }
 0x9fd   :  { %v1303_v17 = vmul.f32 0.5, %v1299_v37  ;;  %v1306_v50 = vmul.f32 %v1302_v49, %v1266_v8 }
 0x9fe   :  { %v1301_v13 = vmul.f32 0.5, %v1297_v14  ;;  %v1304_v7 = vmul.f32 %v1300_v45, %v1258_v62 }
 0x9ff   :  { %v1307_v15 = vmul.f32 %v1303_v17, %v1269_v5 }
 0xa00   :  { %v1305_v31 = vmul.f32 %v1301_v13, %v1261_v59 }
 0xa01   :  { %v1326_v55 = vpack.c.bf16 %v1307_v15, %v1306_v50 }
 0xa02   :  { %v1325_v4 = vpack.c.bf16 %v1305_v31, %v1304_v7 }
 0xa04   :  { %3877 = vmatprep.mubr.bf16.mxu1 %v1325_v4  ;;  %v3442_v4 = vld [vmem:[%s5612_s4 + $0x1] ss:$0 sm:$0xff] }
 0xa05   :  { %3878 = vmatmul.mubr.bf16.vlgmr.msra.gmra.mrb[20].mxu1 %v1326_v55 }
 0xa06   :  { %4062 = vmatpush3.bf16.msra.mxu1 %v4628_v46 }
 0xa07   :  { %4064 = vmatprep.subr.bf16.mxu1 %v4638_v29 }
 0xa0a   :  { %4066 = vmatpush3.bf16.msra.mxu1 %v4638_v29 }
 0xa0b   :  { %4068 = vmatprep.subr.bf16.mxu1 %v4646_v33 }
 0xa0e   :  { %4070 = vmatpush3.bf16.msra.mxu1 %v4646_v33 }
 0xa0f   :  { %4072 = vmatprep.subr.bf16.mxu1 %v4657_v41 }
 0xa12   :  { %4074 = vmatpush3.bf16.msra.mxu1 %v4657_v41 }
 0xa13   :  { %3936 = vmatprep.subr.bf16.mxu1 %v4229_v26 }
 0xad8   :  { %v3879_v54 = vpop.f32.mrb[20].mxu1 }
 0xad9   :  { %v1424_v63 = vadd.f32 %v3879_v54, %v3431_v11  ;;  %v1415_v9 = vpop.f32.mrb[21].mxu1 }
 0xada   :  { %v1416_v57 = vadd.f32 %v3431_v11, %v1415_v9  ;;  %v3880_v0 = vpop.f32.mrb[22].mxu1  ;;  %v3443_v9 = vld [vmem:[%s5613_s1 + $0x1] ss:$0 sm:$0xff] }
 0xadb   :  { %v4815_v10 = vadd.f32 %v1424_v63, %v4726_v36  ;;  %v1427_v18 = vadd.f32 %v3880_v0, %v3431_v11  ;;  %v1418_v3 = vpop.f32.mrb[23].mxu1 }
 0xadc   :  { %v1419_v38 = vadd.f32 %v3431_v11, %v1418_v3  ;;  %v4818_v8 = vadd.f32 %v1416_v57, %v4729_v1 }
 0xadd   :  { %v4821_v19 = vadd.f32 %v1427_v18, %v4732_v56  ;;  %v1444_v62 = vsel %vm192_vm1, %v4815_v10, 0.0  ;;  %v1456_v51 = vmul.f32 %v4815_v10, %v4815_v10 }
 0xade   :  { %1445 = vadd.xlane.f32.xlu0 %v1444_v62  ;;  %v4826_v20 = vadd.f32 %v1419_v38, %v4737_v44  ;;  %v1438_v40 = vsel %vm192_vm1, %v4818_v8, 0.0  ;;  %v1454_v1 = vmul.f32 %v4818_v8, %v4818_v8 }
 0xadf   :  { %v1447_v36 = vsel %vm192_vm1, %v4821_v19, 0.0  ;;  %v1457_v59 = vmul.f32 %v4821_v19, %v4821_v19  ;;  %v1464_v60 = vsel %vm192_vm1, %v1456_v51, 0.0 }
 0xae0   :  { %1448 = vadd.xlane.f32.xlu1 %v1447_v36  ;;  %v1441_v56 = vsel %vm192_vm1, %v4826_v20, 0.0  ;;  %v1455_v5 = vmul.f32 %v4826_v20, %v4826_v20  ;;  %v1458_v44 = vsel %vm192_vm1, %v1454_v1, 0.0 }
 0xae1   :  { %v1467_v6 = vsel %vm192_vm1, %v1457_v59, 0.0 }
 0xae2   :  { %1439 = vadd.xlane.f32.xlu0 %v1438_v40  ;;  %v1461_v52 = vsel %vm192_vm1, %v1455_v5, 0.0 }
 0xae4   :  { %1442 = vadd.xlane.f32.xlu1 %v1441_v56 }
 0xae6   :  { %1459 = vadd.xlane.f32.xlu0 %v1458_v44 }
 0xae8   :  { %1462 = vadd.xlane.f32.xlu1 %v1461_v52 }
 0xaea   :  { %1465 = vadd.xlane.f32.xlu0 %v1464_v60 }
 0xaec   :  { %1468 = vadd.xlane.f32.xlu1 %v1467_v6 }
 0xb6b   :  { %v1446_v16 = vpop.xlane.xlu0 %1445 }
 0xb6c   :  { %v1452_v23 = vmul.f32 0.03125, %v1446_v16  ;;  %v4120_v16 = vld [vmem:[%s5610_s29 + $0x18] sm:$0xff]  }
 0xb6d   :  { %v1449_v2 = vpop.xlane.xlu1 %1448 }
 0xb6e   :  { %v1453_v27 = vmul.f32 0.03125, %v1449_v2  ;;  %v1476_v35 = vmul.f32 %v1452_v23, %v1452_v23  ;;  %v1484_v57 = vsub.f32 %v4815_v10, %v1452_v23  ;;  %v3449_v2 = vld [vmem:[%s5572_s10 + $0x1] ss:$0 sm:$0xff] }
 0xb6f   :  { %v1440_v47 = vpop.xlane.xlu0 %1439 }
 0xb70   :  { %v1450_v39 = vmul.f32 0.03125, %v1440_v47  ;;  %v1477_v37 = vmul.f32 %v1453_v27, %v1453_v27  ;;  %v1485_v38 = vsub.f32 %v4821_v19, %v1453_v27 }
 0xb71   :  { %v1443_v34 = vpop.xlane.xlu1 %1442 }
 0xb72   :  { %v1451_v21 = vmul.f32 0.03125, %v1443_v34  ;;  %v1474_v24 = vmul.f32 %v1450_v39, %v1450_v39  ;;  %v1482_v31 = vsub.f32 %v4818_v8, %v1450_v39 }
 0xb73   :  { %v1460_v22 = vpop.xlane.xlu0 %1459 }
 0xb74   :  { %v1470_v25 = vmul.f32 0.03125, %v1460_v22  ;;  %v1475_v58 = vmul.f32 %v1451_v21, %v1451_v21  ;;  %v1483_v11 = vsub.f32 %v4826_v20, %v1451_v21 }
 0xb75   :  { %v1463_v42 = vpop.xlane.xlu1 %1462 }
 0xb76   :  { %v1478_v28 = vsub.f32 %v1470_v25, %v1474_v24  ;;  %v1471_v30 = vmul.f32 0.03125, %v1463_v42  ;;  %v3459_v42 = vld [vmem:[%s5574_s12 + $0x1] ss:$0 sm:$0xff] }
 0xb77   :  { %v1466_v32 = vpop.xlane.xlu0 %1465 }
 0xb78   :  { %v1486_v43 = vadd.f32 1e-06, %v1478_v28  ;;  %v1479_v48 = vsub.f32 %v1471_v30, %v1475_v58  ;;  %v1472_v49 = vmul.f32 0.03125, %v1466_v32 }
 0xb79   :  { %v1469_v14 = vpop.xlane.xlu1 %1468 }
 0xb7a   :  { %4181 = vrsqrt.f32 %v1486_v43  ;;  %v1487_v45 = vadd.f32 1e-06, %v1479_v48  ;;  %v1480_v17 = vsub.f32 %v1472_v49, %v1476_v35  ;;  %v1473_v13 = vmul.f32 0.03125, %v1469_v14  ;;  %v4221_v49 = vld [vmem:[%s5573_s5] sm:$0xff]  ;;  %v4222_v14 = vld [vmem:[%s5573_s5 + $0x10] sm:$0xff] }
 0xb7c   :  { %4183 = vrsqrt.f32 %v1487_v45  ;;  %v1488_v50 = vadd.f32 1e-06, %v1480_v17  ;;  %v1481_v15 = vsub.f32 %v1473_v13, %v1477_v37  ;;  %v4223_v17 = vld [vmem:[%s5573_s5 + $0x20] sm:$0xff] }
 0xb7e   :  { %4185 = vrsqrt.f32 %v1488_v50  ;;  %v1489_v7 = vadd.f32 1e-06, %v1481_v15 }
 0xb80   :  { %4187 = vrsqrt.f32 %v1489_v7 }
 0xb84   :  { %v4182_v55 = vpop.eup %4181 }
 0xb85   :  { %v1494_v54 = vmul.f32 %v4182_v55, %v1482_v31  ;;  %v4224_v55 = vld [vmem:[%s5573_s5 + $0x30] sm:$0xff] }
 0xb86   :  { %v4184_v63 = vpop.eup %4183 }
 0xb87   :  { %v1495_v0 = vmul.f32 %v4184_v63, %v1483_v11  ;;  %v1504_v18 = vmul.f32 %v3442_v4, %v1494_v54  ;;  %v4225_v11 = vld [vmem:[%s5573_s5 + $0x8] sm:$0xff]  ;;  %v4226_v63 = vld [vmem:[%s5573_s5 + $0x18] sm:$0xff] }
 0xb88   :  { %v4186_v3 = vpop.eup %4185 }
 0xb89   :  { %v1496_v62 = vmul.f32 %v4186_v3, %v1484_v57  ;;  %v1505_v36 = vmul.f32 %v3442_v4, %v1495_v0  ;;  %v1514_v40 = vadd.f32 %v3443_v9, %v1504_v18  ;;  %v4227_v57 = vld [vmem:[%s5573_s5 + $0x28] sm:$0xff]  ;;  %v3469_v18 = vld [vmem:[%s5571_s14 + $0x1] ss:$0 sm:$0xff] }
 0xb8a   :  { %v4188_v1 = vpop.eup %4187 }
 0xb8b   :  { %v1497_v56 = vmul.f32 %v4188_v1, %v1485_v38  ;;  %v1515_v5 = vadd.f32 %v3443_v9, %v1505_v36  ;;  %v1506_v44 = vmul.f32 %v3442_v4, %v1496_v62  ;;  %v4228_v36 = vld [vmem:[%s5573_s5 + $0x38] sm:$0xff] }
 0xb8d   :  { %v1525_v51 = vpack.c.bf16 %v1515_v5, %v1514_v40  ;;  %v1507_v52 = vmul.f32 %v3442_v4, %v1497_v56  ;;  %v1516_v59 = vadd.f32 %v3443_v9, %v1506_v44 }
 0xb8f   :  { %3885 = vmatprep.mubr.msk.bf16.mxu0 %vm192_vm1, %v1525_v51  ;;  %v1517_v60 = vadd.f32 %v3443_v9, %v1507_v52 }
 0xb91   :  { %v1526_v6 = vpack.c.bf16 %v1517_v60, %v1516_v59 }
 0xb93   :  { %3886 = vmatmul.mubr.msk.bf16.vlgmr.msra.gmra.mrb[24].mxu0 %vm192_vm1, %v1526_v6 }
 0xb94   :  { %3890 = vmatpush3.bf16.msra.mxu0 %v4117_v61  ;;  %3893 = vmatprep.mubr.msk.bf16.mxu0 %vm192_vm1, %v1525_v51 }
 0xb95   :  { %3891 = vmatprep.subr.bf16.mxu0 %v4118_v12 }
 0xb98   :  { %3892 = vmatpush3.bf16.msra.mxu0 %v4118_v12 }
 0xb99   :  { %3897 = vmatprep.subr.bf16.mxu0 %v4119_v53 }
 0xb9b   :  { %3894 = vmatmul.mubr.msk.bf16.vlgmr.msra.gmra.mrb[28].mxu0 %vm192_vm1, %v1526_v6 }
 0xb9c   :  { %3898 = vmatpush3.bf16.msra.mxu0 %v4119_v53  ;;  %3901 = vmatprep.mubr.msk.bf16.mxu0 %vm192_vm1, %v1525_v51 }
 0xb9d   :  { %3899 = vmatprep.subr.bf16.mxu0 %v4120_v16 }
 0xba0   :  { %3900 = vmatpush3.bf16.msra.mxu0 %v4120_v16 }
 0xba1   :  { %3905 = vmatprep.subr.bf16.mxu0 %v4229_v26 }
 0xba3   :  { %3902 = vmatmul.mubr.msk.bf16.vlgmr.msra.gmra.mrb[32].mxu0 %vm192_vm1, %v1526_v6 }
 0xba4   :  { %3913 = vmatprep.mubr.msk.bf16.mxu0 %vm4230_vm2, %v4229_v26 }
 0xc66   :  { %v3887_v61 = vpop.f32.mrb[24].mxu0 }
 0xc67   :  { %v1585_v47 = vpop.f32.mrb[25].mxu0  ;;  %v4886_v34 = vadd.f32 %v3887_v61, %v3449_v2 }
 0xc68   :  { %v3888_v39 = vpop.f32.mrb[26].mxu0  ;;  %v4890_v23 = vadd.f32 %v3449_v2, %v1585_v47 }
 0xc69   :  { %v4888_v21 = vadd.f32 %v3888_v39, %v3449_v2  ;;  %v1588_v22 = vpop.f32.mrb[27].mxu0 }
 0xc6a   :  { %v4892_v24 = vadd.f32 %v3449_v2, %v1588_v22 }
 0xc6b   :  { %v1987_v25 = vpack.c.bf16 %v4888_v21, %v4886_v34 }
 0xc6c   :  { %v1764_v27 = vpack.c.bf16 %v4892_v24, %v4890_v23 }
 0xc6e   :  { %v3895_v58 = vpop.f32.mrb[28].mxu0 }
 0xc6f   :  { %v1668_v28 = vadd.f32 %v3895_v58, %v3459_v42  ;;  %v1659_v30 = vpop.f32.mrb[29].mxu0 }
 0xc70   :  { %v1660_v32 = vadd.f32 %v3459_v42, %v1659_v30  ;;  %v3896_v35 = vpop.f32.mrb[30].mxu0 }
 0xc71   :  { %v1671_v43 = vadd.f32 %v3896_v35, %v3459_v42  ;;  %v1662_v48 = vpop.f32.mrb[31].mxu0  ;;  %v4904_v37 = vmul.f32 %v4221_v49, %v1668_v28  ;;  %v4909_v45 = vmul.f32 %v4222_v14, %v1668_v28  ;;  %v4914_v13 = vmul.f32 %v4223_v17, %v1668_v28 }
 0xc72   :  { %v1663_v50 = vadd.f32 %v3459_v42, %v1662_v48  ;;  %v1748_v15 = vmul.f32 %v4221_v49, %v1660_v32  ;;  %v1750_v7 = vmul.f32 %v4222_v14, %v1660_v32  ;;  %v4916_v31 = vmul.f32 %v4223_v17, %v1660_v32 }
 0xc73   :  { %v4921_v4 = vmul.f32 %v4224_v55, %v1660_v32  ;;  %v4926_v54 = vmul.f32 %v4225_v11, %v1671_v43  ;;  %v4931_v9 = vmul.f32 %v4226_v63, %v1671_v43  ;;  %v4936_v0 = vmul.f32 %v4227_v57, %v1671_v43 }
 0xc74   :  { %v1749_v3 = vmul.f32 %v4225_v11, %v1663_v50  ;;  %v1751_v38 = vmul.f32 %v4226_v63, %v1663_v50  ;;  %v1753_v62 = vmul.f32 %v4227_v57, %v1663_v50  ;;  %v1755_v40 = vmul.f32 %v4228_v36, %v1663_v50 }
 0xc75   :  { %v1988_v1 = vpack.c.bf16 %v4926_v54, %v4904_v37  ;;  %v1989_v56 = vpack.c.bf16 %v4931_v9, %v4909_v45  ;;  %v1990_v5 = vpack.c.bf16 %v4936_v0, %v4914_v13  ;;  %v1977_v47 = vmul.f32 %v4224_v55, %v1668_v28 }
 0xc76   :  { %v3903_v44 = vpop.f32.mrb[32].mxu0  ;;  %v1765_v51 = vpack.c.bf16 %v1749_v3, %v1748_v15  ;;  %v1766_v52 = vpack.c.bf16 %v1751_v38, %v1750_v7  ;;  %v1767_v59 = vpack.c.bf16 %v1753_v62, %v4916_v31  ;;  %v1768_v60 = vpack.c.bf16 %v1755_v40, %v4921_v4 }
 0xc77   :  { %v1742_v6 = vadd.f32 %v3903_v44, %v3469_v18  ;;  %v1733_v12 = vpop.f32.mrb[33].mxu0  ;;  %v1978_v48 = vmul.f32 %v4228_v36, %v1671_v43  ;;  %v1996_v62 = vsel %vm192_vm1, %v1988_v1, 0  ;;  %v2002_v40 = vsel %vm192_vm1, %v1990_v5, 0 }
 0xc78   :  { %v1734_v53 = vadd.f32 %v3469_v18, %v1733_v12  ;;  %v3904_v16 = vpop.f32.mrb[34].mxu0  ;;  %v1773_v61 = vsel %vm192_vm1, %v1765_v51, 0  ;;  %v1776_v58 = vsel %vm192_vm1, %v1766_v52, 0  ;;  %v1779_v3 = vsel %vm192_vm1, %v1767_v59, 0 }
 0xc79   :  { %v1736_v2 = vpop.f32.mrb[35].mxu0  ;;  %3906 = vmatpush3.bf16.xpose.msra.mxu0 %v1773_v61  ;;  %v4953_v39 = vmul.f32 %v4221_v49, %v1742_v6  ;;  %v4955_v22 = vmul.f32 %v4222_v14, %v1742_v6  ;;  %v4957_v42 = vmul.f32 %v4223_v17, %v1742_v6  ;;  %v4961_v30 = vmul.f32 %v4224_v55, %v1742_v6 }
 0xc7a   :  { %3907 = vmatprep.subr.bf16.mxu0 %v4229_v26  ;;  %v1745_v32 = vadd.f32 %v3904_v16, %v3469_v18  ;;  %v1737_v35 = vadd.f32 %v3469_v18, %v1736_v2  ;;  %v4963_v37 = vmul.f32 %v4221_v49, %v1734_v53  ;;  %v4965_v45 = vmul.f32 %v4222_v14, %v1734_v53 }
 0xc7b   :  { %v4967_v28 = vmul.f32 %v4223_v17, %v1734_v53  ;;  %v4969_v13 = vmul.f32 %v4224_v55, %v1734_v53  ;;  %v1991_v14 = vpack.c.bf16 %v1978_v48, %v1977_v47  ;;  %v1782_v38 = vsel %vm192_vm1, %v1768_v60, 0 }
 0xc7c   :  { %v4971_v50 = vmul.f32 %v4225_v11, %v1745_v32  ;;  %v4973_v15 = vmul.f32 %v4226_v63, %v1745_v32  ;;  %v4975_v7 = vmul.f32 %v4227_v57, %v1745_v32  ;;  %v4977_v31 = vmul.f32 %v4228_v36, %v1745_v32 }
 0xc7d   :  { %v4979_v4 = vmul.f32 %v4225_v11, %v1737_v35  ;;  %v4981_v54 = vmul.f32 %v4226_v63, %v1737_v35  ;;  %v4983_v43 = vmul.f32 %v4227_v57, %v1737_v35  ;;  %v4985_v49 = vmul.f32 %v4228_v36, %v1737_v35 }
 0xc7e   :  { %v2146_v17 = vpack.c.bf16 %v4971_v50, %v4953_v39  ;;  %v2147_v55 = vpack.c.bf16 %v4973_v15, %v4955_v22  ;;  %v2148_v9 = vpack.c.bf16 %v4975_v7, %v4957_v42  ;;  %v2149_v18 = vpack.c.bf16 %v4977_v31, %v4961_v30 }
 0xc7f   :  { %v1923_v11 = vpack.c.bf16 %v4979_v4, %v4963_v37  ;;  %v1924_v63 = vpack.c.bf16 %v4981_v54, %v4965_v45  ;;  %v1925_v57 = vpack.c.bf16 %v4983_v43, %v4967_v28  ;;  %v1926_v0 = vpack.c.bf16 %v4985_v49, %v4969_v13 }
 0xc80   :  { %v1999_v36 = vsel %vm192_vm1, %v1989_v56, 0  ;;  %v2005_v23 = vsel %vm192_vm1, %v1991_v14, 0 }
 0xc81   :  { %3908 = vmatpush3.bf16.xpose.msra.mxu0 %v1776_v58 }
 0xc82   :  { %3909 = vmatprep.subr.bf16.mxu0 %v4229_v26 }
 0xc89   :  { %3910 = vmatpush3.bf16.xpose.msra.mxu0 %v1779_v3  ;;  %v3487_v3 = vld [vmem:[%s5577_s16 + $0x1] ss:$0 sm:$0xff] }
 0xc8a   :  { %3911 = vmatprep.subr.bf16.mxu0 %v4229_v26 }
 0xc91   :  { %3912 = vmatpush3.bf16.xpose.msra.mxu0 %v1782_v38 }
 0xc92   :  { %3948 = vmatprep.subr.bf16.mxu0 %v4229_v26 }
 0xc98   :  { %3914 = vmatmul.mubr.msk.bf16.vlgmr.msra.gmra.mrb[36].mxu0 %vm192_vm1, %v1764_v27 }
 0xc99   :  { %3949 = vmatpush3.bf16.xpose.msra.mxu0 %v1996_v62  ;;  %3956 = vmatprep.mubr.msk.bf16.mxu0 %vm4230_vm2, %v4229_v26 }
 0xc9a   :  { %3950 = vmatprep.subr.bf16.mxu0 %v4229_v26 }
 0xca1   :  { %3951 = vmatpush3.bf16.xpose.msra.mxu0 %v1999_v36 }
 0xca2   :  { %3952 = vmatprep.subr.bf16.mxu0 %v4229_v26 }
 0xca9   :  { %3953 = vmatpush3.bf16.xpose.msra.mxu0 %v2002_v40 }
 0xcaa   :  { %3954 = vmatprep.subr.bf16.mxu0 %v4229_v26 }
 0xcb1   :  { %3955 = vmatpush3.bf16.xpose.msra.mxu0 %v2005_v23 }
 0xcb8   :  { %3957 = vmatmul.mubr.msk.bf16.vlgmr.msra.gmra.mrb[40].mxu0 %vm192_vm1, %v1987_v25 }
 0xd6b   :  { %v1818_v24 = vpop.f32.mrb[36].mxu0 }
 0xd6c   :  { %v3915_v27 = vpop.f32.mrb[37].mxu0  ;;  %v1825_v1 = vsel %vm656_vm3, %v1818_v24, -inf }
 0xd6d   :  { %1826 = vmax.xlane.f32.xlu0 %v1825_v1  ;;  %v1821_v56 = vpop.f32.mrb[38].mxu0 }
 0xd6e   :  { %v3916_v44 = vpop.f32.mrb[39].mxu0  ;;  %v1828_v5 = vsel %vm656_vm3, %v1821_v56, -inf }
 0xd6f   :  { %1829 = vmax.xlane.f32.xlu1 %v1828_v5 }
 0xd8b   :  { %v2041_v51 = vpop.f32.mrb[40].mxu0 }
 0xd8c   :  { %v3958_v52 = vpop.f32.mrb[41].mxu0  ;;  %v2048_v59 = vsel %vm656_vm3, %v2041_v51, -inf }
 0xd8d   :  { %2049 = vmax.xlane.f32.xlu0 %v2048_v59  ;;  %v2044_v60 = vpop.f32.mrb[42].mxu0 }
 0xd8e   :  { %v3959_v6 = vpop.f32.mrb[43].mxu0  ;;  %v2051_v34 = vsel %vm656_vm3, %v2044_v60, -inf }
 0xd8f   :  { %2052 = vmax.xlane.f32.xlu1 %v2051_v34 }
 0xdfa   :  { %v1827_v21 = vpop.xlane.xlu0 %1826 }
 0xdfb   :  { %v1831_v25 = vsub.f32 %v1818_v24, %v1827_v21 }
 0xdfc   :  { %v1830_v12 = vpop.xlane.xlu1 %1829 }
 0xdfd   :  { %v1833_v53 = vmul.f32 1.442695, %v1831_v25  ;;  %v1832_v16 = vsub.f32 %v1821_v56, %v1830_v12 }
 0xdff   :  { %4189 = vpow2.f32 %v1833_v53  ;;  %v1835_v61 = vmul.f32 1.442695, %v1832_v16  ;;  %v4123_v53 = vld [vmem:[%s5578_s19 + $0x10] sm:$0xff]   ;;  %v4124_v16 = vld [vmem:[%s5578_s19 + $0x18] sm:$0xff]  }
 0xe01   :  { %4191 = vpow2.f32 %v1835_v61 }
 0xe09   :  { %v4190_v2 = vpop.eup %4189 }
 0xe0a   :  { %3933 = vmatprep.mubr.msk.f32.mxu1 %vm656_vm3, %v4190_v2 }
 0xe0b   :  { %v4192_v47 = vpop.eup %4191 }
 0xe0c   :  { %3934 = vmatmul.mubr.msk.f32.vlgmr.msra.gmra.mrb[24].mxu1 %vm656_vm3, %v4192_v47 }
 0xe0d   :  { %3937 = vmatpush3.bf16.msra.mxu1 %v1923_v11  ;;  %3944 = vmatprep.mubr.msk.bf16.mxu1 %vm4230_vm2, %v4229_v26 }
 0xe0e   :  { %3938 = vmatprep.subr.bf16.mxu1 %v4229_v26 }
 0xe11   :  { %3939 = vmatpush3.bf16.msra.mxu1 %v1924_v63 }
 0xe12   :  { %3940 = vmatprep.subr.bf16.mxu1 %v4229_v26 }
 0xe15   :  { %3941 = vmatpush3.bf16.msra.mxu1 %v1925_v57 }
 0xe16   :  { %3942 = vmatprep.subr.bf16.mxu1 %v4229_v26 }
 0xe19   :  { %3943 = vmatpush3.bf16.msra.mxu1 %v1926_v0 }
 0xe1a   :  { %4076 = vmatprep.subr.bf16.mxu1 %v4628_v46  ;;  %v2050_v58 = vpop.xlane.xlu0 %2049 }
 0xe1b   :  { %v2054_v32 = vsub.f32 %v2041_v51, %v2050_v58 }
 0xe1c   :  { %v2053_v28 = vpop.xlane.xlu1 %2052 }
 0xe1d   :  { %v2056_v37 = vmul.f32 1.442695, %v2054_v32  ;;  %v2055_v43 = vsub.f32 %v2044_v60, %v2053_v28 }
 0xe1f   :  { %v2058_v11 = vmul.f32 1.442695, %v2055_v43 }
 0xedf   :  { %v3935_v35 = vpop.f32.mrb[24].mxu1 }
 0xee0   :  { %4193 = vrcp.f32 %v3935_v35  ;;  %v1909_v48 = vpop.f32.mrb[25].mxu1 }
 0xee1   :  { %4195 = vrcp.f32 %v1909_v48 }
 0xee2   :  { %4197 = vpow2.f32 %v2056_v37 }
 0xee3   :  { %4199 = vpow2.f32 %v2058_v11 }
 0xeea   :  { %v4194_v45 = vpop.eup %4193 }
 0xeeb   :  { %v4196_v13 = vpop.eup %4195  ;;  %v1921_v4 = vmul.f32 %v4194_v45, %v4192_v47 }
 0xeec   :  { %v1920_v54 = vmul.f32 %v4196_v13, %v4190_v2  ;;  %v4198_v14 = vpop.eup %4197 }
 0xeed   :  { %v4200_v63 = vpop.eup %4199 }
 0xeee   :  { %v1922_v49 = vpack.c.bf16 %v1921_v4, %v1920_v54 }
 0xef0   :  { %3945 = vmatmul.mubr.msk.bf16.vlgmr.msra.gmra.mrb[28].mxu1 %vm656_vm3, %v1922_v49 }
 0xef1   :  { %4078 = vmatpush3.bf16.msra.mxu1 %v4628_v46  ;;  %3976 = vmatprep.mubr.msk.f32.mxu1 %vm656_vm3, %v4198_v14  ;;  %v4121_v46 = vld [vmem:[%s5576_s15 + $0x10] sm:$0xff]  }
 0xef2   :  { %4080 = vmatprep.subr.bf16.mxu1 %v4638_v29  ;;  %3991 = vmatprep.subr.bf16.mxu0 %v4121_v46 }
 0xef3   :  { %3992 = vmatpush3.bf16.msra.mxu0 %v4121_v46 }
 0xef5   :  { %4082 = vmatpush3.bf16.msra.mxu1 %v4638_v29 }
 0xef6   :  { %4084 = vmatprep.subr.bf16.mxu1 %v4646_v33 }
 0xef9   :  { %4086 = vmatpush3.bf16.msra.mxu1 %v4646_v33 }
 0xefa   :  { %4088 = vmatprep.subr.bf16.mxu1 %v4657_v41 }
 0xefd   :  { %4090 = vmatpush3.bf16.msra.mxu1 %v4657_v41 }
 0xefe   :  { %3979 = vmatprep.subr.bf16.mxu1 %v4229_v26 }
 0xf00   :  { %3977 = vmatmul.mubr.msk.f32.vlgmr.msra.gmra.mrb[26].mxu1 %vm656_vm3, %v4200_v63 }
 0xf01   :  { %3980 = vmatpush3.bf16.msra.mxu1 %v2146_v17  ;;  %3987 = vmatprep.mubr.msk.bf16.mxu1 %vm4230_vm2, %v4229_v26  ;;  %v4122_v17 = vld [vmem:[%s5576_s15 + $0x18] sm:$0xff]  }
 0xf02   :  { %3981 = vmatprep.subr.bf16.mxu1 %v4229_v26  ;;  %3993 = vmatprep.subr.bf16.mxu0 %v4122_v17 }
 0xf03   :  { %3994 = vmatpush3.bf16.msra.mxu0 %v4122_v17 }
 0xf05   :  { %3982 = vmatpush3.bf16.msra.mxu1 %v2147_v55 }
 0xf06   :  { %3983 = vmatprep.subr.bf16.mxu1 %v4229_v26 }
 0xf09   :  { %3984 = vmatpush3.bf16.msra.mxu1 %v2148_v9 }
 0xf0a   :  { %3985 = vmatprep.subr.bf16.mxu1 %v4229_v26 }
 0xf0d   :  { %3986 = vmatpush3.bf16.msra.mxu1 %v2149_v18 }
 0xf0e   :  { %3999 = vmatprep.subr.bf16.mxu1 %v4123_v53 }
 0xfc3   :  { %v1964_v29 = vpop.f32.mrb[28].mxu1 }
 0xfc4   :  { %v3946_v33 = vpop.f32.mrb[29].mxu1 }
 0xfc5   :  { %v1967_v41 = vpop.f32.mrb[30].mxu1 }
 0xfc6   :  { %v2201_v39 = vpack.c.bf16 %v1967_v41, %v1964_v29  ;;  %v3947_v22 = vpop.f32.mrb[31].mxu1 }
 0xfc8   :  { %3995 = vmatprep.mubr.msk.bf16.mxu0 %vm192_vm1, %v2201_v39 }
 0xfd3   :  { %v3978_v42 = vpop.f32.mrb[26].mxu1 }
 0xfd4   :  { %4201 = vrcp.f32 %v3978_v42  ;;  %v2132_v26 = vpop.f32.mrb[27].mxu1 }
 0xfd5   :  { %4203 = vrcp.f32 %v2132_v26 }
 0xfde   :  { %v4202_v50 = vpop.eup %4201 }
 0xfdf   :  { %v4204_v30 = vpop.eup %4203  ;;  %v2144_v15 = vmul.f32 %v4202_v50, %v4200_v63 }
 0xfe0   :  { %v2143_v7 = vmul.f32 %v4204_v30, %v4198_v14 }
 0xfe2   :  { %v2145_v31 = vpack.c.bf16 %v2144_v15, %v2143_v7 }
 0xfe4   :  { %3988 = vmatmul.mubr.msk.bf16.vlgmr.msra.gmra.mrb[32].mxu1 %vm656_vm3, %v2145_v31  ;;  %v3494_v31 = vld [vmem:[%s5579_s17 + $0x1] ss:$0 sm:$0xff] }
 0xfe5   :  { %4000 = vmatpush3.bf16.msra.mxu1 %v4123_v53  ;;  %v4131_v53 = vld [vmem:[%s5581_s21 + $0x70] sm:$0xff]  }
 0xfe6   :  { %4001 = vmatprep.subr.bf16.mxu1 %v4124_v16 }
 0xfe9   :  { %4002 = vmatpush3.bf16.msra.mxu1 %v4124_v16  ;;  %v4132_v16 = vld [vmem:[%s5581_s21 + $0x78] sm:$0xff]  }
0x10b7   :  { %v2187_v55 = vpop.f32.mrb[32].mxu1 }
0x10b8   :  { %v3989_v9 = vpop.f32.mrb[33].mxu1 }
0x10b9   :  { %v2190_v57 = vpop.f32.mrb[34].mxu1 }
0x10ba   :  { %v2202_v0 = vpack.c.bf16 %v2190_v57, %v2187_v55  ;;  %v3990_v18 = vpop.f32.mrb[35].mxu1 }
0x10bc   :  { %3996 = vmatmul.mubr.msk.bf16.vlgmr.msra.gmra.mrb[44].mxu0 %vm192_vm1, %v2202_v0 }
0x118f   :  { %v3997_v38 = vpop.f32.mrb[44].mxu0 }
0x1190   :  { %v2270_v62 = vadd.f32 %v3997_v38, %v3487_v3  ;;  %v2261_v36 = vpop.f32.mrb[45].mxu0  ;;  %v3495_v38 = vld [vmem:[%s5580_s18 + $0x1] ss:$0 sm:$0xff] }
0x1191   :  { %v2262_v40 = vadd.f32 %v3487_v3, %v2261_v36  ;;  %v3998_v23 = vpop.f32.mrb[46].mxu0 }
0x1192   :  { %v5078_v24 = vadd.f32 %v2270_v62, %v4815_v10  ;;  %v2273_v27 = vadd.f32 %v3998_v23, %v3487_v3  ;;  %v2264_v1 = vpop.f32.mrb[47].mxu0 }
0x1193   :  { %v2265_v56 = vadd.f32 %v3487_v3, %v2264_v1  ;;  %v5081_v44 = vadd.f32 %v2262_v40, %v4818_v8 }
0x1194   :  { %v5084_v5 = vadd.f32 %v2273_v27, %v4821_v19  ;;  %v2290_v51 = vsel %vm192_vm1, %v5078_v24, 0.0  ;;  %v2302_v6 = vmul.f32 %v5078_v24, %v5078_v24 }
0x1195   :  { %2291 = vadd.xlane.f32.xlu0 %v2290_v51  ;;  %v5089_v52 = vadd.f32 %v2265_v56, %v4826_v20  ;;  %v2284_v59 = vsel %vm192_vm1, %v5081_v44, 0.0  ;;  %v2300_v8 = vmul.f32 %v5081_v44, %v5081_v44 }
0x1196   :  { %v2293_v10 = vsel %vm192_vm1, %v5084_v5, 0.0  ;;  %v2303_v21 = vmul.f32 %v5084_v5, %v5084_v5  ;;  %v2310_v25 = vsel %vm192_vm1, %v2302_v6, 0.0  ;;  %v4126_v6 = vld [vmem:[%s5581_s21 + $0x48] sm:$0xff]  }
0x1197   :  { %2294 = vadd.xlane.f32.xlu1 %v2293_v10  ;;  %v2287_v19 = vsel %vm192_vm1, %v5089_v52, 0.0  ;;  %v2301_v60 = vmul.f32 %v5089_v52, %v5089_v52  ;;  %v2304_v20 = vsel %vm192_vm1, %v2300_v8, 0.0 }
0x1198   :  { %v2313_v12 = vsel %vm192_vm1, %v2303_v21, 0.0  ;;  %v4128_v21 = vld [vmem:[%s5581_s21 + $0x58] sm:$0xff]  }
0x1199   :  { %2285 = vadd.xlane.f32.xlu0 %v2284_v59  ;;  %v2307_v34 = vsel %vm192_vm1, %v2301_v60, 0.0 }
0x119b   :  { %2288 = vadd.xlane.f32.xlu1 %v2287_v19 }
0x119d   :  { %2305 = vadd.xlane.f32.xlu0 %v2304_v20  ;;  %v4125_v20 = vld [vmem:[%s5581_s21 + $0x40] sm:$0xff]  }
0x119e   :  { %4007 = vmatprep.subr.bf16.mxu0 %v4125_v20 }
0x119f   :  { %2308 = vadd.xlane.f32.xlu1 %v2307_v34  ;;  %4008 = vmatpush3.bf16.msra.mxu0 %v4125_v20  ;;  %v4127_v34 = vld [vmem:[%s5581_s21 + $0x50] sm:$0xff]  }
0x11a0   :  { %4009 = vmatprep.subr.bf16.mxu0 %v4126_v6  ;;  %v2620_v20 = vld [vmem:[%s5584_s23 + $0x50] sm:$0xff] }
0x11a1   :  { %2311 = vadd.xlane.f32.xlu0 %v2310_v25  ;;  %v4129_v25 = vld [vmem:[%s5581_s21 + $0x60] sm:$0xff]  }
0x11a3   :  { %2314 = vadd.xlane.f32.xlu1 %v2313_v12  ;;  %4010 = vmatpush3.bf16.msra.mxu0 %v4126_v6  ;;  %v4130_v12 = vld [vmem:[%s5581_s21 + $0x68] sm:$0xff]  }
0x11a4   :  { %4011 = vmatprep.subr.bf16.mxu0 %v4127_v34 }
0x11a7   :  { %4012 = vmatpush3.bf16.msra.mxu0 %v4127_v34 }
0x11a8   :  { %4013 = vmatprep.subr.bf16.mxu0 %v4128_v21 }
0x11ab   :  { %4014 = vmatpush3.bf16.msra.mxu0 %v4128_v21  ;;  %v2626_v21 = vld [vmem:[%s5584_s23 + $0x80] sm:$0xff] }
0x11ac   :  { %4015 = vmatprep.subr.bf16.mxu0 %v4129_v25 }
0x11af   :  { %4016 = vmatpush3.bf16.msra.mxu0 %v4129_v25  ;;  %v2634_v25 = vld [vmem:[%s5584_s23 + $0xc0] sm:$0xff] }
0x11b0   :  { %4017 = vmatprep.subr.bf16.mxu0 %v4130_v12 }
0x11b3   :  { %4018 = vmatpush3.bf16.msra.mxu0 %v4130_v12  ;;  %v2628_v12 = vld [vmem:[%s5584_s23 + $0x90] sm:$0xff] }
0x11b4   :  { %4019 = vmatprep.subr.bf16.mxu0 %v4131_v53 }
0x11b7   :  { %4020 = vmatpush3.bf16.msra.mxu0 %v4131_v53  ;;  %v3548_v53 = vcombine.low %v2626_v21, %v2634_v25 }
0x11b8   :  { %4021 = vmatprep.subr.bf16.mxu0 %v4132_v16 }
0x11bb   :  { %4022 = vmatpush3.bf16.msra.mxu0 %v4132_v16  ;;  %v3549_v16 = vcombine.high %v2626_v21, %v2634_v25  ;;  %v2625_v21 = vld [vmem:[%s5584_s23 + $0x78] sm:$0xff] }
0x1222   :  { %v2292_v61 = vpop.xlane.xlu0 %2291 }
0x1223   :  { %v2298_v37 = vmul.f32 0.03125, %v2292_v61  ;;  %v3501_v61 = vld [vmem:[%s5582_s20 + $0x1] ss:$0 sm:$0xff] }
0x1224   :  { %v2295_v2 = vpop.xlane.xlu1 %2294 }
0x1225   :  { %v2299_v13 = vmul.f32 0.03125, %v2295_v2  ;;  %v2322_v11 = vmul.f32 %v2298_v37, %v2298_v37  ;;  %v2330_v57 = vsub.f32 %v5078_v24, %v2298_v37 }
0x1226   :  { %v2286_v47 = vpop.xlane.xlu0 %2285 }
0x1227   :  { %v2296_v58 = vmul.f32 0.03125, %v2286_v47  ;;  %v2323_v33 = vmul.f32 %v2299_v13, %v2299_v13  ;;  %v2331_v62 = vsub.f32 %v5084_v5, %v2299_v13 }
0x1228   :  { %v2289_v32 = vpop.xlane.xlu1 %2288 }
0x1229   :  { %v2297_v35 = vmul.f32 0.03125, %v2289_v32  ;;  %v2320_v45 = vmul.f32 %v2296_v58, %v2296_v58  ;;  %v2328_v15 = vsub.f32 %v5081_v44, %v2296_v58 }
0x122a   :  { %v2306_v48 = vpop.xlane.xlu0 %2305 }
0x122b   :  { %v2316_v28 = vmul.f32 0.03125, %v2306_v48  ;;  %v2321_v54 = vmul.f32 %v2297_v35, %v2297_v35  ;;  %v2329_v17 = vsub.f32 %v5089_v52, %v2297_v35 }
0x122c   :  { %v2309_v4 = vpop.xlane.xlu1 %2308 }
0x122d   :  { %v2324_v43 = vsub.f32 %v2316_v28, %v2320_v45  ;;  %v2317_v49 = vmul.f32 0.03125, %v2309_v4 }
0x122e   :  { %v2312_v14 = vpop.xlane.xlu0 %2311 }
0x122f   :  { %v2332_v63 = vadd.f32 1e-06, %v2324_v43  ;;  %v2325_v46 = vsub.f32 %v2317_v49, %v2321_v54  ;;  %v2318_v29 = vmul.f32 0.03125, %v2312_v14 }
0x1230   :  { %v2315_v41 = vpop.xlane.xlu1 %2314 }
0x1231   :  { %4205 = vrsqrt.f32 %v2332_v63  ;;  %v2333_v39 = vadd.f32 1e-06, %v2325_v46  ;;  %v2326_v22 = vsub.f32 %v2318_v29, %v2322_v11  ;;  %v2319_v42 = vmul.f32 0.03125, %v2315_v41 }
0x1233   :  { %4207 = vrsqrt.f32 %v2333_v39  ;;  %v2334_v26 = vadd.f32 1e-06, %v2326_v22  ;;  %v2327_v50 = vsub.f32 %v2319_v42, %v2323_v33 }
0x1235   :  { %4209 = vrsqrt.f32 %v2334_v26  ;;  %v2335_v30 = vadd.f32 1e-06, %v2327_v50 }
0x1237   :  { %4211 = vrsqrt.f32 %v2335_v30 }
0x123b   :  { %v4206_v7 = vpop.eup %4205 }
0x123c   :  { %v2340_v55 = vmul.f32 %v4206_v7, %v2328_v15 }
0x123d   :  { %v4208_v9 = vpop.eup %4207 }
0x123e   :  { %v2341_v0 = vmul.f32 %v4208_v9, %v2329_v17  ;;  %v2350_v18 = vmul.f32 %v3494_v31, %v2340_v55 }
0x123f   :  { %v4210_v3 = vpop.eup %4209 }
0x1240   :  { %v2342_v36 = vmul.f32 %v4210_v3, %v2330_v57  ;;  %v2351_v40 = vmul.f32 %v3494_v31, %v2341_v0  ;;  %v2360_v1 = vadd.f32 %v3495_v38, %v2350_v18 }
0x1241   :  { %v4212_v23 = vpop.eup %4211 }
0x1242   :  { %v2343_v27 = vmul.f32 %v4212_v23, %v2331_v62  ;;  %v2361_v56 = vadd.f32 %v3495_v38, %v2351_v40  ;;  %v2352_v51 = vmul.f32 %v3494_v31, %v2342_v36 }
0x1244   :  { %v2371_v10 = vpack.c.bf16 %v2361_v56, %v2360_v1  ;;  %v2353_v59 = vmul.f32 %v3494_v31, %v2343_v27  ;;  %v2362_v8 = vadd.f32 %v3495_v38, %v2352_v51 }
0x1246   :  { %4003 = vmatprep.mubr.msk.bf16.mxu1 %vm192_vm1, %v2371_v10  ;;  %v2363_v19 = vadd.f32 %v3495_v38, %v2353_v59  ;;  %v2610_v10 = vld [vmem:[%s5584_s23] sm:$0xff] }
0x1247   :  { %v2618_v59 = vld [vmem:[%s5584_s23 + $0x40] sm:$0xff] }
0x1248   :  { %v2372_v60 = vpack.c.bf16 %v2363_v19, %v2362_v8  ;;  %v3532_v8 = vcombine.low %v2610_v10, %v2618_v59  ;;  %v3533_v19 = vcombine.high %v2610_v10, %v2618_v59 }
0x124a   :  { %4004 = vmatmul.mubr.msk.bf16.vlgmr.msra.gmra.mrb[36].mxu1 %vm192_vm1, %v2372_v60  ;;  %v2612_v60 = vld [vmem:[%s5584_s23 + $0x10] sm:$0xff]  ;;  %2894 = vmatprep.subr.bf16.mxu1 %v3533_v19  ;;  %v2631_v19 = vld [vmem:[%s5584_s23 + $0xa8] sm:$0xff] }
0x124b   :  { %v3536_v6 = vcombine.low %v2612_v60, %v2620_v20  ;;  %v3537_v34 = vcombine.high %v2612_v60, %v2620_v20  ;;  %2895 = vmatpush1.bf16.msra.mxu1 %v3532_v8  ;;  %v2639_v60 = vld [vmem:[%s5584_s23 + $0xe8] sm:$0xff] }
0x124c   :  { %2896 = vmatprep.subr.bf16.mxu1 %v3549_v16  ;;  %v3558_v25 = vcombine.low %v2631_v19, %v2639_v60  ;;  %v2641_v16 = vld [vmem:[%s5584_s23 + $0xf8] sm:$0xff] }
0x124d   :  { %3000 = vmatprep.subr.bf16.mxu0 %v3537_v34  ;;  %v2617_v34 = vld [vmem:[%s5584_s23 + $0x38] sm:$0xff] }
0x124f   :  { %2897 = vmatpush1.bf16.msra.mxu1 %v3548_v53  ;;  %v2633_v53 = vld [vmem:[%s5584_s23 + $0xb8] sm:$0xff] }
0x131d   :  { %v4005_v2 = vpop.f32.mrb[36].mxu1 }
0x131e   :  { %v2440_v47 = vadd.f32 %v4005_v2, %v3501_v61  ;;  %v2431_v58 = vpop.f32.mrb[37].mxu1  ;;  %v4231_v2 = vmov 0  }
0x131f   :  { %v2432_v32 = vadd.f32 %v3501_v61, %v2431_v58  ;;  %v4006_v35 = vpop.f32.mrb[38].mxu1  ;;  %2926 = vmatprep.mubr.bf16.mxu1 %v4231_v2  ;;  %v2619_v58 = vld [vmem:[%s5584_s23 + $0x48] sm:$0xff] }
0x1320   :  { %v2448_v48 = vmul.f32 %v2440_v47, %v2440_v47  ;;  %v2443_v37 = vadd.f32 %v4006_v35, %v3501_v61  ;;  %v2434_v45 = vpop.f32.mrb[39].mxu1 }
0x1321   :  { %v2446_v28 = vmul.f32 %v2432_v32, %v2432_v32  ;;  %v2435_v13 = vadd.f32 %v3501_v61, %v2434_v45  ;;  %v2636_v61 = vld [vmem:[%s5584_s23 + $0xd0] sm:$0xff]  ;;  %v2614_v45 = vld [vmem:[%s5584_s23 + $0x20] sm:$0xff] }
0x1322   :  { %v2452_v4 = vmul.f32 %v2448_v48, %v2440_v47  ;;  %v2449_v54 = vmul.f32 %v2443_v37, %v2443_v37 }
0x1323   :  { %v2450_v43 = vmul.f32 %v2446_v28, %v2432_v32  ;;  %v2447_v49 = vmul.f32 %v2435_v13, %v2435_v13  ;;  %v2622_v28 = vld [vmem:[%s5584_s23 + $0x60] sm:$0xff] }
0x1324   :  { %v2456_v14 = vmul.f32 0.044715, %v2452_v4  ;;  %v2453_v11 = vmul.f32 %v2449_v54, %v2443_v37  ;;  %v3541_v4 = vcombine.high %v2614_v45, %v2622_v28  ;;  %v3523_v54 = vld [vmem:[%s5583_s22 + $0x1] ss:$0 sm:$0xff] }
0x1325   :  { %v2454_v63 = vmul.f32 0.044715, %v2450_v43  ;;  %v2451_v46 = vmul.f32 %v2447_v49, %v2435_v13 }
0x1326   :  { %v2460_v29 = vadd.f32 %v2456_v14, %v2440_v47  ;;  %v2457_v33 = vmul.f32 0.044715, %v2453_v11 }
0x1327   :  { %v2458_v41 = vadd.f32 %v2454_v63, %v2432_v32  ;;  %v2455_v39 = vmul.f32 0.044715, %v2451_v46 }
0x1328   :  { %v2464_v22 = vmul.f32 0.7978846, %v2460_v29  ;;  %v2461_v42 = vadd.f32 %v2457_v33, %v2443_v37 }
0x1329   :  { %v2462_v26 = vmul.f32 0.7978846, %v2458_v41  ;;  %v2459_v50 = vadd.f32 %v2455_v39, %v2435_v13 }
0x132a   :  { %4213 = vtanh.f32 %v2464_v22  ;;  %v2465_v30 = vmul.f32 0.7978846, %v2461_v42  ;;  %v2627_v22 = vld [vmem:[%s5584_s23 + $0x88] sm:$0xff] }
0x132b   :  { %4215 = vtanh.f32 %v2462_v26  ;;  %v2463_v15 = vmul.f32 0.7978846, %v2459_v50  ;;  %v2635_v42 = vld [vmem:[%s5584_s23 + $0xc8] sm:$0xff] }
0x132c   :  { %4217 = vtanh.f32 %v2465_v30 }
0x132d   :  { %4219 = vtanh.f32 %v2463_v15 }
0x1334   :  { %v4214_v7 = vpop.eup %4213 }
0x1335   :  { %v4216_v31 = vpop.eup %4215  ;;  %v2472_v17 = vadd.f32 1.0, %v4214_v7  ;;  %v3551_v7 = vcombine.high %v2627_v22, %v2635_v42 }
0x1336   :  { %v4218_v55 = vpop.eup %4217  ;;  %v2470_v9 = vadd.f32 1.0, %v4216_v31  ;;  %v2613_v31 = vld [vmem:[%s5584_s23 + $0x18] sm:$0xff] }
0x1337   :  { %v4220_v57 = vpop.eup %4219  ;;  %v2476_v0 = vmul.f32 0.5, %v2472_v17  ;;  %v2473_v18 = vadd.f32 1.0, %v4218_v55  ;;  %v3550_v17 = vcombine.low %v2627_v22, %v2635_v42 }
0x1338   :  { %v2471_v3 = vadd.f32 1.0, %v4220_v57  ;;  %v2474_v38 = vmul.f32 0.5, %v2470_v9  ;;  %v2616_v57 = vld [vmem:[%s5584_s23 + $0x30] sm:$0xff] }
0x1339   :  { %v2477_v62 = vmul.f32 0.5, %v2473_v18  ;;  %v2480_v40 = vmul.f32 %v2476_v0, %v2440_v47  ;;  %v2611_v47 = vld [vmem:[%s5584_s23 + $0x8] sm:$0xff]  ;;  %v2624_v0 = vld [vmem:[%s5584_s23 + $0x70] sm:$0xff] }
0x133a   :  { %v2475_v36 = vmul.f32 0.5, %v2471_v3  ;;  %v2478_v27 = vmul.f32 %v2474_v38, %v2432_v32  ;;  %v3553_v32 = vcombine.high %v2628_v12, %v2636_v61  ;;  %v3534_v35 = vcombine.low %v2611_v47, %v2619_v58  ;;  %v2629_v3 = vld [vmem:[%s5584_s23 + $0x98] sm:$0xff] }
0x133b   :  { %v2481_v23 = vmul.f32 %v2477_v62, %v2443_v37  ;;  %v3535_v48 = vcombine.high %v2611_v47, %v2619_v58  ;;  %v3552_v37 = vcombine.low %v2628_v12, %v2636_v61  ;;  %v3545_v18 = vcombine.high %v2616_v57, %v2624_v0  ;;  %v2637_v38 = vld [vmem:[%s5584_s23 + $0xd8] sm:$0xff] }
0x133c   :  { %v2479_v1 = vmul.f32 %v2475_v36, %v2435_v13  ;;  %v3540_v13 = vcombine.low %v2614_v45, %v2622_v28  ;;  %v2632_v36 = vld [vmem:[%s5584_s23 + $0xb0] sm:$0xff]  ;;  %v3554_v10 = vcombine.low %v2629_v3, %v2637_v38  ;;  %v3547_v12 = vcombine.high %v2617_v34, %v2625_v21  ;;  %v5316_v45 = vld [vmem:[%s5585_s24] sm:$0xff] }
0x133d   :  { %v2502_v56 = vpack.c.bf16 %v2481_v23, %v2480_v40  ;;  %2947 = vmatprep.subr.bf16.mxu1 %v3535_v48  ;;  %v2640_v40 = vld [vmem:[%s5584_s23 + $0xf0] sm:$0xff]  ;;  %v3555_v23 = vcombine.high %v2629_v3, %v2637_v38  ;;  %v3546_v61 = vcombine.low %v2617_v34, %v2625_v21  ;;  %v3563_v47 = vcombine.high %v2633_v53, %v2641_v16  ;;  %v5356_v3 = vld [vmem:[%s5585_s24 + $0x8] sm:$0xff] }
0x133e   :  { %v2501_v51 = vpack.c.bf16 %v2479_v1, %v2478_v27  ;;  %v3544_v27 = vcombine.low %v2616_v57, %v2624_v0  ;;  %v2615_v1 = vld [vmem:[%s5584_s23 + $0x28] sm:$0xff]  ;;  %v3560_v8 = vcombine.low %v2632_v36, %v2640_v40  ;;  %v3562_v58 = vcombine.low %v2633_v53, %v2641_v16 }
0x1340   :  { %4023 = vmatprep.mubr.bf16.mxu0 %v2501_v51  ;;  %v3561_v51 = vcombine.high %v2632_v36, %v2640_v40 }
0x1341   :  { %4024 = vmatmul.mubr.bf16.vlgmr.msra.gmra.mrb[48].mxu0 %v2502_v56  ;;  %v2623_v56 = vld [vmem:[%s5584_s23 + $0x68] sm:$0xff] }
0x1342   :  { %3001 = vmatpush1.bf16.msra.mxu0 %v3536_v6  ;;  %3032 = vmatprep.mubr.bf16.mxu0 %v4231_v2  ;;  %v3543_v59 = vcombine.high %v2615_v1, %v2623_v56  ;;  %v3542_v20 = vcombine.low %v2615_v1, %v2623_v56  ;;  %v3559_v6 = vcombine.high %v2631_v19, %v2639_v60 }
0x1343   :  { %3002 = vmatprep.subr.bf16.mxu0 %v3553_v32  ;;  %v2648_v32 = vlaneseq }
0x1346   :  { %3003 = vmatpush1.bf16.msra.mxu0 %v3552_v37 }
0x1347   :  { %3106 = vmatprep.subr.bf16.mxu0 %v3541_v4 }
0x1414   :  { %v4025_v43 = vpop.f32.mrb[48].mxu0 }
0x1415   :  { %v2600_v49 = vadd.f32 %v4025_v43, %v3523_v54  ;;  %v2591_v14 = vpop.f32.mrb[49].mxu0 }
0x1416   :  { %v2592_v11 = vadd.f32 %v3523_v54, %v2591_v14  ;;  %v4026_v63 = vpop.f32.mrb[50].mxu0 }
0x1417   :  { %v2603_v46 = vadd.f32 %v4026_v63, %v3523_v54  ;;  %v2594_v29 = vpop.f32.mrb[51].mxu0  ;;  %v2608_v41 = vadd.f32 %v2600_v49, %v5078_v24  ;;  %v2630_v24 = vld [vmem:[%s5584_s23 + $0xa0] sm:$0xff] }
0x1418   :  { %v2595_v33 = vadd.f32 %v3523_v54, %v2594_v29  ;;  %v2606_v26 = vadd.f32 %v2592_v11, %v5081_v44  ;;  %v2621_v44 = vld [vmem:[%s5584_s23 + $0x58] sm:$0xff] }
0x1419   :  { %v2609_v39 = vadd.f32 %v2603_v46, %v5084_v5  ;;  %v2638_v5 = vld [vmem:[%s5584_s23 + $0xe0] sm:$0xff]  ;;  %v3539_v55 = vcombine.high %v2613_v31, %v2621_v44  ;;  %v3538_v62 = vcombine.low %v2613_v31, %v2621_v44 }
0x141a   :  { %v2607_v50 = vadd.f32 %v2595_v33, %v5089_v52  ;;  %v3557_v52 = vcombine.high %v2630_v24, %v2638_v5  ;;  %v3556_v9 = vcombine.low %v2630_v24, %v2638_v5 }
0x141b   :  { %v5205_v30 = vpack.c.bf16 %v2609_v39, %v2608_v41 }
0x141c   :  { %v5213_v15 = vpack.c.bf16 %v2607_v50, %v2606_v26 }
0x141e   :  { %3564 = vmatmul.mubr.msk.bf16.vlgmr.msra.gmra.mrb[40].mxu1 %vm192_vm1, %v5213_v15  ;;  %3568 = vmatmul.mubr.msk.bf16.vlgmr.msra.gmra.mrb[52].mxu0 %vm192_vm1, %v5213_v15 }
0x141f   :  { %2948 = vmatpush1.bf16.msra.mxu1 %v3534_v35  ;;  %2936 = vmatprep.mubr.bf16.mxu1 %v4231_v2  ;;  %v5309_v35 = vshrl.u32 %v2648_v32, 7 }
0x1420   :  { %2949 = vmatprep.subr.bf16.mxu1 %v3551_v7  ;;  %3042 = vmatprep.mubr.bf16.mxu0 %v4231_v2 }
0x1421   :  { %3107 = vmatpush1.bf16.msra.mxu0 %v3540_v13  ;;  %v2650_v48 = vsub.s32 0, %v5309_v35  ;;  %v2666_v37 = vsub.s32 4, %v5309_v35  ;;  %v2654_v28 = vsub.s32 1, %v5309_v35  ;;  %v2670_v13 = vsub.s32 5, %v5309_v35 }
0x1422   :  { %3108 = vmatprep.subr.bf16.mxu0 %v3557_v52  ;;  %v2662_v38 = vsub.s32 3, %v5309_v35 }
0x1423   :  { %2950 = vmatpush1.bf16.msra.mxu1 %v3550_v17  ;;  %v2667_v4 = vrot.slane %v5316_v45, %v2666_v37  ;;  %v2655_v54 = vrot.slane %v5316_v45, %v2654_v28  ;;  %v2671_v43 = vrot.slane %v5316_v45, %v2670_v13 }
0x1424   :  { %3053 = vmatprep.subr.bf16.mxu1 %v3539_v55  ;;  %v2658_v55 = vsub.s32 2, %v5309_v35 }
0x1425   :  { %3109 = vmatpush1.bf16.msra.mxu0 %v3556_v9 }
0x1426   :  { %3565 = vmatmul.mubr.msk.bf16.gmra.mrb[44].mxu1 %vm192_vm1, %v5205_v30  ;;  %3569 = vmatmul.mubr.msk.bf16.gmra.mrb[56].mxu0 %vm192_vm1, %v5205_v30  ;;  %v2659_v56 = vrot.slane %v5316_v45, %v2658_v55 }
0x1427   :  { %2979 = vmatprep.mubr.bf16.mxu1 %v4231_v2  ;;  %3138 = vmatprep.mubr.bf16.mxu0 %v4231_v2 }
0x1428   :  { %3212 = vmatprep.subr.bf16.mxu0 %v3545_v18 }
0x142e   :  { %3566 = vmatmul.mubr.msk.bf16.vlgmr.msra.gmra.mrb[48].mxu1 %vm192_vm1, %v5213_v15  ;;  %3572 = vmatmul.mubr.msk.bf16.vlgmr.msra.gmra.mrb[60].mxu0 %vm192_vm1, %v5213_v15 }
0x142f   :  { %3054 = vmatpush1.bf16.msra.mxu1 %v3538_v62  ;;  %2989 = vmatprep.mubr.bf16.mxu1 %v4231_v2 }
0x1430   :  { %3055 = vmatprep.subr.bf16.mxu1 %v3555_v23  ;;  %3148 = vmatprep.mubr.bf16.mxu0 %v4231_v2 }
0x1431   :  { %3213 = vmatpush1.bf16.msra.mxu0 %v3544_v27 }
0x1432   :  { %3214 = vmatprep.subr.bf16.mxu0 %v3561_v51  ;;  %v2683_v51 = vrot.slane %v5356_v3, %v2650_v48 }
0x1433   :  { %3056 = vmatpush1.bf16.msra.mxu1 %v3554_v10  ;;  %v2663_v10 = vrot.slane %v5316_v45, %v2662_v38 }
0x1434   :  { %3159 = vmatprep.subr.bf16.mxu1 %v3543_v59  ;;  %v2687_v59 = vrot.slane %v5356_v3, %v2654_v28 }
0x1435   :  { %3215 = vmatpush1.bf16.msra.mxu0 %v3560_v8 }
0x1436   :  { %3567 = vmatmul.mubr.msk.bf16.gmra.mrb[52].mxu1 %vm192_vm1, %v5205_v30  ;;  %3573 = vmatmul.mubr.msk.bf16.gmra.mrb[64].mxu0 %vm192_vm1, %v5205_v30 }
0x1437   :  { %3085 = vmatprep.mubr.bf16.mxu1 %v4231_v2  ;;  %3244 = vmatprep.mubr.bf16.mxu0 %v4231_v2 }
0x143e   :  { %3570 = vmatmul.mubr.msk.bf16.vlgmr.msra.gmra.mrb[56].mxu1 %vm192_vm1, %v5213_v15  ;;  %3576 = vmatmul.mubr.msk.bf16.vlgmr.msra.gmra.mrb[68].mxu0 %vm192_vm1, %v5213_v15 }
0x143f   :  { %3160 = vmatpush1.bf16.msra.mxu1 %v3542_v20  ;;  %3095 = vmatprep.mubr.bf16.mxu1 %v4231_v2 }
0x1440   :  { %3161 = vmatprep.subr.bf16.mxu1 %v3559_v6  ;;  %3254 = vmatprep.mubr.bf16.mxu0 %v4231_v2 }
0x1443   :  { %3162 = vmatpush1.bf16.msra.mxu1 %v3558_v25 }
0x1444   :  { %3265 = vmatprep.subr.bf16.mxu1 %v3547_v12 }
0x1446   :  { %3571 = vmatmul.mubr.msk.bf16.gmra.mrb[60].mxu1 %vm192_vm1, %v5205_v30  ;;  %3577 = vmatmul.mubr.msk.bf16.gmra.mrb[72].mxu0 %vm192_vm1, %v5205_v30 }
0x1447   :  { %3191 = vmatprep.mubr.bf16.mxu1 %v4231_v2 }
0x144e   :  { %3574 = vmatmul.mubr.msk.bf16.vlgmr.msra.gmra.mrb[64].mxu1 %vm192_vm1, %v5213_v15 }
0x144f   :  { %3266 = vmatpush1.bf16.msra.mxu1 %v3546_v61  ;;  %3201 = vmatprep.mubr.bf16.mxu1 %v4231_v2 }
0x1450   :  { %3267 = vmatprep.subr.bf16.mxu1 %v3563_v47 }
0x1453   :  { %3268 = vmatpush1.bf16.msra.mxu1 %v3562_v58 }
0x1456   :  { %3575 = vmatmul.mubr.msk.bf16.gmra.mrb[68].mxu1 %vm192_vm1, %v5205_v30 }
0x1457   :  { %3297 = vmatprep.mubr.bf16.mxu1 %v4231_v2 }
0x145e   :  { %3578 = vmatmul.mubr.msk.bf16.vlgmr.msra.gmra.mrb[72].mxu1 %vm192_vm1, %v5213_v15 }
0x145f   :  { %3307 = vmatprep.mubr.bf16.mxu1 %v4231_v2  ;;  %v2651_v2 = vrot.slane %v5316_v45, %v2650_v48 }
0x1466   :  { %3579 = vmatmul.mubr.msk.bf16.gmra.mrb[76].mxu1 %vm192_vm1, %v5205_v30 }
0x14f1   :  { %v2928_v49 = vpop.f32.mrb[40].mxu1  ;;  %v3034_v14 = vpop.f32.mrb[52].mxu0 }
0x14f2   :  { %v2929_v11 = vadd.f32 %v2928_v49, %v2651_v2  ;;  %v3035_v63 = vadd.f32 %v3034_v14, %v2667_v4  ;;  %v2930_v46 = vpop.f32.mrb[41].mxu1  ;;  %v3036_v29 = vpop.f32.mrb[53].mxu0  ;;  %v2674_v14 = vsub.s32 6, %v5309_v35 }
0x14f3   :  { %v2931_v33 = vadd.f32 %v2930_v46, %v2655_v54  ;;  %v3037_v41 = vadd.f32 %v3036_v29, %v2671_v43  ;;  %v2932_v39 = vpop.f32.mrb[42].mxu1  ;;  %v3038_v22 = vpop.f32.mrb[54].mxu0 }
0x14f4   :  { %3318 = vst [vmem:[%s5586_s25] sm:$0xff] %v2929_v11  ;;  %3322 = vst [vmem:[%s5586_s25 + $0x20] sm:$0xff] %v3035_v63  ;;  %v2933_v42 = vadd.f32 %v2932_v39, %v2651_v2  ;;  %v3039_v26 = vadd.f32 %v3038_v22, %v2667_v4  ;;  %v2934_v50 = vpop.f32.mrb[43].mxu1  ;;  %v3040_v30 = vpop.f32.mrb[55].mxu0 }
0x14f5   :  { %3319 = vst [vmem:[%s5586_s25 + $0x8] sm:$0xff] %v2931_v33  ;;  %3323 = vst [vmem:[%s5586_s25 + $0x28] sm:$0xff] %v3037_v41  ;;  %v2935_v24 = vadd.f32 %v2934_v50, %v2655_v54  ;;  %v3041_v5 = vadd.f32 %v3040_v30, %v2671_v43  ;;  %v2678_v33 = vsub.s32 7, %v5309_v35  ;;  %v2675_v30 = vrot.slane %v5316_v45, %v2674_v14 }
0x14f6   :  { %3334 = vst [vmem:[%s5586_s25 + $0x80] sm:$0xff] %v2933_v42  ;;  %3338 = vst [vmem:[%s5586_s25 + $0xa0] sm:$0xff] %v3039_v26 }
0x14f7   :  { %3335 = vst [vmem:[%s5586_s25 + $0x88] sm:$0xff] %v2935_v24  ;;  %3339 = vst [vmem:[%s5586_s25 + $0xa8] sm:$0xff] %v3041_v5  ;;  %v2699_v24 = vrot.slane %v5356_v3, %v2666_v37  ;;  %v2679_v5 = vrot.slane %v5316_v45, %v2678_v33 }
0x14f9   :  { %v2938_v15 = vpop.f32.mrb[44].mxu1  ;;  %v3044_v7 = vpop.f32.mrb[56].mxu0 }
0x14fa   :  { %v2939_v31 = vadd.f32 %v2938_v15, %v2651_v2  ;;  %v3045_v44 = vadd.f32 %v3044_v7, %v2667_v4  ;;  %v2940_v52 = vpop.f32.mrb[45].mxu1  ;;  %v3046_v17 = vpop.f32.mrb[57].mxu0  ;;  %v2703_v15 = vrot.slane %v5356_v3, %v2670_v13 }
0x14fb   :  { %v2941_v9 = vadd.f32 %v2940_v52, %v2655_v54  ;;  %v3047_v57 = vadd.f32 %v3046_v17, %v2671_v43  ;;  %v2942_v0 = vpop.f32.mrb[46].mxu1  ;;  %v3048_v18 = vpop.f32.mrb[58].mxu0 }
0x14fc   :  { %3350 = vst [vmem:[%s5586_s25 + $0x100] sm:$0xff] %v2939_v31  ;;  %3354 = vst [vmem:[%s5586_s25 + $0x120] sm:$0xff] %v3045_v44  ;;  %v2943_v62 = vadd.f32 %v2942_v0, %v2651_v2  ;;  %v3049_v36 = vadd.f32 %v3048_v18, %v2667_v4  ;;  %v2944_v40 = vpop.f32.mrb[47].mxu1  ;;  %v3050_v23 = vpop.f32.mrb[59].mxu0 }
0x14fd   :  { %3351 = vst [vmem:[%s5586_s25 + $0x108] sm:$0xff] %v2941_v9  ;;  %3355 = vst [vmem:[%s5586_s25 + $0x128] sm:$0xff] %v3047_v57  ;;  %v2945_v27 = vadd.f32 %v2944_v40, %v2655_v54  ;;  %v3051_v1 = vadd.f32 %v3050_v23, %v2671_v43 }
0x14fe   :  { %3366 = vst [vmem:[%s5586_s25 + $0x180] sm:$0xff] %v2943_v62  ;;  %3370 = vst [vmem:[%s5586_s25 + $0x1a0] sm:$0xff] %v3049_v36 }
0x14ff   :  { %3367 = vst [vmem:[%s5586_s25 + $0x188] sm:$0xff] %v2945_v27  ;;  %3371 = vst [vmem:[%s5586_s25 + $0x1a8] sm:$0xff] %v3051_v1 }
0x1501   :  { %v2981_v8 = vpop.f32.mrb[48].mxu1  ;;  %v3140_v19 = vpop.f32.mrb[60].mxu0 }
0x1502   :  { %v2982_v60 = vadd.f32 %v2981_v8, %v2659_v56  ;;  %v3141_v20 = vadd.f32 %v3140_v19, %v2683_v51  ;;  %v2983_v6 = vpop.f32.mrb[49].mxu1  ;;  %v3142_v34 = vpop.f32.mrb[61].mxu0 }
0x1503   :  { %v2984_v21 = vadd.f32 %v2983_v6, %v2663_v10  ;;  %v3143_v25 = vadd.f32 %v3142_v34, %v2687_v59  ;;  %v2985_v12 = vpop.f32.mrb[50].mxu1  ;;  %v3144_v53 = vpop.f32.mrb[62].mxu0 }
0x1504   :  { %3320 = vst [vmem:[%s5586_s25 + $0x10] sm:$0xff] %v2982_v60  ;;  %3326 = vst [vmem:[%s5586_s25 + $0x40] sm:$0xff] %v3141_v20  ;;  %v2986_v16 = vadd.f32 %v2985_v12, %v2659_v56  ;;  %v3145_v61 = vadd.f32 %v3144_v53, %v2683_v51  ;;  %v2987_v47 = vpop.f32.mrb[51].mxu1  ;;  %v3146_v58 = vpop.f32.mrb[63].mxu0 }
0x1505   :  { %3321 = vst [vmem:[%s5586_s25 + $0x18] sm:$0xff] %v2984_v21  ;;  %3327 = vst [vmem:[%s5586_s25 + $0x48] sm:$0xff] %v3143_v25  ;;  %v2988_v32 = vadd.f32 %v2987_v47, %v2663_v10  ;;  %v3147_v48 = vadd.f32 %v3146_v58, %v2687_v59 }
0x1506   :  { %3336 = vst [vmem:[%s5586_s25 + $0x90] sm:$0xff] %v2986_v16  ;;  %3342 = vst [vmem:[%s5586_s25 + $0xc0] sm:$0xff] %v3145_v61  ;;  %v2691_v16 = vrot.slane %v5356_v3, %v2658_v55  ;;  %v2695_v61 = vrot.slane %v5356_v3, %v2662_v38 }
0x1507   :  { %3337 = vst [vmem:[%s5586_s25 + $0x98] sm:$0xff] %v2988_v32  ;;  %3343 = vst [vmem:[%s5586_s25 + $0xc8] sm:$0xff] %v3147_v48 }
0x1509   :  { %v2991_v28 = vpop.f32.mrb[52].mxu1  ;;  %v3150_v2 = vpop.f32.mrb[64].mxu0 }
0x150a   :  { %v2992_v4 = vadd.f32 %v2991_v28, %v2659_v56  ;;  %v3151_v54 = vadd.f32 %v3150_v2, %v2683_v51  ;;  %v2993_v43 = vpop.f32.mrb[53].mxu1  ;;  %v3152_v49 = vpop.f32.mrb[65].mxu0 }
0x150b   :  { %v2994_v11 = vadd.f32 %v2993_v43, %v2663_v10  ;;  %v3153_v63 = vadd.f32 %v3152_v49, %v2687_v59  ;;  %v2995_v46 = vpop.f32.mrb[54].mxu1  ;;  %v3154_v29 = vpop.f32.mrb[66].mxu0 }
0x150c   :  { %3352 = vst [vmem:[%s5586_s25 + $0x110] sm:$0xff] %v2992_v4  ;;  %3358 = vst [vmem:[%s5586_s25 + $0x140] sm:$0xff] %v3151_v54  ;;  %v2996_v41 = vadd.f32 %v2995_v46, %v2659_v56  ;;  %v3155_v39 = vadd.f32 %v3154_v29, %v2683_v51  ;;  %v2997_v22 = vpop.f32.mrb[55].mxu1  ;;  %v3156_v42 = vpop.f32.mrb[67].mxu0 }
0x150d   :  { %3353 = vst [vmem:[%s5586_s25 + $0x118] sm:$0xff] %v2994_v11  ;;  %3359 = vst [vmem:[%s5586_s25 + $0x148] sm:$0xff] %v3153_v63  ;;  %v2998_v26 = vadd.f32 %v2997_v22, %v2663_v10  ;;  %v3157_v50 = vadd.f32 %v3156_v42, %v2687_v59 }
0x150e   :  { %3368 = vst [vmem:[%s5586_s25 + $0x190] sm:$0xff] %v2996_v41  ;;  %3374 = vst [vmem:[%s5586_s25 + $0x1c0] sm:$0xff] %v3155_v39  ;;  %v2707_v41 = vrot.slane %v5356_v3, %v2674_v14  ;;  %v2711_v39 = vrot.slane %v5356_v3, %v2678_v33 }
0x150f   :  { %3369 = vst [vmem:[%s5586_s25 + $0x198] sm:$0xff] %v2998_v26  ;;  %3375 = vst [vmem:[%s5586_s25 + $0x1c8] sm:$0xff] %v3157_v50 }
0x1511   :  { %v3087_v7 = vpop.f32.mrb[56].mxu1  ;;  %v3246_v31 = vpop.f32.mrb[68].mxu0 }
0x1512   :  { %v3088_v44 = vadd.f32 %v3087_v7, %v2675_v30  ;;  %v3247_v37 = vadd.f32 %v3246_v31, %v2699_v24  ;;  %v3089_v52 = vpop.f32.mrb[57].mxu1  ;;  %v3248_v17 = vpop.f32.mrb[69].mxu0 }
0x1513   :  { %v3090_v9 = vadd.f32 %v3089_v52, %v2679_v5  ;;  %v3249_v57 = vadd.f32 %v3248_v17, %v2703_v15  ;;  %v3091_v0 = vpop.f32.mrb[58].mxu1  ;;  %v3250_v18 = vpop.f32.mrb[70].mxu0 }
0x1514   :  { %3324 = vst [vmem:[%s5586_s25 + $0x30] sm:$0xff] %v3088_v44  ;;  %3330 = vst [vmem:[%s5586_s25 + $0x60] sm:$0xff] %v3247_v37  ;;  %v3092_v45 = vadd.f32 %v3091_v0, %v2675_v30  ;;  %v3251_v13 = vadd.f32 %v3250_v18, %v2699_v24  ;;  %v3093_v62 = vpop.f32.mrb[59].mxu1  ;;  %v3252_v36 = vpop.f32.mrb[71].mxu0 }
0x1515   :  { %3325 = vst [vmem:[%s5586_s25 + $0x38] sm:$0xff] %v3090_v9  ;;  %3331 = vst [vmem:[%s5586_s25 + $0x68] sm:$0xff] %v3249_v57  ;;  %v3094_v40 = vadd.f32 %v3093_v62, %v2679_v5  ;;  %v3253_v23 = vadd.f32 %v3252_v36, %v2703_v15 }
0x1516   :  { %3340 = vst [vmem:[%s5586_s25 + $0xb0] sm:$0xff] %v3092_v45  ;;  %3346 = vst [vmem:[%s5586_s25 + $0xe0] sm:$0xff] %v3251_v13 }
0x1517   :  { %3341 = vst [vmem:[%s5586_s25 + $0xb8] sm:$0xff] %v3094_v40  ;;  %3347 = vst [vmem:[%s5586_s25 + $0xe8] sm:$0xff] %v3253_v23 }
0x1519   :  { %v3097_v27 = vpop.f32.mrb[60].mxu1  ;;  %v3256_v1 = vpop.f32.mrb[72].mxu0 }
0x151a   :  { %v3098_v56 = vadd.f32 %v3097_v27, %v2675_v30  ;;  %v3257_v51 = vadd.f32 %v3256_v1, %v2699_v24  ;;  %v3099_v10 = vpop.f32.mrb[61].mxu1  ;;  %v3258_v59 = vpop.f32.mrb[73].mxu0 }
0x151b   :  { %v3100_v8 = vadd.f32 %v3099_v10, %v2679_v5  ;;  %v3259_v19 = vadd.f32 %v3258_v59, %v2703_v15  ;;  %v3101_v60 = vpop.f32.mrb[62].mxu1  ;;  %v3260_v20 = vpop.f32.mrb[74].mxu0 }
0x151c   :  { %3356 = vst [vmem:[%s5586_s25 + $0x130] sm:$0xff] %v3098_v56  ;;  %3362 = vst [vmem:[%s5586_s25 + $0x160] sm:$0xff] %v3257_v51  ;;  %v3102_v6 = vadd.f32 %v3101_v60, %v2675_v30  ;;  %v3261_v34 = vadd.f32 %v3260_v20, %v2699_v24  ;;  %v3103_v21 = vpop.f32.mrb[63].mxu1  ;;  %v3262_v25 = vpop.f32.mrb[75].mxu0 }
0x151d   :  { %3357 = vst [vmem:[%s5586_s25 + $0x138] sm:$0xff] %v3100_v8  ;;  %3363 = vst [vmem:[%s5586_s25 + $0x168] sm:$0xff] %v3259_v19  ;;  %v3104_v12 = vadd.f32 %v3103_v21, %v2679_v5  ;;  %v3263_v53 = vadd.f32 %v3262_v25, %v2703_v15 }
0x151e   :  { %3372 = vst [vmem:[%s5586_s25 + $0x1b0] sm:$0xff] %v3102_v6  ;;  %3378 = vst [vmem:[%s5586_s25 + $0x1e0] sm:$0xff] %v3261_v34 }
0x151f   :  { %3373 = vst [vmem:[%s5586_s25 + $0x1b8] sm:$0xff] %v3104_v12  ;;  %3379 = vst [vmem:[%s5586_s25 + $0x1e8] sm:$0xff] %v3263_v53 }
0x1521   :  { %v3193_v47 = vpop.f32.mrb[64].mxu1 }
0x1522   :  { %v3194_v58 = vadd.f32 %v3193_v47, %v2691_v16  ;;  %v3195_v32 = vpop.f32.mrb[65].mxu1 }
0x1523   :  { %v3196_v48 = vadd.f32 %v3195_v32, %v2695_v61  ;;  %v3197_v28 = vpop.f32.mrb[66].mxu1 }
0x1524   :  { %3328 = vst [vmem:[%s5586_s25 + $0x50] sm:$0xff] %v3194_v58  ;;  %v3198_v55 = vadd.f32 %v3197_v28, %v2691_v16  ;;  %v3199_v2 = vpop.f32.mrb[67].mxu1 }
0x1525   :  { %3329 = vst [vmem:[%s5586_s25 + $0x58] sm:$0xff] %v3196_v48  ;;  %v3200_v4 = vadd.f32 %v3199_v2, %v2695_v61 }
0x1526   :  { %3344 = vst [vmem:[%s5586_s25 + $0xd0] sm:$0xff] %v3198_v55 }
0x1527   :  { %3345 = vst [vmem:[%s5586_s25 + $0xd8] sm:$0xff] %v3200_v4 }
0x1529   :  { %v3203_v38 = vpop.f32.mrb[68].mxu1 }
0x152a   :  { %v3204_v54 = vadd.f32 %v3203_v38, %v2691_v16  ;;  %v3205_v43 = vpop.f32.mrb[69].mxu1 }
0x152b   :  { %v3206_v49 = vadd.f32 %v3205_v43, %v2695_v61  ;;  %v3207_v11 = vpop.f32.mrb[70].mxu1 }
0x152c   :  { %3360 = vst [vmem:[%s5586_s25 + $0x150] sm:$0xff] %v3204_v54  ;;  %v3208_v63 = vadd.f32 %v3207_v11, %v2691_v16  ;;  %v3209_v46 = vpop.f32.mrb[71].mxu1 }
0x152d   :  { %3361 = vst [vmem:[%s5586_s25 + $0x158] sm:$0xff] %v3206_v49  ;;  %v3210_v29 = vadd.f32 %v3209_v46, %v2695_v61 }
0x152e   :  { %3376 = vst [vmem:[%s5586_s25 + $0x1d0] sm:$0xff] %v3208_v63 }
0x152f   :  { %3377 = vst [vmem:[%s5586_s25 + $0x1d8] sm:$0xff] %v3210_v29 }
0x1531   :  { %v3299_v22 = vpop.f32.mrb[72].mxu1 }
0x1532   :  { %v3300_v42 = vadd.f32 %v3299_v22, %v2707_v41  ;;  %v3301_v26 = vpop.f32.mrb[73].mxu1 }
0x1533   :  { %v3302_v50 = vadd.f32 %v3301_v26, %v2711_v39  ;;  %v3303_v30 = vpop.f32.mrb[74].mxu1 }
0x1534   :  { %3332 = vst [vmem:[%s5586_s25 + $0x70] sm:$0xff] %v3300_v42  ;;  %v3304_v24 = vadd.f32 %v3303_v30, %v2707_v41  ;;  %v3305_v5 = vpop.f32.mrb[75].mxu1 }
0x1535   :  { %3333 = vst [vmem:[%s5586_s25 + $0x78] sm:$0xff] %v3302_v50  ;;  %v3306_v14 = vadd.f32 %v3305_v5, %v2711_v39 }
0x1536   :  { %3348 = vst [vmem:[%s5586_s25 + $0xf0] sm:$0xff] %v3304_v24 }
0x1537   :  { %3349 = vst [vmem:[%s5586_s25 + $0xf8] sm:$0xff] %v3306_v14 }
0x1539   :  { %v3309_v35 = vpop.f32.mrb[76].mxu1 }
0x153a   :  { %v3310_v3 = vadd.f32 %v3309_v35, %v2707_v41  ;;  %v3311_v33 = vpop.f32.mrb[77].mxu1 }
0x153b   :  { %v3312_v15 = vadd.f32 %v3311_v33, %v2711_v39  ;;  %v3313_v7 = vpop.f32.mrb[78].mxu1 }
0x153c   :  { %3364 = vst [vmem:[%s5586_s25 + $0x170] sm:$0xff] %v3310_v3  ;;  %v3314_v31 = vadd.f32 %v3313_v7, %v2707_v41  ;;  %v3315_v44 = vpop.f32.mrb[79].mxu1 }
0x153d   :  { %3365 = vst [vmem:[%s5586_s25 + $0x178] sm:$0xff] %v3312_v15  ;;  %v3316_v37 = vadd.f32 %v3315_v44, %v2711_v39 }
0x153e   :  { %3380 = vst [vmem:[%s5586_s25 + $0x1f0] sm:$0xff] %v3314_v31 }
0x153f   :  { %3381 = vst [vmem:[%s5586_s25 + $0x1f8] sm:$0xff] %v3316_v37 }

</bundles_post_ra>
